<compile_context>
chip_gen: v6e
topology: v6e:2x2x1
jax: 0.10.0
libtpu: 0.0.40
codegen_flags: <defaults>
</compile_context>

<pallas_src>
import functools
import math

import jax
import jax.numpy as jnp
from jax import lax
from jax.experimental import pallas as pl
from jax.experimental.pallas import tpu as pltpu


# ----------------------------- model config --------------------------------

CFG = dict(vocab=64, max_pos=16, hidden=128, heads=2, layers=2,
           intermediate=256, n_other=4, num_labels=2)


# ------------------------------ kernel helpers ------------------------------

def _layernorm(x, g, b):
    mu = jnp.mean(x, axis=-1, keepdims=True)
    var = jnp.mean(jnp.square(x - mu), axis=-1, keepdims=True)
    return (x - mu) * lax.rsqrt(var + 1e-12) * g + b


# --------------------------- single fused kernel ----------------------------

def _forward_kernel(*refs, B, S, H, num_heads, layers, vocab, with_loss):
    if with_loss:
        (ids_ref, mask_ref, pos_type_ref, others_ref, labels_ref,
         word_emb_ref, emb_ln_g_ref, emb_ln_b_ref,
         wqkv_ref, bqkv_ref, wo_ref, bo_ref, ln1_g_ref, ln1_b_ref,
         wi_ref, bi_ref, wo2_ref, bo2_ref, ln2_g_ref, ln2_b_ref,
         pool_w_ref, pool_b_ref, cls_w_ref, cls_b_ref,
         ff1_wl_ref, ff1_wo_ref, ff1_b_ref,
         probs_ref, loss_ref) = refs
    else:
        (ids_ref, mask_ref, pos_type_ref, others_ref,
         word_emb_ref, emb_ln_g_ref, emb_ln_b_ref,
         wqkv_ref, bqkv_ref, wo_ref, bo_ref, ln1_g_ref, ln1_b_ref,
         wi_ref, bi_ref, wo2_ref, bo2_ref, ln2_g_ref, ln2_b_ref,
         pool_w_ref, pool_b_ref, cls_w_ref, cls_b_ref,
         ff1_wl_ref, ff1_wo_ref, ff1_b_ref,
         probs_ref) = refs
        labels_ref = loss_ref = None

    f32, bf16 = jnp.float32, jnp.bfloat16
    M = B * S
    Dh = H // num_heads

    # --- embeddings: in-kernel one-hot MXU gather (no XLA gather, no extra call)
    ids = ids_ref[...]                                              # (M, 1) int32
    vocab_iota = lax.broadcasted_iota(jnp.int32, (M, vocab), 1)
    one_hot = (vocab_iota == ids).astype(bf16)                      # (M, vocab)
    x = jnp.dot(one_hot, word_emb_ref[...], preferred_element_type=f32)
    x = x + pos_type_ref[...]                                       # pos + type(0)
    x = _layernorm(x, emb_ln_g_ref[...], emb_ln_b_ref[...])         # (M, H) f32

    attn_mask = mask_ref[...]                                       # (M, M) additive

    # --- encoder layers: static loop over stacked weights (layers = 2) ---
    for l in range(layers):
        # fused QKV projection, one MXU pass over the (H, 3H) bf16 weight;
        # the softmax 1/sqrt(Dh) scale is pre-folded into the Q columns.
        qkv = jnp.dot(x.astype(bf16), wqkv_ref[l],
                      preferred_element_type=f32) + bqkv_ref[l]     # (M, 3H)
        wo_l = wo_ref[l]                                            # (H, H) bf16

        # residual + output-projection bias folded into the accumulator
        attn = x + bo_ref[l]                                        # (M, H) f32

        # Static per-head loop (num_heads = 2; unrolled at trace time).
        for h in range(num_heads):
            lo = h * Dh
            q = qkv[:, lo:lo + Dh]
            k = qkv[:, H + lo:H + lo + Dh]
            v = qkv[:, 2 * H + lo:2 * H + lo + Dh]

            # scores over all B*S rows; block-diag mask keeps sequences separate
            s = lax.dot_general(q.astype(bf16), k.astype(bf16),
                                (((1,), (1,)), ((), ())),
                                preferred_element_type=f32)         # (M, M)
            s = s + attn_mask
            s = s - jnp.max(s, axis=-1, keepdims=True)
            p = jnp.exp(s)
            p = p * pl.reciprocal(jnp.sum(p, axis=-1, keepdims=True), approx=True)

            ctx = jnp.dot(p.astype(bf16), v.astype(bf16),
                          preferred_element_type=f32)               # (M, Dh)

            # fold the per-head slice of the output projection (no concat/merge)
            attn = attn + jnp.dot(ctx.astype(bf16), wo_l[lo:lo + Dh, :],
                                  preferred_element_type=f32)

        # residual already included in attn -> LayerNorm 1 (f32)
        h1 = _layernorm(attn, ln1_g_ref[l], ln1_b_ref[l])

        # FFN: GELU(h1 @ wi + bi) @ wo2 + bo2
        inter = jnp.dot(h1.astype(bf16), wi_ref[l],
                        preferred_element_type=f32) + bi_ref[l]
        # TODO(synk): HF BERT uses erf-GELU; tanh approximation differs ~1e-3.
        inter = 0.5 * inter * (1.0 + jnp.tanh(
            0.7978845608028654 * (inter + 0.044715 * inter * inter * inter)))
        ffn = jnp.dot(inter.astype(bf16), wo2_ref[l],
                      preferred_element_type=f32) + bo2_ref[l]

        x = _layernorm(ffn + h1, ln2_g_ref[l], ln2_b_ref[l])        # (M, H)

    # --- classifier head (fused: CLS already resident in VMEM) ---
    # select the CLS rows (0, S, 2S, ...) via a tiny one-hot MXU matmul
    row_i = lax.broadcasted_iota(jnp.int32, (B, M), 0)
    col_i = lax.broadcasted_iota(jnp.int32, (B, M), 1)
    sel = (col_i == row_i * S).astype(bf16)                         # (B, M)
    cls = jnp.dot(sel, x.astype(bf16), preferred_element_type=f32)  # (B, H)

    pooled = jnp.tanh(jnp.dot(cls.astype(bf16), pool_w_ref[...],
                              preferred_element_type=f32) + pool_b_ref[...])
    logits = jnp.dot(pooled.astype(bf16), cls_w_ref[...],
                     preferred_element_type=f32) + cls_b_ref[...]   # (B, 2)

    # ff1 over cat(logits, others): K=2 / K=4 contractions on the VPU
    # (equivalent to concat + Linear; avoids an f32 MXU push on v5e).
    z = (jnp.sum(logits * ff1_wl_ref[...], axis=-1, keepdims=True)
         + jnp.sum(others_ref[...] * ff1_wo_ref[...], axis=-1, keepdims=True)
         + ff1_b_ref[...])                                          # (B, 1)
    probs = 1.0 / (1.0 + jnp.exp(-z))
    probs_ref[...] = probs

    if with_loss:
        # torch.nn.BCELoss semantics (mean reduction, log clamped at -100)
        y = labels_ref[...]
        logp = jnp.maximum(jnp.log(probs), -100.0)
        log1mp = jnp.maximum(jnp.log(1.0 - probs), -100.0)
        l_elt = -(y * logp + (1.0 - y) * log1mp)
        loss_ref[...] = jnp.sum(l_elt, keepdims=True) / float(l_elt.size)


# ------------------------------ params & glue -------------------------------

def init_params(key, cfg):
    scale = 0.02
    ks = iter(jax.random.split(key, 64))

    def nrm(shape):
        return scale * jax.random.normal(next(ks), shape, jnp.float32)

    H, I, L = cfg["hidden"], cfg["intermediate"], cfg["layers"]
    Dh = H // cfg["heads"]
    inv_sqrt_dh = 1.0 / math.sqrt(Dh)

    # fused QKV weight with the softmax scale folded into the Q columns
    wqkv = nrm((L, H, 3 * H)).at[:, :, :H].multiply(inv_sqrt_dh)
    bqkv = jnp.zeros((L, 1, 3 * H), jnp.float32)   # zero bias (Q block would be
                                                   # scaled identically if nonzero)
    return {
        "word_emb": nrm((cfg["vocab"], H)).astype(jnp.bfloat16),
        "pos_emb": nrm((cfg["max_pos"], H)),
        "type_emb": nrm((2, H)),
        "emb_ln_g": jnp.ones((1, H), jnp.float32),
        "emb_ln_b": jnp.zeros((1, H), jnp.float32),
        # encoder layers, stacked along a leading layer axis (static in-kernel loop)
        "wqkv": wqkv.astype(jnp.bfloat16),
        "bqkv": bqkv,
        "wo": nrm((L, H, H)).astype(jnp.bfloat16),
        "bo": jnp.zeros((L, 1, H), jnp.float32),
        "ln1_g": jnp.ones((L, 1, H), jnp.float32),
        "ln1_b": jnp.zeros((L, 1, H), jnp.float32),
        "wi": nrm((L, H, I)).astype(jnp.bfloat16),
        "bi": jnp.zeros((L, 1, I), jnp.float32),
        "wo2": nrm((L, I, H)).astype(jnp.bfloat16),
        "bo2": jnp.zeros((L, 1, H), jnp.float32),
        "ln2_g": jnp.ones((L, 1, H), jnp.float32),
        "ln2_b": jnp.zeros((L, 1, H), jnp.float32),
        # classifier head
        "pool_w": nrm((H, H)).astype(jnp.bfloat16),
        "pool_b": jnp.zeros((1, H), jnp.float32),
        "cls_w": nrm((H, cfg["num_labels"])).astype(jnp.bfloat16),
        "cls_b": jnp.zeros((1, cfg["num_labels"]), jnp.float32),
        # ff1 over cat(logits, others), pre-split & transposed for the VPU path
        "ff1_wl": nrm((1, cfg["num_labels"])),
        "ff1_wo": nrm((1, cfg["n_other"])),
        "ff1_b": jnp.zeros((1, 1), jnp.float32),
    }


def title_detection_forward(params, input_ids, attention_mask, others,
                            labels=None, cfg=CFG):
    B, S = input_ids.shape
    H = cfg["hidden"]
    M = B * S
    with_loss = labels is not None

    ids = input_ids.reshape(M, 1).astype(jnp.int32)

    # block-diagonal (per-sequence) + key-padding additive attention mask (M, M)
    batch_id = jnp.repeat(jnp.arange(B, dtype=jnp.int32), S)
    same_seq = batch_id[:, None] == batch_id[None, :]
    key_ok = (attention_mask.reshape(-1) > 0)[None, :]
    mask_add = jnp.where(same_seq & key_ok, 0.0, -10000.0).astype(jnp.float32)

    # position + token-type(0) embeddings, tiled to (M, H)
    pos_type = jnp.tile(params["pos_emb"][:S] + params["type_emb"][0][None, :],
                        (B, 1)).astype(jnp.float32)

    args = [ids, mask_add, pos_type, others.astype(jnp.float32)]
    if with_loss:
        args.append(labels.astype(jnp.float32))
    args += [params["word_emb"], params["emb_ln_g"], params["emb_ln_b"],
             params["wqkv"], params["bqkv"], params["wo"], params["bo"],
             params["ln1_g"], params["ln1_b"],
             params["wi"], params["bi"], params["wo2"], params["bo2"],
             params["ln2_g"], params["ln2_b"],
             params["pool_w"], params["pool_b"], params["cls_w"], params["cls_b"],
             params["ff1_wl"], params["ff1_wo"], params["ff1_b"]]

    if with_loss:
        out_shape = (jax.ShapeDtypeStruct((B, 1), jnp.float32),
                     jax.ShapeDtypeStruct((1, 1), jnp.float32))
    else:
        out_shape = jax.ShapeDtypeStruct((B, 1), jnp.float32)

    out = pl.pallas_call(
        functools.partial(_forward_kernel, B=B, S=S, H=H,
                          num_heads=cfg["heads"], layers=cfg["layers"],
                          vocab=cfg["vocab"], with_loss=with_loss),
        out_shape=out_shape,
        # single grid step, everything VMEM-resident (~0.6 MiB total);
        # plenty of headroom even on v7x's 64 MiB VMEM.
        compiler_params=pltpu.CompilerParams(vmem_limit_bytes=32 * 1024 * 1024),
    )(*args)

    if with_loss:
        probs, loss = out
        return loss[0, 0], probs
    return jnp.zeros((), jnp.float32), out
    # NOTE: at real bert-base scale (B*S~16K, H=768, I=3072) this single-block
    # kernel must instead tile M into ~512-1024 row blocks with a K-innermost
    # "arbitrary" axis and an output-resident f32 VMEM accumulator (matmul
    # pattern P3), with roughly half-size tiles on v7x's 64 MiB VMEM.


# --------------------------------- main -------------------------------------

if __name__ == "__main__":
    key = jax.random.PRNGKey(0)
    k_param, k_ids, k_other, k_lbl = jax.random.split(key, 4)

    B, S = 2, 8
    params = init_params(k_param, CFG)

    input_ids = jax.random.randint(k_ids, (B, S), 0, CFG["vocab"], dtype=jnp.int32)
    attention_mask = jnp.array([[1, 1, 1, 1, 1, 1, 1, 1],
                                [1, 1, 1, 1, 1, 0, 0, 0]], dtype=jnp.int32)
    others = jax.random.normal(k_other, (B, CFG["n_other"]), jnp.float32)
    labels = jax.random.bernoulli(k_lbl, 0.5, (B, 1)).astype(jnp.float32)

    @jax.jit
    def run(params, input_ids, attention_mask, others, labels):
        return title_detection_forward(params, input_ids, attention_mask,
                                       others, labels)

    loss, probs = run(params, input_ids, attention_mask, others, labels)
    jax.block_until_ready((loss, probs))

    assert probs.shape == (B, 1) and probs.dtype == jnp.float32
    assert bool(jnp.isfinite(loss)) and bool(jnp.all(jnp.isfinite(probs)))
    print("KERNEL_OK")
</pallas_src>

<mosaic_0001>
module attributes {stable_mosaic.version = 11 : i64} {
  func.func @_forward_kernel(%arg0: memref<16x1xi32, #tpu.memory_space<vmem>>, %arg1: memref<16x16xf32, #tpu.memory_space<vmem>>, %arg2: memref<16x128xf32, #tpu.memory_space<vmem>>, %arg3: memref<2x4xf32, #tpu.memory_space<vmem>>, %arg4: memref<2x1xf32, #tpu.memory_space<vmem>>, %arg5: memref<64x128xbf16, #tpu.memory_space<vmem>>, %arg6: memref<1x128xf32, #tpu.memory_space<vmem>>, %arg7: memref<1x128xf32, #tpu.memory_space<vmem>>, %arg8: memref<2x128x384xbf16, #tpu.memory_space<vmem>>, %arg9: memref<2x1x384xf32, #tpu.memory_space<vmem>>, %arg10: memref<2x128x128xbf16, #tpu.memory_space<vmem>>, %arg11: memref<2x1x128xf32, #tpu.memory_space<vmem>>, %arg12: memref<2x1x128xf32, #tpu.memory_space<vmem>>, %arg13: memref<2x1x128xf32, #tpu.memory_space<vmem>>, %arg14: memref<2x128x256xbf16, #tpu.memory_space<vmem>>, %arg15: memref<2x1x256xf32, #tpu.memory_space<vmem>>, %arg16: memref<2x256x128xbf16, #tpu.memory_space<vmem>>, %arg17: memref<2x1x128xf32, #tpu.memory_space<vmem>>, %arg18: memref<2x1x128xf32, #tpu.memory_space<vmem>>, %arg19: memref<2x1x128xf32, #tpu.memory_space<vmem>>, %arg20: memref<128x128xbf16, #tpu.memory_space<vmem>>, %arg21: memref<1x128xf32, #tpu.memory_space<vmem>>, %arg22: memref<128x2xbf16, #tpu.memory_space<vmem>>, %arg23: memref<1x2xf32, #tpu.memory_space<vmem>>, %arg24: memref<1x2xf32, #tpu.memory_space<vmem>>, %arg25: memref<1x4xf32, #tpu.memory_space<vmem>>, %arg26: memref<1x1xf32, #tpu.memory_space<vmem>>, %arg27: memref<2x1xf32, #tpu.memory_space<vmem>>, %arg28: memref<1x1xf32, #tpu.memory_space<vmem>>) attributes {dimension_semantics = [], scalar_prefetch = 0 : i64, scratch_operands = 0 : i64, tpu.core_type = #tpu.core_type<tc>} {
    %c0 = arith.constant 0 : index
    %c0_0 = arith.constant 0 : index
    %0 = vector.load %arg0[%c0, %c0_0] : memref<16x1xi32, #tpu.memory_space<vmem>>, vector<16x1xi32>
    %1 = tpu.iota {dimensions = array<i32: 1>} : vector<16x64xi32>
    %2 = vector.broadcast %0 : vector<16x1xi32> to vector<16x64xi32>
    %3 = arith.cmpi eq, %1, %2 : vector<16x64xi32>
    %4 = arith.extui %3 : vector<16x64xi1> to vector<16x64xi32>
    %5 = arith.sitofp %4 : vector<16x64xi32> to vector<16x64xf32>
    %6 = arith.truncf %5 : vector<16x64xf32> to vector<16x64xbf16>
    %c0_1 = arith.constant 0 : index
    %c0_2 = arith.constant 0 : index
    %7 = vector.load %arg5[%c0_1, %c0_2] : memref<64x128xbf16, #tpu.memory_space<vmem>>, vector<64x128xbf16>
    %cst = arith.constant dense<0.000000e+00> : vector<16x128xf32>
    %8 = tpu.matmul %6, %7, %cst {dimension_numbers = #tpu.dot_dimension_numbers<[1], [0], [0], [1], [0, 0, 1, 1], [], []>} : vector<16x64xbf16>, vector<64x128xbf16>, vector<16x128xf32> -> vector<16x128xf32>
    %c0_3 = arith.constant 0 : index
    %c0_4 = arith.constant 0 : index
    %9 = vector.load %arg2[%c0_3, %c0_4] : memref<16x128xf32, #tpu.memory_space<vmem>>, vector<16x128xf32>
    %10 = arith.addf %8, %9 : vector<16x128xf32>
    %c0_5 = arith.constant 0 : index
    %c0_6 = arith.constant 0 : index
    %11 = vector.load %arg6[%c0_5, %c0_6] : memref<1x128xf32, #tpu.memory_space<vmem>>, vector<1x128xf32>
    %c0_7 = arith.constant 0 : index
    %c0_8 = arith.constant 0 : index
    %12 = vector.load %arg7[%c0_7, %c0_8] : memref<1x128xf32, #tpu.memory_space<vmem>>, vector<1x128xf32>
    %cst_9 = arith.constant dense<0.000000e+00> : vector<16xf32>
    %13 = vector.multi_reduction <add>, %10, %cst_9 [1] : vector<16x128xf32> to vector<16xf32>
    %14 = vector.shape_cast %13 : vector<16xf32> to vector<16x1xf32>
    %cst_10 = arith.constant 1.280000e+02 : f32
    %15 = vector.broadcast %cst_10 : f32 to vector<16x1xf32>
    %16 = arith.divf %14, %15 : vector<16x1xf32>
    %17 = vector.broadcast %16 : vector<16x1xf32> to vector<16x128xf32>
    %18 = arith.subf %10, %17 : vector<16x128xf32>
    %19 = arith.mulf %18, %18 : vector<16x128xf32>
    %cst_11 = arith.constant dense<0.000000e+00> : vector<16xf32>
    %20 = vector.multi_reduction <add>, %19, %cst_11 [1] : vector<16x128xf32> to vector<16xf32>
    %21 = vector.shape_cast %20 : vector<16xf32> to vector<16x1xf32>
    %cst_12 = arith.constant 1.280000e+02 : f32
    %22 = vector.broadcast %cst_12 : f32 to vector<16x1xf32>
    %23 = arith.divf %21, %22 : vector<16x1xf32>
    %24 = vector.broadcast %16 : vector<16x1xf32> to vector<16x128xf32>
    %25 = arith.subf %10, %24 : vector<16x128xf32>
    %cst_13 = arith.constant 9.99999996E-13 : f32
    %26 = vector.broadcast %cst_13 : f32 to vector<16x1xf32>
    %27 = arith.addf %23, %26 : vector<16x1xf32>
    %28 = math.rsqrt %27 : vector<16x1xf32>
    %29 = vector.broadcast %28 : vector<16x1xf32> to vector<16x128xf32>
    %30 = arith.mulf %25, %29 : vector<16x128xf32>
    %31 = vector.broadcast %11 : vector<1x128xf32> to vector<16x128xf32>
    %32 = arith.mulf %30, %31 : vector<16x128xf32>
    %33 = vector.broadcast %12 : vector<1x128xf32> to vector<16x128xf32>
    %34 = arith.addf %32, %33 : vector<16x128xf32>
    %c0_14 = arith.constant 0 : index
    %c0_15 = arith.constant 0 : index
    %35 = vector.load %arg1[%c0_14, %c0_15] : memref<16x16xf32, #tpu.memory_space<vmem>>, vector<16x16xf32>
    %36 = arith.truncf %34 : vector<16x128xf32> to vector<16x128xbf16>
    %c0_16 = arith.constant 0 : index
    %c0_17 = arith.constant 0 : index
    %c0_18 = arith.constant 0 : index
    %37 = vector.load %arg8[%c0_16, %c0_17, %c0_18] : memref<2x128x384xbf16, #tpu.memory_space<vmem>>, vector<1x128x384xbf16>
    %38 = vector.shape_cast %37 : vector<1x128x384xbf16> to vector<128x384xbf16>
    %cst_19 = arith.constant dense<0.000000e+00> : vector<16x384xf32>
    %39 = tpu.matmul %36, %38, %cst_19 {dimension_numbers = #tpu.dot_dimension_numbers<[1], [0], [0], [1], [0, 0, 1, 1], [], []>} : vector<16x128xbf16>, vector<128x384xbf16>, vector<16x384xf32> -> vector<16x384xf32>
    %c0_20 = arith.constant 0 : index
    %c0_21 = arith.constant 0 : index
    %c0_22 = arith.constant 0 : index
    %40 = vector.load %arg9[%c0_20, %c0_21, %c0_22] : memref<2x1x384xf32, #tpu.memory_space<vmem>>, vector<1x1x384xf32>
    %41 = vector.shape_cast %40 : vector<1x1x384xf32> to vector<1x384xf32>
    %42 = vector.broadcast %41 : vector<1x384xf32> to vector<16x384xf32>
    %43 = arith.addf %39, %42 : vector<16x384xf32>
    %c0_23 = arith.constant 0 : index
    %c0_24 = arith.constant 0 : index
    %c0_25 = arith.constant 0 : index
    %44 = vector.load %arg10[%c0_23, %c0_24, %c0_25] : memref<2x128x128xbf16, #tpu.memory_space<vmem>>, vector<1x128x128xbf16>
    %45 = vector.shape_cast %44 : vector<1x128x128xbf16> to vector<128x128xbf16>
    %c0_26 = arith.constant 0 : index
    %c0_27 = arith.constant 0 : index
    %c0_28 = arith.constant 0 : index
    %46 = vector.load %arg11[%c0_26, %c0_27, %c0_28] : memref<2x1x128xf32, #tpu.memory_space<vmem>>, vector<1x1x128xf32>
    %47 = vector.shape_cast %46 : vector<1x1x128xf32> to vector<1x128xf32>
    %48 = vector.broadcast %47 : vector<1x128xf32> to vector<16x128xf32>
    %49 = arith.addf %34, %48 : vector<16x128xf32>
    %50 = vector.extract_strided_slice %43 {offsets = [0, 0], sizes = [16, 64], strides = [1, 1]} : vector<16x384xf32> to vector<16x64xf32>
    %51 = vector.extract_strided_slice %43 {offsets = [0, 128], sizes = [16, 64], strides = [1, 1]} : vector<16x384xf32> to vector<16x64xf32>
    %52 = vector.extract_strided_slice %43 {offsets = [0, 256], sizes = [16, 64], strides = [1, 1]} : vector<16x384xf32> to vector<16x64xf32>
    %53 = arith.truncf %50 : vector<16x64xf32> to vector<16x64xbf16>
    %54 = arith.truncf %51 : vector<16x64xf32> to vector<16x64xbf16>
    %cst_29 = arith.constant dense<0.000000e+00> : vector<16x16xf32>
    %55 = tpu.matmul %53, %54, %cst_29 {dimension_numbers = #tpu.dot_dimension_numbers<[1], [1], [0], [0], [0, 0, 1, 0], [], []>} : vector<16x64xbf16>, vector<16x64xbf16>, vector<16x16xf32> -> vector<16x16xf32>
    %56 = arith.addf %55, %35 : vector<16x16xf32>
    %cst_30 = arith.constant dense<0xFF800000> : vector<16xf32>
    %57 = vector.multi_reduction <maximumf>, %56, %cst_30 [1] : vector<16x16xf32> to vector<16xf32>
    %58 = vector.shape_cast %57 : vector<16xf32> to vector<16x1xf32>
    %59 = vector.broadcast %58 : vector<16x1xf32> to vector<16x16xf32>
    %60 = arith.subf %56, %59 : vector<16x16xf32>
    %61 = math.exp %60 : vector<16x16xf32>
    %cst_31 = arith.constant dense<0.000000e+00> : vector<16xf32>
    %62 = vector.multi_reduction <add>, %61, %cst_31 [1] : vector<16x16xf32> to vector<16xf32>
    %63 = vector.shape_cast %62 : vector<16xf32> to vector<16x1xf32>
    %64 = tpu.reciprocal %63 {approx = true} : vector<16x1xf32> -> vector<16x1xf32>
    %65 = vector.broadcast %64 : vector<16x1xf32> to vector<16x16xf32>
    %66 = arith.mulf %61, %65 : vector<16x16xf32>
    %67 = arith.truncf %66 : vector<16x16xf32> to vector<16x16xbf16>
    %68 = arith.truncf %52 : vector<16x64xf32> to vector<16x64xbf16>
    %cst_32 = arith.constant dense<0.000000e+00> : vector<16x64xf32>
    %69 = tpu.matmul %67, %68, %cst_32 {dimension_numbers = #tpu.dot_dimension_numbers<[1], [0], [0], [1], [0, 0, 1, 1], [], []>} : vector<16x16xbf16>, vector<16x64xbf16>, vector<16x64xf32> -> vector<16x64xf32>
    %70 = arith.truncf %69 : vector<16x64xf32> to vector<16x64xbf16>
    %71 = vector.extract_strided_slice %45 {offsets = [0, 0], sizes = [64, 128], strides = [1, 1]} : vector<128x128xbf16> to vector<64x128xbf16>
    %cst_33 = arith.constant dense<0.000000e+00> : vector<16x128xf32>
    %72 = tpu.matmul %70, %71, %cst_33 {dimension_numbers = #tpu.dot_dimension_numbers<[1], [0], [0], [1], [0, 0, 1, 1], [], []>} : vector<16x64xbf16>, vector<64x128xbf16>, vector<16x128xf32> -> vector<16x128xf32>
    %73 = arith.addf %49, %72 : vector<16x128xf32>
    %74 = vector.extract_strided_slice %43 {offsets = [0, 64], sizes = [16, 64], strides = [1, 1]} : vector<16x384xf32> to vector<16x64xf32>
    %75 = vector.extract_strided_slice %43 {offsets = [0, 192], sizes = [16, 64], strides = [1, 1]} : vector<16x384xf32> to vector<16x64xf32>
    %76 = vector.extract_strided_slice %43 {offsets = [0, 320], sizes = [16, 64], strides = [1, 1]} : vector<16x384xf32> to vector<16x64xf32>
    %77 = arith.truncf %74 : vector<16x64xf32> to vector<16x64xbf16>
    %78 = arith.truncf %75 : vector<16x64xf32> to vector<16x64xbf16>
    %cst_34 = arith.constant dense<0.000000e+00> : vector<16x16xf32>
    %79 = tpu.matmul %77, %78, %cst_34 {dimension_numbers = #tpu.dot_dimension_numbers<[1], [1], [0], [0], [0, 0, 1, 0], [], []>} : vector<16x64xbf16>, vector<16x64xbf16>, vector<16x16xf32> -> vector<16x16xf32>
    %80 = arith.addf %79, %35 : vector<16x16xf32>
    %cst_35 = arith.constant dense<0xFF800000> : vector<16xf32>
    %81 = vector.multi_reduction <maximumf>, %80, %cst_35 [1] : vector<16x16xf32> to vector<16xf32>
    %82 = vector.shape_cast %81 : vector<16xf32> to vector<16x1xf32>
    %83 = vector.broadcast %82 : vector<16x1xf32> to vector<16x16xf32>
    %84 = arith.subf %80, %83 : vector<16x16xf32>
    %85 = math.exp %84 : vector<16x16xf32>
    %cst_36 = arith.constant dense<0.000000e+00> : vector<16xf32>
    %86 = vector.multi_reduction <add>, %85, %cst_36 [1] : vector<16x16xf32> to vector<16xf32>
    %87 = vector.shape_cast %86 : vector<16xf32> to vector<16x1xf32>
    %88 = tpu.reciprocal %87 {approx = true} : vector<16x1xf32> -> vector<16x1xf32>
    %89 = vector.broadcast %88 : vector<16x1xf32> to vector<16x16xf32>
    %90 = arith.mulf %85, %89 : vector<16x16xf32>
    %91 = arith.truncf %90 : vector<16x16xf32> to vector<16x16xbf16>
    %92 = arith.truncf %76 : vector<16x64xf32> to vector<16x64xbf16>
    %cst_37 = arith.constant dense<0.000000e+00> : vector<16x64xf32>
    %93 = tpu.matmul %91, %92, %cst_37 {dimension_numbers = #tpu.dot_dimension_numbers<[1], [0], [0], [1], [0, 0, 1, 1], [], []>} : vector<16x16xbf16>, vector<16x64xbf16>, vector<16x64xf32> -> vector<16x64xf32>
    %94 = arith.truncf %93 : vector<16x64xf32> to vector<16x64xbf16>
    %95 = vector.extract_strided_slice %45 {offsets = [64, 0], sizes = [64, 128], strides = [1, 1]} : vector<128x128xbf16> to vector<64x128xbf16>
    %cst_38 = arith.constant dense<0.000000e+00> : vector<16x128xf32>
    %96 = tpu.matmul %94, %95, %cst_38 {dimension_numbers = #tpu.dot_dimension_numbers<[1], [0], [0], [1], [0, 0, 1, 1], [], []>} : vector<16x64xbf16>, vector<64x128xbf16>, vector<16x128xf32> -> vector<16x128xf32>
    %97 = arith.addf %73, %96 : vector<16x128xf32>
    %c0_39 = arith.constant 0 : index
    %c0_40 = arith.constant 0 : index
    %c0_41 = arith.constant 0 : index
    %98 = vector.load %arg12[%c0_39, %c0_40, %c0_41] : memref<2x1x128xf32, #tpu.memory_space<vmem>>, vector<1x1x128xf32>
    %99 = vector.shape_cast %98 : vector<1x1x128xf32> to vector<1x128xf32>
    %c0_42 = arith.constant 0 : index
    %c0_43 = arith.constant 0 : index
    %c0_44 = arith.constant 0 : index
    %100 = vector.load %arg13[%c0_42, %c0_43, %c0_44] : memref<2x1x128xf32, #tpu.memory_space<vmem>>, vector<1x1x128xf32>
    %101 = vector.shape_cast %100 : vector<1x1x128xf32> to vector<1x128xf32>
    %cst_45 = arith.constant dense<0.000000e+00> : vector<16xf32>
    %102 = vector.multi_reduction <add>, %97, %cst_45 [1] : vector<16x128xf32> to vector<16xf32>
    %103 = vector.shape_cast %102 : vector<16xf32> to vector<16x1xf32>
    %cst_46 = arith.constant 1.280000e+02 : f32
    %104 = vector.broadcast %cst_46 : f32 to vector<16x1xf32>
    %105 = arith.divf %103, %104 : vector<16x1xf32>
    %106 = vector.broadcast %105 : vector<16x1xf32> to vector<16x128xf32>
    %107 = arith.subf %97, %106 : vector<16x128xf32>
    %108 = arith.mulf %107, %107 : vector<16x128xf32>
    %cst_47 = arith.constant dense<0.000000e+00> : vector<16xf32>
    %109 = vector.multi_reduction <add>, %108, %cst_47 [1] : vector<16x128xf32> to vector<16xf32>
    %110 = vector.shape_cast %109 : vector<16xf32> to vector<16x1xf32>
    %cst_48 = arith.constant 1.280000e+02 : f32
    %111 = vector.broadcast %cst_48 : f32 to vector<16x1xf32>
    %112 = arith.divf %110, %111 : vector<16x1xf32>
    %113 = vector.broadcast %105 : vector<16x1xf32> to vector<16x128xf32>
    %114 = arith.subf %97, %113 : vector<16x128xf32>
    %cst_49 = arith.constant 9.99999996E-13 : f32
    %115 = vector.broadcast %cst_49 : f32 to vector<16x1xf32>
    %116 = arith.addf %112, %115 : vector<16x1xf32>
    %117 = math.rsqrt %116 : vector<16x1xf32>
    %118 = vector.broadcast %117 : vector<16x1xf32> to vector<16x128xf32>
    %119 = arith.mulf %114, %118 : vector<16x128xf32>
    %120 = vector.broadcast %99 : vector<1x128xf32> to vector<16x128xf32>
    %121 = arith.mulf %119, %120 : vector<16x128xf32>
    %122 = vector.broadcast %101 : vector<1x128xf32> to vector<16x128xf32>
    %123 = arith.addf %121, %122 : vector<16x128xf32>
    %124 = arith.truncf %123 : vector<16x128xf32> to vector<16x128xbf16>
    %c0_50 = arith.constant 0 : index
    %c0_51 = arith.constant 0 : index
    %c0_52 = arith.constant 0 : index
    %125 = vector.load %arg14[%c0_50, %c0_51, %c0_52] : memref<2x128x256xbf16, #tpu.memory_space<vmem>>, vector<1x128x256xbf16>
    %126 = vector.shape_cast %125 : vector<1x128x256xbf16> to vector<128x256xbf16>
    %cst_53 = arith.constant dense<0.000000e+00> : vector<16x256xf32>
    %127 = tpu.matmul %124, %126, %cst_53 {dimension_numbers = #tpu.dot_dimension_numbers<[1], [0], [0], [1], [0, 0, 1, 1], [], []>} : vector<16x128xbf16>, vector<128x256xbf16>, vector<16x256xf32> -> vector<16x256xf32>
    %c0_54 = arith.constant 0 : index
    %c0_55 = arith.constant 0 : index
    %c0_56 = arith.constant 0 : index
    %128 = vector.load %arg15[%c0_54, %c0_55, %c0_56] : memref<2x1x256xf32, #tpu.memory_space<vmem>>, vector<1x1x256xf32>
    %129 = vector.shape_cast %128 : vector<1x1x256xf32> to vector<1x256xf32>
    %130 = vector.broadcast %129 : vector<1x256xf32> to vector<16x256xf32>
    %131 = arith.addf %127, %130 : vector<16x256xf32>
    %cst_57 = arith.constant 5.000000e-01 : f32
    %132 = vector.broadcast %cst_57 : f32 to vector<16x256xf32>
    %133 = arith.mulf %132, %131 : vector<16x256xf32>
    %cst_58 = arith.constant 4.471500e-02 : f32
    %134 = vector.broadcast %cst_58 : f32 to vector<16x256xf32>
    %135 = arith.mulf %134, %131 : vector<16x256xf32>
    %136 = arith.mulf %135, %131 : vector<16x256xf32>
    %137 = arith.mulf %136, %131 : vector<16x256xf32>
    %138 = arith.addf %131, %137 : vector<16x256xf32>
    %cst_59 = arith.constant 0.797884583 : f32
    %139 = vector.broadcast %cst_59 : f32 to vector<16x256xf32>
    %140 = arith.mulf %139, %138 : vector<16x256xf32>
    %141 = math.tanh %140 : vector<16x256xf32>
    %cst_60 = arith.constant 1.000000e+00 : f32
    %142 = vector.broadcast %cst_60 : f32 to vector<16x256xf32>
    %143 = arith.addf %142, %141 : vector<16x256xf32>
    %144 = arith.mulf %133, %143 : vector<16x256xf32>
    %145 = arith.truncf %144 : vector<16x256xf32> to vector<16x256xbf16>
    %c0_61 = arith.constant 0 : index
    %c0_62 = arith.constant 0 : index
    %c0_63 = arith.constant 0 : index
    %146 = vector.load %arg16[%c0_61, %c0_62, %c0_63] : memref<2x256x128xbf16, #tpu.memory_space<vmem>>, vector<1x256x128xbf16>
    %147 = vector.shape_cast %146 : vector<1x256x128xbf16> to vector<256x128xbf16>
    %cst_64 = arith.constant dense<0.000000e+00> : vector<16x128xf32>
    %148 = tpu.matmul %145, %147, %cst_64 {dimension_numbers = #tpu.dot_dimension_numbers<[1], [0], [0], [1], [0, 0, 1, 1], [], []>} : vector<16x256xbf16>, vector<256x128xbf16>, vector<16x128xf32> -> vector<16x128xf32>
    %c0_65 = arith.constant 0 : index
    %c0_66 = arith.constant 0 : index
    %c0_67 = arith.constant 0 : index
    %149 = vector.load %arg17[%c0_65, %c0_66, %c0_67] : memref<2x1x128xf32, #tpu.memory_space<vmem>>, vector<1x1x128xf32>
    %150 = vector.shape_cast %149 : vector<1x1x128xf32> to vector<1x128xf32>
    %151 = vector.broadcast %150 : vector<1x128xf32> to vector<16x128xf32>
    %152 = arith.addf %148, %151 : vector<16x128xf32>
    %153 = arith.addf %152, %123 : vector<16x128xf32>
    %c0_68 = arith.constant 0 : index
    %c0_69 = arith.constant 0 : index
    %c0_70 = arith.constant 0 : index
    %154 = vector.load %arg18[%c0_68, %c0_69, %c0_70] : memref<2x1x128xf32, #tpu.memory_space<vmem>>, vector<1x1x128xf32>
    %155 = vector.shape_cast %154 : vector<1x1x128xf32> to vector<1x128xf32>
    %c0_71 = arith.constant 0 : index
    %c0_72 = arith.constant 0 : index
    %c0_73 = arith.constant 0 : index
    %156 = vector.load %arg19[%c0_71, %c0_72, %c0_73] : memref<2x1x128xf32, #tpu.memory_space<vmem>>, vector<1x1x128xf32>
    %157 = vector.shape_cast %156 : vector<1x1x128xf32> to vector<1x128xf32>
    %cst_74 = arith.constant dense<0.000000e+00> : vector<16xf32>
    %158 = vector.multi_reduction <add>, %153, %cst_74 [1] : vector<16x128xf32> to vector<16xf32>
    %159 = vector.shape_cast %158 : vector<16xf32> to vector<16x1xf32>
    %cst_75 = arith.constant 1.280000e+02 : f32
    %160 = vector.broadcast %cst_75 : f32 to vector<16x1xf32>
    %161 = arith.divf %159, %160 : vector<16x1xf32>
    %162 = vector.broadcast %161 : vector<16x1xf32> to vector<16x128xf32>
    %163 = arith.subf %153, %162 : vector<16x128xf32>
    %164 = arith.mulf %163, %163 : vector<16x128xf32>
    %cst_76 = arith.constant dense<0.000000e+00> : vector<16xf32>
    %165 = vector.multi_reduction <add>, %164, %cst_76 [1] : vector<16x128xf32> to vector<16xf32>
    %166 = vector.shape_cast %165 : vector<16xf32> to vector<16x1xf32>
    %cst_77 = arith.constant 1.280000e+02 : f32
    %167 = vector.broadcast %cst_77 : f32 to vector<16x1xf32>
    %168 = arith.divf %166, %167 : vector<16x1xf32>
    %169 = vector.broadcast %161 : vector<16x1xf32> to vector<16x128xf32>
    %170 = arith.subf %153, %169 : vector<16x128xf32>
    %cst_78 = arith.constant 9.99999996E-13 : f32
    %171 = vector.broadcast %cst_78 : f32 to vector<16x1xf32>
    %172 = arith.addf %168, %171 : vector<16x1xf32>
    %173 = math.rsqrt %172 : vector<16x1xf32>
    %174 = vector.broadcast %173 : vector<16x1xf32> to vector<16x128xf32>
    %175 = arith.mulf %170, %174 : vector<16x128xf32>
    %176 = vector.broadcast %155 : vector<1x128xf32> to vector<16x128xf32>
    %177 = arith.mulf %175, %176 : vector<16x128xf32>
    %178 = vector.broadcast %157 : vector<1x128xf32> to vector<16x128xf32>
    %179 = arith.addf %177, %178 : vector<16x128xf32>
    %180 = arith.truncf %179 : vector<16x128xf32> to vector<16x128xbf16>
    %c1 = arith.constant 1 : index
    %c0_79 = arith.constant 0 : index
    %c0_80 = arith.constant 0 : index
    %181 = vector.load %arg8[%c1, %c0_79, %c0_80] : memref<2x128x384xbf16, #tpu.memory_space<vmem>>, vector<1x128x384xbf16>
    %182 = vector.shape_cast %181 : vector<1x128x384xbf16> to vector<128x384xbf16>
    %cst_81 = arith.constant dense<0.000000e+00> : vector<16x384xf32>
    %183 = tpu.matmul %180, %182, %cst_81 {dimension_numbers = #tpu.dot_dimension_numbers<[1], [0], [0], [1], [0, 0, 1, 1], [], []>} : vector<16x128xbf16>, vector<128x384xbf16>, vector<16x384xf32> -> vector<16x384xf32>
    %c1_82 = arith.constant 1 : index
    %c0_83 = arith.constant 0 : index
    %c0_84 = arith.constant 0 : index
    %184 = vector.load %arg9[%c1_82, %c0_83, %c0_84] : memref<2x1x384xf32, #tpu.memory_space<vmem>>, vector<1x1x384xf32>
    %185 = vector.shape_cast %184 : vector<1x1x384xf32> to vector<1x384xf32>
    %186 = vector.broadcast %185 : vector<1x384xf32> to vector<16x384xf32>
    %187 = arith.addf %183, %186 : vector<16x384xf32>
    %c1_85 = arith.constant 1 : index
    %c0_86 = arith.constant 0 : index
    %c0_87 = arith.constant 0 : index
    %188 = vector.load %arg10[%c1_85, %c0_86, %c0_87] : memref<2x128x128xbf16, #tpu.memory_space<vmem>>, vector<1x128x128xbf16>
    %189 = vector.shape_cast %188 : vector<1x128x128xbf16> to vector<128x128xbf16>
    %c1_88 = arith.constant 1 : index
    %c0_89 = arith.constant 0 : index
    %c0_90 = arith.constant 0 : index
    %190 = vector.load %arg11[%c1_88, %c0_89, %c0_90] : memref<2x1x128xf32, #tpu.memory_space<vmem>>, vector<1x1x128xf32>
    %191 = vector.shape_cast %190 : vector<1x1x128xf32> to vector<1x128xf32>
    %192 = vector.broadcast %191 : vector<1x128xf32> to vector<16x128xf32>
    %193 = arith.addf %179, %192 : vector<16x128xf32>
    %194 = vector.extract_strided_slice %187 {offsets = [0, 0], sizes = [16, 64], strides = [1, 1]} : vector<16x384xf32> to vector<16x64xf32>
    %195 = vector.extract_strided_slice %187 {offsets = [0, 128], sizes = [16, 64], strides = [1, 1]} : vector<16x384xf32> to vector<16x64xf32>
    %196 = vector.extract_strided_slice %187 {offsets = [0, 256], sizes = [16, 64], strides = [1, 1]} : vector<16x384xf32> to vector<16x64xf32>
    %197 = arith.truncf %194 : vector<16x64xf32> to vector<16x64xbf16>
    %198 = arith.truncf %195 : vector<16x64xf32> to vector<16x64xbf16>
    %cst_91 = arith.constant dense<0.000000e+00> : vector<16x16xf32>
    %199 = tpu.matmul %197, %198, %cst_91 {dimension_numbers = #tpu.dot_dimension_numbers<[1], [1], [0], [0], [0, 0, 1, 0], [], []>} : vector<16x64xbf16>, vector<16x64xbf16>, vector<16x16xf32> -> vector<16x16xf32>
    %200 = arith.addf %199, %35 : vector<16x16xf32>
    %cst_92 = arith.constant dense<0xFF800000> : vector<16xf32>
    %201 = vector.multi_reduction <maximumf>, %200, %cst_92 [1] : vector<16x16xf32> to vector<16xf32>
    %202 = vector.shape_cast %201 : vector<16xf32> to vector<16x1xf32>
    %203 = vector.broadcast %202 : vector<16x1xf32> to vector<16x16xf32>
    %204 = arith.subf %200, %203 : vector<16x16xf32>
    %205 = math.exp %204 : vector<16x16xf32>
    %cst_93 = arith.constant dense<0.000000e+00> : vector<16xf32>
    %206 = vector.multi_reduction <add>, %205, %cst_93 [1] : vector<16x16xf32> to vector<16xf32>
    %207 = vector.shape_cast %206 : vector<16xf32> to vector<16x1xf32>
    %208 = tpu.reciprocal %207 {approx = true} : vector<16x1xf32> -> vector<16x1xf32>
    %209 = vector.broadcast %208 : vector<16x1xf32> to vector<16x16xf32>
    %210 = arith.mulf %205, %209 : vector<16x16xf32>
    %211 = arith.truncf %210 : vector<16x16xf32> to vector<16x16xbf16>
    %212 = arith.truncf %196 : vector<16x64xf32> to vector<16x64xbf16>
    %cst_94 = arith.constant dense<0.000000e+00> : vector<16x64xf32>
    %213 = tpu.matmul %211, %212, %cst_94 {dimension_numbers = #tpu.dot_dimension_numbers<[1], [0], [0], [1], [0, 0, 1, 1], [], []>} : vector<16x16xbf16>, vector<16x64xbf16>, vector<16x64xf32> -> vector<16x64xf32>
    %214 = arith.truncf %213 : vector<16x64xf32> to vector<16x64xbf16>
    %215 = vector.extract_strided_slice %189 {offsets = [0, 0], sizes = [64, 128], strides = [1, 1]} : vector<128x128xbf16> to vector<64x128xbf16>
    %cst_95 = arith.constant dense<0.000000e+00> : vector<16x128xf32>
    %216 = tpu.matmul %214, %215, %cst_95 {dimension_numbers = #tpu.dot_dimension_numbers<[1], [0], [0], [1], [0, 0, 1, 1], [], []>} : vector<16x64xbf16>, vector<64x128xbf16>, vector<16x128xf32> -> vector<16x128xf32>
    %217 = arith.addf %193, %216 : vector<16x128xf32>
    %218 = vector.extract_strided_slice %187 {offsets = [0, 64], sizes = [16, 64], strides = [1, 1]} : vector<16x384xf32> to vector<16x64xf32>
    %219 = vector.extract_strided_slice %187 {offsets = [0, 192], sizes = [16, 64], strides = [1, 1]} : vector<16x384xf32> to vector<16x64xf32>
    %220 = vector.extract_strided_slice %187 {offsets = [0, 320], sizes = [16, 64], strides = [1, 1]} : vector<16x384xf32> to vector<16x64xf32>
    %221 = arith.truncf %218 : vector<16x64xf32> to vector<16x64xbf16>
    %222 = arith.truncf %219 : vector<16x64xf32> to vector<16x64xbf16>
    %cst_96 = arith.constant dense<0.000000e+00> : vector<16x16xf32>
    %223 = tpu.matmul %221, %222, %cst_96 {dimension_numbers = #tpu.dot_dimension_numbers<[1], [1], [0], [0], [0, 0, 1, 0], [], []>} : vector<16x64xbf16>, vector<16x64xbf16>, vector<16x16xf32> -> vector<16x16xf32>
    %224 = arith.addf %223, %35 : vector<16x16xf32>
    %cst_97 = arith.constant dense<0xFF800000> : vector<16xf32>
    %225 = vector.multi_reduction <maximumf>, %224, %cst_97 [1] : vector<16x16xf32> to vector<16xf32>
    %226 = vector.shape_cast %225 : vector<16xf32> to vector<16x1xf32>
    %227 = vector.broadcast %226 : vector<16x1xf32> to vector<16x16xf32>
    %228 = arith.subf %224, %227 : vector<16x16xf32>
    %229 = math.exp %228 : vector<16x16xf32>
    %cst_98 = arith.constant dense<0.000000e+00> : vector<16xf32>
    %230 = vector.multi_reduction <add>, %229, %cst_98 [1] : vector<16x16xf32> to vector<16xf32>
    %231 = vector.shape_cast %230 : vector<16xf32> to vector<16x1xf32>
    %232 = tpu.reciprocal %231 {approx = true} : vector<16x1xf32> -> vector<16x1xf32>
    %233 = vector.broadcast %232 : vector<16x1xf32> to vector<16x16xf32>
    %234 = arith.mulf %229, %233 : vector<16x16xf32>
    %235 = arith.truncf %234 : vector<16x16xf32> to vector<16x16xbf16>
    %236 = arith.truncf %220 : vector<16x64xf32> to vector<16x64xbf16>
    %cst_99 = arith.constant dense<0.000000e+00> : vector<16x64xf32>
    %237 = tpu.matmul %235, %236, %cst_99 {dimension_numbers = #tpu.dot_dimension_numbers<[1], [0], [0], [1], [0, 0, 1, 1], [], []>} : vector<16x16xbf16>, vector<16x64xbf16>, vector<16x64xf32> -> vector<16x64xf32>
    %238 = arith.truncf %237 : vector<16x64xf32> to vector<16x64xbf16>
    %239 = vector.extract_strided_slice %189 {offsets = [64, 0], sizes = [64, 128], strides = [1, 1]} : vector<128x128xbf16> to vector<64x128xbf16>
    %cst_100 = arith.constant dense<0.000000e+00> : vector<16x128xf32>
    %240 = tpu.matmul %238, %239, %cst_100 {dimension_numbers = #tpu.dot_dimension_numbers<[1], [0], [0], [1], [0, 0, 1, 1], [], []>} : vector<16x64xbf16>, vector<64x128xbf16>, vector<16x128xf32> -> vector<16x128xf32>
    %241 = arith.addf %217, %240 : vector<16x128xf32>
    %c1_101 = arith.constant 1 : index
    %c0_102 = arith.constant 0 : index
    %c0_103 = arith.constant 0 : index
    %242 = vector.load %arg12[%c1_101, %c0_102, %c0_103] : memref<2x1x128xf32, #tpu.memory_space<vmem>>, vector<1x1x128xf32>
    %243 = vector.shape_cast %242 : vector<1x1x128xf32> to vector<1x128xf32>
    %c1_104 = arith.constant 1 : index
    %c0_105 = arith.constant 0 : index
    %c0_106 = arith.constant 0 : index
    %244 = vector.load %arg13[%c1_104, %c0_105, %c0_106] : memref<2x1x128xf32, #tpu.memory_space<vmem>>, vector<1x1x128xf32>
    %245 = vector.shape_cast %244 : vector<1x1x128xf32> to vector<1x128xf32>
    %cst_107 = arith.constant dense<0.000000e+00> : vector<16xf32>
    %246 = vector.multi_reduction <add>, %241, %cst_107 [1] : vector<16x128xf32> to vector<16xf32>
    %247 = vector.shape_cast %246 : vector<16xf32> to vector<16x1xf32>
    %cst_108 = arith.constant 1.280000e+02 : f32
    %248 = vector.broadcast %cst_108 : f32 to vector<16x1xf32>
    %249 = arith.divf %247, %248 : vector<16x1xf32>
    %250 = vector.broadcast %249 : vector<16x1xf32> to vector<16x128xf32>
    %251 = arith.subf %241, %250 : vector<16x128xf32>
    %252 = arith.mulf %251, %251 : vector<16x128xf32>
    %cst_109 = arith.constant dense<0.000000e+00> : vector<16xf32>
    %253 = vector.multi_reduction <add>, %252, %cst_109 [1] : vector<16x128xf32> to vector<16xf32>
    %254 = vector.shape_cast %253 : vector<16xf32> to vector<16x1xf32>
    %cst_110 = arith.constant 1.280000e+02 : f32
    %255 = vector.broadcast %cst_110 : f32 to vector<16x1xf32>
    %256 = arith.divf %254, %255 : vector<16x1xf32>
    %257 = vector.broadcast %249 : vector<16x1xf32> to vector<16x128xf32>
    %258 = arith.subf %241, %257 : vector<16x128xf32>
    %cst_111 = arith.constant 9.99999996E-13 : f32
    %259 = vector.broadcast %cst_111 : f32 to vector<16x1xf32>
    %260 = arith.addf %256, %259 : vector<16x1xf32>
    %261 = math.rsqrt %260 : vector<16x1xf32>
    %262 = vector.broadcast %261 : vector<16x1xf32> to vector<16x128xf32>
    %263 = arith.mulf %258, %262 : vector<16x128xf32>
    %264 = vector.broadcast %243 : vector<1x128xf32> to vector<16x128xf32>
    %265 = arith.mulf %263, %264 : vector<16x128xf32>
    %266 = vector.broadcast %245 : vector<1x128xf32> to vector<16x128xf32>
    %267 = arith.addf %265, %266 : vector<16x128xf32>
    %268 = arith.truncf %267 : vector<16x128xf32> to vector<16x128xbf16>
    %c1_112 = arith.constant 1 : index
    %c0_113 = arith.constant 0 : index
    %c0_114 = arith.constant 0 : index
    %269 = vector.load %arg14[%c1_112, %c0_113, %c0_114] : memref<2x128x256xbf16, #tpu.memory_space<vmem>>, vector<1x128x256xbf16>
    %270 = vector.shape_cast %269 : vector<1x128x256xbf16> to vector<128x256xbf16>
    %cst_115 = arith.constant dense<0.000000e+00> : vector<16x256xf32>
    %271 = tpu.matmul %268, %270, %cst_115 {dimension_numbers = #tpu.dot_dimension_numbers<[1], [0], [0], [1], [0, 0, 1, 1], [], []>} : vector<16x128xbf16>, vector<128x256xbf16>, vector<16x256xf32> -> vector<16x256xf32>
    %c1_116 = arith.constant 1 : index
    %c0_117 = arith.constant 0 : index
    %c0_118 = arith.constant 0 : index
    %272 = vector.load %arg15[%c1_116, %c0_117, %c0_118] : memref<2x1x256xf32, #tpu.memory_space<vmem>>, vector<1x1x256xf32>
    %273 = vector.shape_cast %272 : vector<1x1x256xf32> to vector<1x256xf32>
    %274 = vector.broadcast %273 : vector<1x256xf32> to vector<16x256xf32>
    %275 = arith.addf %271, %274 : vector<16x256xf32>
    %cst_119 = arith.constant 5.000000e-01 : f32
    %276 = vector.broadcast %cst_119 : f32 to vector<16x256xf32>
    %277 = arith.mulf %276, %275 : vector<16x256xf32>
    %cst_120 = arith.constant 4.471500e-02 : f32
    %278 = vector.broadcast %cst_120 : f32 to vector<16x256xf32>
    %279 = arith.mulf %278, %275 : vector<16x256xf32>
    %280 = arith.mulf %279, %275 : vector<16x256xf32>
    %281 = arith.mulf %280, %275 : vector<16x256xf32>
    %282 = arith.addf %275, %281 : vector<16x256xf32>
    %cst_121 = arith.constant 0.797884583 : f32
    %283 = vector.broadcast %cst_121 : f32 to vector<16x256xf32>
    %284 = arith.mulf %283, %282 : vector<16x256xf32>
    %285 = math.tanh %284 : vector<16x256xf32>
    %cst_122 = arith.constant 1.000000e+00 : f32
    %286 = vector.broadcast %cst_122 : f32 to vector<16x256xf32>
    %287 = arith.addf %286, %285 : vector<16x256xf32>
    %288 = arith.mulf %277, %287 : vector<16x256xf32>
    %289 = arith.truncf %288 : vector<16x256xf32> to vector<16x256xbf16>
    %c1_123 = arith.constant 1 : index
    %c0_124 = arith.constant 0 : index
    %c0_125 = arith.constant 0 : index
    %290 = vector.load %arg16[%c1_123, %c0_124, %c0_125] : memref<2x256x128xbf16, #tpu.memory_space<vmem>>, vector<1x256x128xbf16>
    %291 = vector.shape_cast %290 : vector<1x256x128xbf16> to vector<256x128xbf16>
    %cst_126 = arith.constant dense<0.000000e+00> : vector<16x128xf32>
    %292 = tpu.matmul %289, %291, %cst_126 {dimension_numbers = #tpu.dot_dimension_numbers<[1], [0], [0], [1], [0, 0, 1, 1], [], []>} : vector<16x256xbf16>, vector<256x128xbf16>, vector<16x128xf32> -> vector<16x128xf32>
    %c1_127 = arith.constant 1 : index
    %c0_128 = arith.constant 0 : index
    %c0_129 = arith.constant 0 : index
    %293 = vector.load %arg17[%c1_127, %c0_128, %c0_129] : memref<2x1x128xf32, #tpu.memory_space<vmem>>, vector<1x1x128xf32>
    %294 = vector.shape_cast %293 : vector<1x1x128xf32> to vector<1x128xf32>
    %295 = vector.broadcast %294 : vector<1x128xf32> to vector<16x128xf32>
    %296 = arith.addf %292, %295 : vector<16x128xf32>
    %297 = arith.addf %296, %267 : vector<16x128xf32>
    %c1_130 = arith.constant 1 : index
    %c0_131 = arith.constant 0 : index
    %c0_132 = arith.constant 0 : index
    %298 = vector.load %arg18[%c1_130, %c0_131, %c0_132] : memref<2x1x128xf32, #tpu.memory_space<vmem>>, vector<1x1x128xf32>
    %299 = vector.shape_cast %298 : vector<1x1x128xf32> to vector<1x128xf32>
    %c1_133 = arith.constant 1 : index
    %c0_134 = arith.constant 0 : index
    %c0_135 = arith.constant 0 : index
    %300 = vector.load %arg19[%c1_133, %c0_134, %c0_135] : memref<2x1x128xf32, #tpu.memory_space<vmem>>, vector<1x1x128xf32>
    %301 = vector.shape_cast %300 : vector<1x1x128xf32> to vector<1x128xf32>
    %cst_136 = arith.constant dense<0.000000e+00> : vector<16xf32>
    %302 = vector.multi_reduction <add>, %297, %cst_136 [1] : vector<16x128xf32> to vector<16xf32>
    %303 = vector.shape_cast %302 : vector<16xf32> to vector<16x1xf32>
    %cst_137 = arith.constant 1.280000e+02 : f32
    %304 = vector.broadcast %cst_137 : f32 to vector<16x1xf32>
    %305 = arith.divf %303, %304 : vector<16x1xf32>
    %306 = vector.broadcast %305 : vector<16x1xf32> to vector<16x128xf32>
    %307 = arith.subf %297, %306 : vector<16x128xf32>
    %308 = arith.mulf %307, %307 : vector<16x128xf32>
    %cst_138 = arith.constant dense<0.000000e+00> : vector<16xf32>
    %309 = vector.multi_reduction <add>, %308, %cst_138 [1] : vector<16x128xf32> to vector<16xf32>
    %310 = vector.shape_cast %309 : vector<16xf32> to vector<16x1xf32>
    %cst_139 = arith.constant 1.280000e+02 : f32
    %311 = vector.broadcast %cst_139 : f32 to vector<16x1xf32>
    %312 = arith.divf %310, %311 : vector<16x1xf32>
    %313 = vector.broadcast %305 : vector<16x1xf32> to vector<16x128xf32>
    %314 = arith.subf %297, %313 : vector<16x128xf32>
    %cst_140 = arith.constant 9.99999996E-13 : f32
    %315 = vector.broadcast %cst_140 : f32 to vector<16x1xf32>
    %316 = arith.addf %312, %315 : vector<16x1xf32>
    %317 = math.rsqrt %316 : vector<16x1xf32>
    %318 = vector.broadcast %317 : vector<16x1xf32> to vector<16x128xf32>
    %319 = arith.mulf %314, %318 : vector<16x128xf32>
    %320 = vector.broadcast %299 : vector<1x128xf32> to vector<16x128xf32>
    %321 = arith.mulf %319, %320 : vector<16x128xf32>
    %322 = vector.broadcast %301 : vector<1x128xf32> to vector<16x128xf32>
    %323 = arith.addf %321, %322 : vector<16x128xf32>
    %324 = tpu.iota {dimensions = array<i32: 0>} : vector<2x16xi32>
    %325 = tpu.iota {dimensions = array<i32: 1>} : vector<2x16xi32>
    %c8_i32 = arith.constant 8 : i32
    %326 = vector.broadcast %c8_i32 : i32 to vector<2x16xi32>
    %327 = arith.muli %324, %326 : vector<2x16xi32>
    %328 = arith.cmpi eq, %325, %327 : vector<2x16xi32>
    %329 = arith.extui %328 : vector<2x16xi1> to vector<2x16xi32>
    %330 = arith.sitofp %329 : vector<2x16xi32> to vector<2x16xf32>
    %331 = arith.truncf %330 : vector<2x16xf32> to vector<2x16xbf16>
    %332 = arith.truncf %323 : vector<16x128xf32> to vector<16x128xbf16>
    %cst_141 = arith.constant dense<0.000000e+00> : vector<2x128xf32>
    %333 = tpu.matmul %331, %332, %cst_141 {dimension_numbers = #tpu.dot_dimension_numbers<[1], [0], [0], [1], [0, 0, 1, 1], [], []>} : vector<2x16xbf16>, vector<16x128xbf16>, vector<2x128xf32> -> vector<2x128xf32>
    %334 = arith.truncf %333 : vector<2x128xf32> to vector<2x128xbf16>
    %c0_142 = arith.constant 0 : index
    %c0_143 = arith.constant 0 : index
    %335 = vector.load %arg20[%c0_142, %c0_143] : memref<128x128xbf16, #tpu.memory_space<vmem>>, vector<128x128xbf16>
    %cst_144 = arith.constant dense<0.000000e+00> : vector<2x128xf32>
    %336 = tpu.matmul %334, %335, %cst_144 {dimension_numbers = #tpu.dot_dimension_numbers<[1], [0], [0], [1], [0, 0, 1, 1], [], []>} : vector<2x128xbf16>, vector<128x128xbf16>, vector<2x128xf32> -> vector<2x128xf32>
    %c0_145 = arith.constant 0 : index
    %c0_146 = arith.constant 0 : index
    %337 = vector.load %arg21[%c0_145, %c0_146] : memref<1x128xf32, #tpu.memory_space<vmem>>, vector<1x128xf32>
    %338 = vector.broadcast %337 : vector<1x128xf32> to vector<2x128xf32>
    %339 = arith.addf %336, %338 : vector<2x128xf32>
    %340 = math.tanh %339 : vector<2x128xf32>
    %341 = arith.truncf %340 : vector<2x128xf32> to vector<2x128xbf16>
    %c0_147 = arith.constant 0 : index
    %c0_148 = arith.constant 0 : index
    %342 = vector.load %arg22[%c0_147, %c0_148] : memref<128x2xbf16, #tpu.memory_space<vmem>>, vector<128x2xbf16>
    %cst_149 = arith.constant dense<0.000000e+00> : vector<2x2xf32>
    %343 = tpu.matmul %341, %342, %cst_149 {dimension_numbers = #tpu.dot_dimension_numbers<[1], [0], [0], [1], [0, 0, 1, 1], [], []>} : vector<2x128xbf16>, vector<128x2xbf16>, vector<2x2xf32> -> vector<2x2xf32>
    %c0_150 = arith.constant 0 : index
    %c0_151 = arith.constant 0 : index
    %344 = vector.load %arg23[%c0_150, %c0_151] : memref<1x2xf32, #tpu.memory_space<vmem>>, vector<1x2xf32>
    %345 = vector.broadcast %344 : vector<1x2xf32> to vector<2x2xf32>
    %346 = arith.addf %343, %345 : vector<2x2xf32>
    %c0_152 = arith.constant 0 : index
    %c0_153 = arith.constant 0 : index
    %347 = vector.load %arg24[%c0_152, %c0_153] : memref<1x2xf32, #tpu.memory_space<vmem>>, vector<1x2xf32>
    %348 = vector.broadcast %347 : vector<1x2xf32> to vector<2x2xf32>
    %349 = arith.mulf %346, %348 : vector<2x2xf32>
    %cst_154 = arith.constant dense<0.000000e+00> : vector<2xf32>
    %350 = vector.multi_reduction <add>, %349, %cst_154 [1] : vector<2x2xf32> to vector<2xf32>
    %351 = vector.shape_cast %350 : vector<2xf32> to vector<2x1xf32>
    %c0_155 = arith.constant 0 : index
    %c0_156 = arith.constant 0 : index
    %352 = vector.load %arg3[%c0_155, %c0_156] : memref<2x4xf32, #tpu.memory_space<vmem>>, vector<2x4xf32>
    %c0_157 = arith.constant 0 : index
    %c0_158 = arith.constant 0 : index
    %353 = vector.load %arg25[%c0_157, %c0_158] : memref<1x4xf32, #tpu.memory_space<vmem>>, vector<1x4xf32>
    %354 = vector.broadcast %353 : vector<1x4xf32> to vector<2x4xf32>
    %355 = arith.mulf %352, %354 : vector<2x4xf32>
    %cst_159 = arith.constant dense<0.000000e+00> : vector<2xf32>
    %356 = vector.multi_reduction <add>, %355, %cst_159 [1] : vector<2x4xf32> to vector<2xf32>
    %357 = vector.shape_cast %356 : vector<2xf32> to vector<2x1xf32>
    %358 = arith.addf %351, %357 : vector<2x1xf32>
    %c0_160 = arith.constant 0 : index
    %c0_161 = arith.constant 0 : index
    %359 = vector.load %arg26[%c0_160, %c0_161] : memref<1x1xf32, #tpu.memory_space<vmem>>, vector<1x1xf32>
    %360 = vector.broadcast %359 : vector<1x1xf32> to vector<2x1xf32>
    %361 = arith.addf %358, %360 : vector<2x1xf32>
    %cst_162 = arith.constant 0.000000e+00 : f32
    %362 = vector.broadcast %cst_162 : f32 to vector<2x1xf32>
    %363 = arith.subf %362, %361 : vector<2x1xf32>
    %364 = math.exp %363 : vector<2x1xf32>
    %cst_163 = arith.constant 1.000000e+00 : f32
    %365 = vector.broadcast %cst_163 : f32 to vector<2x1xf32>
    %366 = arith.addf %365, %364 : vector<2x1xf32>
    %cst_164 = arith.constant 1.000000e+00 : f32
    %367 = vector.broadcast %cst_164 : f32 to vector<2x1xf32>
    %368 = arith.divf %367, %366 : vector<2x1xf32>
    %c0_165 = arith.constant 0 : index
    %c0_166 = arith.constant 0 : index
    %369 = vector.load %arg27[%c0_165, %c0_166] : memref<2x1xf32, #tpu.memory_space<vmem>>, vector<2x1xf32>
    tpu.vector_store %arg27[%c0_165, %c0_166], %368 {strides = array<i32>} : memref<2x1xf32, #tpu.memory_space<vmem>>, vector<2x1xf32>,
    %c0_167 = arith.constant 0 : index
    %c0_168 = arith.constant 0 : index
    %370 = vector.load %arg4[%c0_167, %c0_168] : memref<2x1xf32, #tpu.memory_space<vmem>>, vector<2x1xf32>
    %371 = math.log %368 : vector<2x1xf32>
    %cst_169 = arith.constant -1.000000e+02 : f32
    %372 = vector.broadcast %cst_169 : f32 to vector<2x1xf32>
    %373 = arith.maximumf %371, %372 : vector<2x1xf32>
    %cst_170 = arith.constant 1.000000e+00 : f32
    %374 = vector.broadcast %cst_170 : f32 to vector<2x1xf32>
    %375 = arith.subf %374, %368 : vector<2x1xf32>
    %376 = math.log %375 : vector<2x1xf32>
    %cst_171 = arith.constant -1.000000e+02 : f32
    %377 = vector.broadcast %cst_171 : f32 to vector<2x1xf32>
    %378 = arith.maximumf %376, %377 : vector<2x1xf32>
    %379 = arith.mulf %370, %373 : vector<2x1xf32>
    %cst_172 = arith.constant 1.000000e+00 : f32
    %380 = vector.broadcast %cst_172 : f32 to vector<2x1xf32>
    %381 = arith.subf %380, %370 : vector<2x1xf32>
    %382 = arith.mulf %381, %378 : vector<2x1xf32>
    %383 = arith.addf %379, %382 : vector<2x1xf32>
    %cst_173 = arith.constant 0.000000e+00 : f32
    %384 = vector.broadcast %cst_173 : f32 to vector<2x1xf32>
    %385 = arith.subf %384, %383 : vector<2x1xf32>
    %386 = vector.shape_cast %385 : vector<2x1xf32> to vector<1x2x1xf32>
    %cst_174 = arith.constant dense<0.000000e+00> : vector<1xf32>
    %387 = vector.multi_reduction <add>, %386, %cst_174 [1, 2] : vector<1x2x1xf32> to vector<1xf32>
    %388 = vector.shape_cast %387 : vector<1xf32> to vector<1x1x1xf32>
    %389 = vector.extract %388[0, 0, 0] : f32 from vector<1x1x1xf32>
    %390 = vector.broadcast %389 : f32 to vector<1x1xf32>
    %cst_175 = arith.constant 2.000000e+00 : f32
    %391 = vector.broadcast %cst_175 : f32 to vector<1x1xf32>
    %392 = arith.divf %390, %391 : vector<1x1xf32>
    %c0_176 = arith.constant 0 : index
    %c0_177 = arith.constant 0 : index
    %393 = vector.load %arg28[%c0_176, %c0_177] : memref<1x1xf32, #tpu.memory_space<vmem>>, vector<1x1xf32>
    tpu.vector_store %arg28[%c0_176, %c0_177], %392 {strides = array<i32>} : memref<1x1xf32, #tpu.memory_space<vmem>>, vector<1x1xf32>,
    return
  }
}

</mosaic_0001>

<bundles_post_ra>
// kernel: eq.8
= control target key start
LH: loop header
LB: loop body
LE: loop exit
PB: predicated region body
PF: predicated region fallthrough
CT: control target
= control target key end

     0   :  { %vm8_vm0 = vcmask 64512   ;;  %vm14_vm1 = vcmask 130112   ;;  %s42_s0 = inlined_call_operand.vmem [shape: s32[2,8], index: 0, kind: input, shape index: {}]   ;;  %s43_s1 = inlined_call_operand.vmem [shape: s32[16], index: 1, kind: output, shape index: {}]  }
   0x1   :  { %v5_v0 = vld [vmem:[%s42_s0] sm:$0x3]  ;;  %s25_s0 = smov 8  }
   0x2   :  { %6 = vst [vmem:[#allocation1] sm:$0x3] %v5_v0 }
   0x9   :  { %v11_v1 = vld [vmem:[#allocation1 + $0x1] sm:$0x1]   ;;  %v7_v2 = vld [vmem:[#allocation1] sm:$0x1]  }
   0xa   :  { %12 = vrot.lane.b32.xlu0 %v11_v1, %s25_s0  ;;  %9 = vst.msk [vmem:[#allocation0] sm:$0x1] %vm8_vm0, %v7_v2  }
  0x7c   :  { %v13_v3 = vpop.permute.xlu0 %12  }
  0x7d   :  { %15 = vst.msk [vmem:[#allocation0] sm:$0x1] %vm14_vm1, %v13_v3  }
  0x84   :  { %v20_v4 = vld [vmem:[#allocation0] sm:$0x1] }
  0x85   :  { %23 = vst [vmem:[%s43_s1] sm:$0x1] %v20_v4 }

// kernel: run.1
= control target key start
LH: loop header
LB: loop body
LE: loop exit
PB: predicated region body
PF: predicated region fallthrough
CT: control target
= control target key end

     0   :  { %s4934_s0 = inlined_call_operand.vmem [shape: s32[16,1], index: 0, kind: input, shape index: {}]   ;;  %s4935_s1 = inlined_call_operand.vmem [shape: f32[16,16], index: 1, kind: input, shape index: {}]   ;;  %s4936_s2 = inlined_call_operand.vmem [shape: f32[16,128], index: 2, kind: input, shape index: {}]   ;;  %s4937_s3 = inlined_call_operand.vmem [shape: f32[2,4], index: 3, kind: input, shape index: {}]   ;;  %s4938_s4 = inlined_call_operand.vmem [shape: f32[2,1], index: 4, kind: input, shape index: {}]   ;;  %s4939_s5 = inlined_call_operand.hbm [shape: bf16[64,128], index: 5, kind: input, shape index: {}]   ;;  %s4940_s6 = inlined_call_operand.hbm [shape: f32[1,128], index: 6, kind: input, shape index: {}]   ;;  %s4941_s7 = inlined_call_operand.hbm [shape: f32[1,128], index: 7, kind: input, shape index: {}]   ;;  %s4942_s8 = inlined_call_operand.hbm [shape: bf16[2,128,384], index: 8, kind: input, shape index: {}]   ;;  %s4943_s9 = inlined_call_operand.hbm [shape: f32[2,1,384], index: 9, kind: input, shape index: {}]   ;;  %s4944_s10 = inlined_call_operand.vmem [shape: bf16[2,128,128], index: 10, kind: input, shape index: {}]   ;;  %s4945_s11 = inlined_call_operand.hbm [shape: f32[2,1,128], index: 11, kind: input, shape index: {}]   ;;  %s4946_s12 = inlined_call_operand.hbm [shape: f32[2,1,128], index: 12, kind: input, shape index: {}]   ;;  %s4947_s13 = inlined_call_operand.hbm [shape: f32[2,1,128], index: 13, kind: input, shape index: {}]   ;;  %s4948_s14 = inlined_call_operand.hbm [shape: bf16[2,128,256], index: 14, kind: input, shape index: {}]   ;;  %s4949_s15 = inlined_call_operand.hbm [shape: f32[2,1,256], index: 15, kind: input, shape index: {}]   ;;  %s4950_s16 = inlined_call_operand.hbm [shape: bf16[2,256,128], index: 16, kind: input, shape index: {}]   ;;  %s4951_s17 = inlined_call_operand.hbm [shape: f32[2,1,128], index: 17, kind: input, shape index: {}]   ;;  %s4952_s18 = inlined_call_operand.hbm [shape: f32[2,1,128], index: 18, kind: input, shape index: {}]   ;;  %s4953_s19 = inlined_call_operand.hbm [shape: f32[2,1,128], index: 19, kind: input, shape index: {}]   ;;  %s4954_s20 = inlined_call_operand.vmem [shape: bf16[128,128], index: 20, kind: input, shape index: {}]   ;;  %s4955_s21 = inlined_call_operand.hbm [shape: f32[1,128], index: 21, kind: input, shape index: {}]   ;;  %s4956_s22 = inlined_call_operand.vmem [shape: bf16[128,2], index: 22, kind: input, shape index: {}]   ;;  %s4957_s23 = inlined_call_operand.hbm [shape: f32[1,2], index: 23, kind: input, shape index: {}]   ;;  %s4958_s24 = inlined_call_operand.hbm [shape: f32[1,2], index: 24, kind: input, shape index: {}]   ;;  %s4959_s25 = inlined_call_operand.hbm [shape: f32[1,4], index: 25, kind: input, shape index: {}]   ;;  %s4960_s26 = inlined_call_operand.<no memory space> [shape: f32[1,1], index: 26, kind: input, shape index: {}]   ;;  %s4961_s27 = inlined_call_operand.vmem [shape: f32[2,1], index: 27, kind: output, shape index: {0}]   ;;  %s4962_s28 = inlined_call_operand.hbm [shape: f32[1,1], index: 28, kind: output, shape index: {1}]  }
   0x1   :  { %4967 = sst [smem:[#allocation44_spill]] %s4934_s0  ;;  %v34_v0 = vstv %s4960_s26 }
   0x2   :  { %4968 = sst [smem:[#allocation45_spill]] %s4935_s1  ;;  %35 = vst [vmem:[#allocation2] sm:$0x1] %v34_v0 }
   0x3   :  { %4969 = sst [smem:[#allocation46_spill]] %s4936_s2 }
   0x4   :  { %4970 = sst [smem:[#allocation47_spill]] %s4937_s3 }
   0x5   :  { %4971 = sst [smem:[#allocation48_spill]] %s4938_s4 }
   0x6   :  { %4972 = sst [smem:[#allocation49_spill]] %s4939_s5 }
   0x7   :  { %4973 = sst [smem:[#allocation50_spill]] %s4940_s6 }
   0x8   :  { %4974 = sst [smem:[#allocation51_spill]] %s4941_s7 }
   0x9   :  { %4975 = sst [smem:[#allocation52_spill]] %s4942_s8 }
   0xa   :  { %4976 = sst [smem:[#allocation53_spill]] %s4943_s9 }
   0xb   :  { %4977 = sst [smem:[#allocation54_spill]] %s4944_s10 }
   0xc   :  { %4978 = sst [smem:[#allocation55_spill]] %s4945_s11 }
   0xd   :  { %4979 = sst [smem:[#allocation56_spill]] %s4946_s12 }
   0xe   :  { %36 = vsyncpa [#allocation4], 0 }
   0xf   :  { %37 = vsyncpa [#allocation7], 0 }
  0x10   :  { %38 = vsyncpa [#allocation10], 0 }
  0x11   :  { %39 = vsyncpa [#allocation13], 0 }
  0x12   :  { %40 = vsyncpa [#allocation16], 0 }
  0x13   :  { %41 = vsyncpa [#allocation19], 0 }
  0x14   :  { %42 = vsyncpa [#allocation22], 0 }
  0x15   :  { %43 = vsyncpa [#allocation25], 0 }
  0x16   :  { %44 = vsyncpa [#allocation28], 0 }
  0x17   :  { %45 = vsyncpa [#allocation31], 0 }
  0x18   :  { %46 = vsyncpa [#allocation5], 0  ;;  %s4300_s9 = smov [#allocation6]   ;;  %s4301_s3 = smov [#allocation9]  }
  0x19   :  { %s75_s30 = sshll.u32 %s4300_s9, 4  ;;  %s94_s6 = sshll.u32 %s4301_s3, 4  ;;  %s76_s30 = int_to_ptr.vmem [resolvable:$true] %s75_s30  ;;  %s95_s6 = int_to_ptr.vmem [resolvable:$true] %s94_s6 }
  0x1a   :  { %s3906_s10 = scalar_lea.vmem %s76_s30, 16  ;;  %s3910_s26 = scalar_lea.vmem %s76_s30, 32 }
  0x1b   :  { %p3907_p0 = scmp.ne.s32.totalorder %s76_s30, %s3906_s10  ;;  %p3911_p1 = scmp.lt.s32.totalorder %s76_s30, %s76_s30 }
  0x1c   :  { %p3912_p2 = scmp.lt.s32.totalorder %s3910_s26, %s3906_s10 }
  0x1e   :  { %p3913_p3 = por %p3912_p2, %p3911_p1 }
  0x20   :  { %p3914_p4 = pnand %p3913_p3, %p3907_p0 }
  0x22   :  { %3917 = shalt.err (!%p3914_p4)
}
  0x23   :  { %s4980_s29 = sld [smem:[#allocation50_spill]]  ;;  %s3926_s2 = scalar_lea.vmem %s95_s6, 6144 }
  0x24   :  { %p3927_p5 = scmp.ne.s32.totalorder %s95_s6, %s3926_s2  ;;  %p3931_p6 = scmp.lt.s32.totalorder %s95_s6, %s95_s6 }
  0x25   :  { %p3932_p7 = scmp.lt.s32.totalorder %s3926_s2, %s3926_s2 }
  0x27   :  { %p3933_p8 = por %p3932_p7, %p3931_p6 }
  0x29   :  { %78 = dma.hbm_to_vmem [thread:$0]  %s4980_s29, 16, %s76_s30, [#allocation7]  }
  0x2a   :  { %p3934_p9 = pnand %p3933_p8, %p3927_p5 }
  0x2c   :  { %3937 = shalt.err (!%p3934_p9)
}
  0x2d   :  { %s4302_s7 = smov 192   ;;  %s4303_s12 = smov 12  }
  0x2e   :  { %s4981_s8 = sld [smem:[#allocation52_spill]]  ;;  %s4304_s5 = smov [#allocation12]  }
  0x2f   :  { %s120_s9 = sshll.u32 %s4304_s5, 4  ;;  %s121_s9 = int_to_ptr.vmem [resolvable:$true] %s120_s9 }
  0x30   :  { %s3946_s3 = scalar_lea.vmem %s121_s9, 32  ;;  %p3951_p11 = scmp.lt.s32.totalorder %s121_s9, %s121_s9 }
  0x31   :  { %p3947_p10 = scmp.ne.s32.totalorder %s121_s9, %s3946_s3  ;;  %p3952_p12 = scmp.lt.s32.totalorder %s3946_s3, %s3946_s3 }
  0x33   :  { %p3953_p13 = por %p3952_p12, %p3951_p11 }
  0x34   :  { %100 = dma.hbm_to_vmem [thread:$0]  %s4981_s8, 6144, %s95_s6, [#allocation10], %s4302_s7, %s4302_s7, %s4303_s12  }
  0x35   :  { %p3954_p0 = pnand %p3953_p13, %p3947_p10 }
  0x37   :  { %3957 = shalt.err (!%p3954_p0)
}
  0x38   :  { %s4305_s30 = smov 16   ;;  %s4306_s10 = smov 1  }
  0x39   :  { %s4982_s11 = sld [smem:[#allocation55_spill]]  ;;  %s4307_s6 = smov [#allocation15]  }
  0x3a   :  { %s144_s29 = sshll.u32 %s4307_s6, 4  ;;  %s4308_s2 = smov [#allocation18]   ;;  %s145_s29 = int_to_ptr.vmem [resolvable:$true] %s144_s29 }
  0x3b   :  { %s168_s7 = sshll.u32 %s4308_s2, 4  ;;  %s3966_s12 = scalar_lea.vmem %s145_s29, 32  ;;  %s169_s7 = int_to_ptr.vmem [resolvable:$true] %s168_s7 }
  0x3c   :  { %p3967_p1 = scmp.ne.s32.totalorder %s145_s29, %s3966_s12  ;;  %p3971_p2 = scmp.lt.s32.totalorder %s145_s29, %s145_s29 }
  0x3d   :  { %p3972_p3 = scmp.lt.s32.totalorder %s3966_s12, %s3966_s12 }
  0x3f   :  { %126 = dma.hbm_to_vmem [thread:$0]  %s4982_s11, 32, %s121_s9, [#allocation13], %s4305_s30, %s4305_s30, %s4306_s10  }
  0x40   :  { %p3973_p4 = por %p3972_p3, %p3971_p2 }
  0x42   :  { %p3974_p5 = pnand %p3973_p4, %p3967_p1 }
  0x44   :  { %3977 = shalt.err (!%p3974_p5)
}
  0x45   :  { %150 = dma.hbm_to_vmem [thread:$0]  %s4947_s13, 32, %s145_s29, [#allocation16], %s4305_s30, %s4305_s30, %s4306_s10  }
  0x46   :  { %s3986_s8 = scalar_lea.vmem %s169_s7, 64  ;;  %p3991_p7 = scmp.lt.s32.totalorder %s169_s7, %s169_s7 }
  0x47   :  { %p3987_p6 = scmp.ne.s32.totalorder %s169_s7, %s3986_s8  ;;  %p3992_p8 = scmp.lt.s32.totalorder %s3986_s8, %s3986_s8 }
  0x49   :  { %p3993_p9 = por %p3992_p8, %p3991_p7 }
  0x4b   :  { %p3994_p10 = pnand %p3993_p9, %p3987_p6 }
  0x4d   :  { %3997 = shalt.err (!%p3994_p10)
}
  0x4e   :  { %s4309_s5 = smov 32   ;;  %s4310_s9 = smov 2  }
  0x4f   :  { %174 = dma.hbm_to_vmem [thread:$0]  %s4949_s15, 64, %s169_s7, [#allocation19], %s4309_s5, %s4309_s5, %s4310_s9  }
  0x50   :  { %s4311_s0 = smov [#allocation21]   ;;  %s4312_s6 = smov [#allocation24]  }
  0x51   :  { %s192_s11 = sshll.u32 %s4311_s0, 4  ;;  %s216_s2 = sshll.u32 %s4312_s6, 4  ;;  %s193_s11 = int_to_ptr.vmem [resolvable:$true] %s192_s11  ;;  %s217_s2 = int_to_ptr.vmem [resolvable:$true] %s216_s2 }
  0x52   :  { %s4006_s13 = scalar_lea.vmem %s193_s11, 32  ;;  %p4011_p12 = scmp.lt.s32.totalorder %s193_s11, %s193_s11 }
  0x53   :  { %p4007_p11 = scmp.ne.s32.totalorder %s193_s11, %s4006_s13  ;;  %p4012_p13 = scmp.lt.s32.totalorder %s4006_s13, %s4006_s13 }
  0x55   :  { %p4013_p0 = por %p4012_p13, %p4011_p12 }
  0x57   :  { %p4014_p1 = pnand %p4013_p0, %p4007_p11 }
  0x59   :  { %4017 = shalt.err (!%p4014_p1)
}
  0x5a   :  { %198 = dma.hbm_to_vmem [thread:$0]  %s4951_s17, 32, %s193_s11, [#allocation22], %s4305_s30, %s4305_s30, %s4306_s10  }
  0x5b   :  { %s4026_s15 = scalar_lea.vmem %s217_s2, 32  ;;  %p4031_p3 = scmp.lt.s32.totalorder %s217_s2, %s217_s2 }
  0x5c   :  { %p4027_p2 = scmp.ne.s32.totalorder %s217_s2, %s4026_s15  ;;  %p4032_p4 = scmp.lt.s32.totalorder %s4026_s15, %s4026_s15 }
  0x5e   :  { %p4033_p5 = por %p4032_p4, %p4031_p3 }
  0x60   :  { %p4034_p6 = pnand %p4033_p5, %p4027_p2 }
  0x62   :  { %4037 = shalt.err (!%p4034_p6)
}
  0x63   :  { %222 = dma.hbm_to_vmem [thread:$0]  %s4953_s19, 32, %s217_s2, [#allocation25], %s4305_s30, %s4305_s30, %s4306_s10  }
  0x64   :  { %s4313_s4 = smov [#allocation27]   ;;  %s4314_s5 = smov [#allocation3]  }
  0x65   :  { %s243_s8 = sshll.u32 %s4313_s4, 4  ;;  %s62_s17 = sshll.u32 %s4314_s5, 4  ;;  %s244_s8 = int_to_ptr.vmem [resolvable:$true] %s243_s8  ;;  %s63_s17 = int_to_ptr.vmem [resolvable:$true] %s62_s17 }
  0x66   :  { %s4046_s9 = scalar_lea.vmem %s244_s8, 16  ;;  %s4050_s3 = scalar_lea.vmem %s244_s8, 32 }
  0x67   :  { %p4047_p7 = scmp.ne.s32.totalorder %s244_s8, %s4046_s9  ;;  %p4051_p8 = scmp.lt.s32.totalorder %s244_s8, %s244_s8 }
  0x68   :  { %p4052_p9 = scmp.lt.s32.totalorder %s4050_s3, %s4046_s9 }
  0x6a   :  { %p4053_p10 = por %p4052_p9, %p4051_p8 }
  0x6c   :  { %p4054_p11 = pnand %p4053_p10, %p4047_p7 }
  0x6e   :  { %4057 = shalt.err (!%p4054_p11)
}
  0x6f   :  { %246 = dma.hbm_to_vmem [thread:$0]  %s4957_s23, 16, %s244_s8, [#allocation28]  }
  0x70   :  { %s4066_s11 = scalar_lea.vmem %s63_s17, 512  ;;  %p4071_p13 = scmp.lt.s32.totalorder %s63_s17, %s63_s17 }
  0x71   :  { %p4067_p12 = scmp.ne.s32.totalorder %s63_s17, %s4066_s11  ;;  %p4072_p0 = scmp.lt.s32.totalorder %s4066_s11, %s4066_s11 }
  0x73   :  { %p4073_p1 = por %p4072_p0, %p4071_p13 }
  0x75   :  { %p4074_p2 = pnand %p4073_p1, %p4067_p12 }
  0x77   :  { %4077 = shalt.err (!%p4074_p2)
}
  0x78   :  { %s4315_s19 = smov 64   ;;  %s4316_s6 = smov 4  }
  0x79   :  { %s4983_s29 = sld [smem:[#allocation49_spill]]  ;;  %s4317_s12 = smov [#allocation8]  }
  0x7a   :  { %s85_s15 = sshll.u32 %s4317_s12, 4  ;;  %s4318_s23 = smov [#allocation11]   ;;  %s86_s15 = int_to_ptr.vmem [resolvable:$true] %s85_s15 }
  0x7b   :  { %s106_s7 = sshll.u32 %s4318_s23, 4  ;;  %s4086_s1 = scalar_lea.vmem %s86_s15, 16  ;;  %s107_s7 = int_to_ptr.vmem [resolvable:$true] %s106_s7 }
  0x7c   :  { %p4087_p3 = scmp.ne.s32.totalorder %s86_s15, %s4086_s1  ;;  %s4090_s4 = scalar_lea.vmem %s86_s15, 32 }
  0x7d   :  { %p4091_p4 = scmp.lt.s32.totalorder %s86_s15, %s86_s15  ;;  %p4092_p5 = scmp.lt.s32.totalorder %s4090_s4, %s4086_s1 }
  0x7f   :  { %68 = dma.hbm_to_vmem [thread:$0]  %s4983_s29, 512, %s63_s17, [#allocation4], %s4315_s19, %s4315_s19, %s4316_s6  }
  0x80   :  { %p4093_p6 = por %p4092_p5, %p4091_p4 }
  0x82   :  { %p4094_p7 = pnand %p4093_p6, %p4087_p3 }
  0x84   :  { %4097 = shalt.err (!%p4094_p7)
}
  0x85   :  { %s4984_s9 = sld [smem:[#allocation51_spill]]  ;;  %s4106_s3 = scalar_lea.vmem %s107_s7, 96 }
  0x86   :  { %p4107_p8 = scmp.ne.s32.totalorder %s107_s7, %s4106_s3  ;;  %p4111_p9 = scmp.lt.s32.totalorder %s107_s7, %s107_s7 }
  0x87   :  { %p4112_p10 = scmp.lt.s32.totalorder %s4106_s3, %s4106_s3 }
  0x89   :  { %p4113_p11 = por %p4112_p10, %p4111_p9 }
  0x8b   :  { %88 = dma.hbm_to_vmem [thread:$0]  %s4984_s9, 16, %s86_s15, [#allocation7]  }
  0x8c   :  { %p4114_p12 = pnand %p4113_p11, %p4107_p8 }
  0x8e   :  { %4117 = shalt.err (!%p4114_p12)
}
  0x8f   :  { %s4319_s17 = smov 48   ;;  %s4320_s26 = smov 3  }
  0x90   :  { %s4985_s2 = sld [smem:[#allocation53_spill]]  ;;  %s4321_s13 = smov [#allocation14]  }
  0x91   :  { %s132_s29 = sshll.u32 %s4321_s13, 4  ;;  %s4322_s12 = smov [#allocation17]   ;;  %s133_s29 = int_to_ptr.vmem [resolvable:$true] %s132_s29 }
  0x92   :  { %s156_s23 = sshll.u32 %s4322_s12, 4  ;;  %s4126_s15 = scalar_lea.vmem %s133_s29, 32  ;;  %s157_s23 = int_to_ptr.vmem [resolvable:$true] %s156_s23 }
  0x93   :  { %p4127_p13 = scmp.ne.s32.totalorder %s133_s29, %s4126_s15  ;;  %p4131_p0 = scmp.lt.s32.totalorder %s133_s29, %s133_s29 }
  0x94   :  { %p4132_p1 = scmp.lt.s32.totalorder %s4126_s15, %s4126_s15 }
  0x96   :  { %112 = dma.hbm_to_vmem [thread:$0]  %s4985_s2, 96, %s107_s7, [#allocation10], %s4319_s17, %s4319_s17, %s4320_s26  }
  0x97   :  { %p4133_p2 = por %p4132_p1, %p4131_p0 }
  0x99   :  { %p4134_p3 = pnand %p4133_p2, %p4127_p13 }
  0x9b   :  { %4137 = shalt.err (!%p4134_p3)
}
  0x9c   :  { %s4986_s8 = sld [smem:[#allocation56_spill]]  ;;  %s4146_s7 = scalar_lea.vmem %s157_s23, 4096 }
  0x9d   :  { %p4147_p4 = scmp.ne.s32.totalorder %s157_s23, %s4146_s7  ;;  %p4151_p5 = scmp.lt.s32.totalorder %s157_s23, %s157_s23 }
  0x9e   :  { %p4152_p6 = scmp.lt.s32.totalorder %s4146_s7, %s4146_s7 }
  0xa0   :  { %p4153_p7 = por %p4152_p6, %p4151_p5 }
  0xa2   :  { %138 = dma.hbm_to_vmem [thread:$0]  %s4986_s8, 32, %s133_s29, [#allocation13], %s4305_s30, %s4305_s30, %s4306_s10  }
  0xa3   :  { %p4154_p8 = pnand %p4153_p7, %p4147_p4 }
  0xa5   :  { %4157 = shalt.err (!%p4154_p8)
}
  0xa6   :  { %s4323_s5 = smov 128   ;;  %s4324_s9 = smov 8  }
  0xa7   :  { %162 = dma.hbm_to_vmem [thread:$0]  %s4948_s14, 4096, %s157_s23, [#allocation16], %s4323_s5, %s4323_s5, %s4324_s9  }
  0xa8   :  { %s4325_s26 = smov [#allocation20]   ;;  %s4326_s11 = smov [#allocation23]  }
  0xa9   :  { %s180_s0 = sshll.u32 %s4325_s26, 4  ;;  %s204_s2 = sshll.u32 %s4326_s11, 4  ;;  %s181_s0 = int_to_ptr.vmem [resolvable:$true] %s180_s0  ;;  %s205_s2 = int_to_ptr.vmem [resolvable:$true] %s204_s2 }
  0xaa   :  { %s4166_s13 = scalar_lea.vmem %s181_s0, 4096  ;;  %p4171_p10 = scmp.lt.s32.totalorder %s181_s0, %s181_s0 }
  0xab   :  { %p4167_p9 = scmp.ne.s32.totalorder %s181_s0, %s4166_s13  ;;  %p4172_p11 = scmp.lt.s32.totalorder %s4166_s13, %s4166_s13 }
  0xad   :  { %p4173_p12 = por %p4172_p11, %p4171_p10 }
  0xaf   :  { %p4174_p13 = pnand %p4173_p12, %p4167_p9 }
  0xb1   :  { %4177 = shalt.err (!%p4174_p13)
}
  0xb2   :  { %186 = dma.hbm_to_vmem [thread:$0]  %s4950_s16, 4096, %s181_s0, [#allocation19], %s4315_s19, %s4315_s19, %s4316_s6  }
  0xb3   :  { %s4186_s14 = scalar_lea.vmem %s205_s2, 32  ;;  %p4191_p1 = scmp.lt.s32.totalorder %s205_s2, %s205_s2 }
  0xb4   :  { %p4187_p0 = scmp.ne.s32.totalorder %s205_s2, %s4186_s14  ;;  %p4192_p2 = scmp.lt.s32.totalorder %s4186_s14, %s4186_s14 }
  0xb6   :  { %p4193_p3 = por %p4192_p2, %p4191_p1 }
  0xb8   :  { %p4194_p4 = pnand %p4193_p3, %p4187_p0 }
  0xba   :  { %4197 = shalt.err (!%p4194_p4)
}
  0xbb   :  { %210 = dma.hbm_to_vmem [thread:$0]  %s4952_s18, 32, %s205_s2, [#allocation22], %s4305_s30, %s4305_s30, %s4306_s10  }
  0xbc   :  { %s4327_s1 = smov [#allocation26]   ;;  %s4328_s8 = smov [#allocation29]  }
  0xbd   :  { %s231_s4 = sshll.u32 %s4327_s1, 4  ;;  %s253_s16 = sshll.u32 %s4328_s8, 4  ;;  %s232_s4 = int_to_ptr.vmem [resolvable:$true] %s231_s4  ;;  %s254_s16 = int_to_ptr.vmem [resolvable:$true] %s253_s16 }
  0xbe   :  { %s4206_s6 = scalar_lea.vmem %s232_s4, 16  ;;  %s4210_s7 = scalar_lea.vmem %s232_s4, 32 }
  0xbf   :  { %p4207_p5 = scmp.ne.s32.totalorder %s232_s4, %s4206_s6  ;;  %p4211_p6 = scmp.lt.s32.totalorder %s232_s4, %s232_s4 }
  0xc0   :  { %p4212_p7 = scmp.lt.s32.totalorder %s4210_s7, %s4206_s6 }
  0xc2   :  { %p4213_p8 = por %p4212_p7, %p4211_p6 }
  0xc4   :  { %p4214_p9 = pnand %p4213_p8, %p4207_p5 }
  0xc6   :  { %4217 = shalt.err (!%p4214_p9)
}
  0xc7   :  { %234 = dma.hbm_to_vmem [thread:$0]  %s4955_s21, 16, %s232_s4, [#allocation25]  }
  0xc8   :  { %s4226_s3 = scalar_lea.vmem %s254_s16, 16  ;;  %s4230_s18 = scalar_lea.vmem %s254_s16, 32 }
  0xc9   :  { %p4227_p10 = scmp.ne.s32.totalorder %s254_s16, %s4226_s3  ;;  %p4231_p11 = scmp.lt.s32.totalorder %s254_s16, %s254_s16 }
  0xca   :  { %p4232_p12 = scmp.lt.s32.totalorder %s4230_s18, %s4226_s3 }
  0xcc   :  { %p4233_p13 = por %p4232_p12, %p4231_p11 }
  0xce   :  { %p4234_p0 = pnand %p4233_p13, %p4227_p10 }
  0xd0   :  { %4237 = shalt.err (!%p4234_p0)
}
  0xd1   :  { %256 = dma.hbm_to_vmem [thread:$0]  %s4958_s24, 16, %s254_s16, [#allocation28]  }
  0xd2   :  { %s4329_s17 = smov [#allocation30]  }
  0xd3   :  { %s263_s26 = sshll.u32 %s4329_s17, 4  ;;  %s264_s26 = int_to_ptr.vmem [resolvable:$true] %s263_s26 }
  0xd4   :  { %s4246_s0 = scalar_lea.vmem %s264_s26, 16  ;;  %s4250_s11 = scalar_lea.vmem %s264_s26, 32 }
  0xd5   :  { %p4247_p1 = scmp.ne.s32.totalorder %s264_s26, %s4246_s0  ;;  %p4251_p2 = scmp.lt.s32.totalorder %s264_s26, %s264_s26 }
  0xd6   :  { %p4252_p3 = scmp.lt.s32.totalorder %s4250_s11, %s4246_s0 }
  0xd8   :  { %p4253_p4 = por %p4252_p3, %p4251_p2 }
  0xda   :  { %p4254_p5 = pnand %p4253_p4, %p4247_p1 }
  0xdc   :  { %4257 = shalt.err (!%p4254_p5)
}
  0xdd   :  { %266 = dma.hbm_to_vmem [thread:$0]  %s4959_s25, 16, %s264_s26, [#allocation31]  }
  0xde   :  { %4278 = dma.done.wait [#allocation4], 512  }
  0xdf   :  { %4279 = vsyncadd [#allocation4], 4294966784 }
  0xe0   :  { %4280 = dma.done.wait [#allocation7], 32  }
  0xe1   :  { %4281 = vsyncadd [#allocation7], 4294967264 }
  0xe2   :  { %4282 = dma.done.wait [#allocation10], 6240  }
  0xe3   :  { %4283 = vsyncadd [#allocation10], 4294961056 }
  0xe4   :  { %4284 = dma.done.wait [#allocation13], 64  }
  0xe5   :  { %4285 = vsyncadd [#allocation13], 4294967232 }
  0xe6   :  { %4286 = dma.done.wait [#allocation16], 4128  }
  0xe7   :  { %4287 = vsyncadd [#allocation16], 4294963168 }
  0xe8   :  { %4288 = dma.done.wait [#allocation19], 4160  }
  0xe9   :  { %4289 = vsyncadd [#allocation19], 4294963136 }
  0xea   :  { %4290 = dma.done.wait [#allocation22], 64  }
  0xeb   :  { %4291 = vsyncadd [#allocation22], 4294967232 }
  0xec   :  { %4292 = dma.done.wait [#allocation25], 48  }
  0xed   :  { %4293 = vsyncadd [#allocation25], 4294967248 }
  0xee   :  { %4294 = dma.done.wait [#allocation28], 32  }
  0xef   :  { %4295 = vsyncadd [#allocation28], 4294967264 }
  0xf0   :  { %4296 = dma.done.wait [#allocation31], 16  }
  0xf1   :  { %4297 = vsyncadd [#allocation31], 4294967280  ;;  %v4330_v1 = vmov 0   ;;  %v4331_v2 = vmov 0.0   ;;  %s4987_s13 = sld [smem:[#allocation44_spill]]  ;;  %v3640_v4 = vld [vmem:[#allocation3 + $0x18] sm:$0xff]   ;;  %v326_v9 = vlaneseq }
  0xf2   :  { %3639 = vset.pattern.permute.xlu0 %v4330_v1  ;;  %3409 = vmatprep.subr.bf16.mxu0 %v4331_v2  ;;  %v3641_v6 = vld [vmem:[#allocation3 + $0x10] sm:$0xff]   ;;  %vm4332_vm0 = vmmov 0   ;;  %v3642_v7 = vld [vmem:[#allocation3 + $0x8] sm:$0xff]   ;;  %v3643_v8 = vld [vmem:[#allocation3] sm:$0xff]   ;;  %vm375_vm3 = vcmask 523264   ;;  %s4988_s15 = sld [smem:[#allocation46_spill]] }
  0xf3   :  { %673 = vmatprep.mubr.bf16.mxu1 %v4330_v1  ;;  %3410 = vmatpush3.bf16.msra.mxu0 %v3640_v4  ;;  %v4576_v10 = vand.u32 127, %v326_v9  ;;  %v3644_v24 = vld [vmem:[#allocation9 + $0xac] ss:$12 sps:$4 sm:$0xff]   ;;  %v3646_v25 = vld [vmem:[#allocation9 + $0xa8] ss:$12 sps:$4 sm:$0xff]   ;;  %s4989_s6 = sld [smem:[#allocation45_spill]] }
  0xf4   :  { %3411 = vmatprep.subr.bf16.mxu0 %v4331_v2  ;;  %3417 = vmatprep.mubr.msk.bf16.mxu0 %vm4332_vm0, %v4331_v2  ;;  %v3647_v26 = vld [vmem:[#allocation9 + $0xb0] ss:$12 sps:$4 sm:$0xff]   ;;  %v3648_v35 = vld [vmem:[#allocation9 + $0x94] ss:$12 sps:$4 sm:$0xff]   ;;  %v3651_v37 = vld [vmem:[#allocation9 + $0x98] ss:$12 sps:$4 sm:$0xff]  }
  0xf5   :  { %641 = vmatprep.subr.bf16.mxu1 %v3644_v24  ;;  %v3650_v36 = vld [vmem:[#allocation9 + $0x90] ss:$12 sps:$4 sm:$0xff]   ;;  %v3654_v39 = vld [vmem:[#allocation9 + $0x78] ss:$12 sps:$4 sm:$0xff]   ;;  %v3655_v40 = vld [vmem:[#allocation9 + $0x80] ss:$12 sps:$4 sm:$0xff]  }
  0xf6   :  { %642 = vmatpush1.bf16.msra.mxu1 %v3646_v25  ;;  %v3652_v38 = vld [vmem:[#allocation9 + $0x7c] ss:$12 sps:$4 sm:$0xff]   ;;  %v3656_v41 = vld [vmem:[#allocation9 + $0x64] ss:$12 sps:$4 sm:$0xff]   ;;  %v3658_v42 = vld [vmem:[#allocation9 + $0x60] ss:$12 sps:$4 sm:$0xff]  }
  0xf7   :  { %v324_v3 = vld [vmem:[%s4987_s13] sm:$0xff]  ;;  %v325_v5 = vld [vmem:[%s4987_s13 + $0x8] sm:$0xff]  ;;  %3412 = vmatpush3.bf16.msra.mxu0 %v3641_v6  ;;  %643 = vmatprep.subr.bf16.mxu1 %v3648_v35  ;;  %vm799_vm4 = vcmask 130048   ;;  %s4990_s18 = sld [smem:[#allocation54_spill]]  ;;  %vm2996_vm6 = vcmask 9216   ;;  %vm3009_vm7 = vcmask 25600  }
  0xf8   :  { %329 = vperm.xlu0 %3639, %v324_v3   ;;  %3413 = vmatprep.subr.bf16.mxu0 %v4331_v2  ;;  %v349_v16 = vld [vmem:[%s4988_s15] sm:$0xff]  ;;  %v350_v20 = vld [vmem:[%s4988_s15 + $0x8] sm:$0xff]  ;;  %s4991_s25 = sld [smem:[#allocation47_spill]]  ;;  %vm3028_vm8 = vcmask 1024   ;;  %vm3056_vm9 = vcmask 0  }
  0xf9   :  { %v3659_v43 = vld [vmem:[#allocation9 + $0x68] ss:$12 sps:$4 sm:$0xff]   ;;  %v3660_v44 = vld [vmem:[#allocation9 + $0x4c] ss:$12 sps:$4 sm:$0xff]   ;;  %v3663_v46 = vld [vmem:[#allocation9 + $0x50] ss:$12 sps:$4 sm:$0xff]  }
  0xfa   :  { %644 = vmatpush1.bf16.msra.mxu1 %v3650_v36  ;;  %v3662_v45 = vld [vmem:[#allocation9 + $0x48] ss:$12 sps:$4 sm:$0xff]   ;;  %v3666_v48 = vld [vmem:[#allocation9 + $0x30] ss:$12 sps:$4 sm:$0xff]   ;;  %v3667_v49 = vld [vmem:[#allocation9 + $0x38] ss:$12 sps:$4 sm:$0xff]  }
  0xfb   :  { %3414 = vmatpush3.bf16.msra.mxu0 %v3642_v7  ;;  %645 = vmatprep.subr.bf16.mxu1 %v3652_v38  ;;  %v3664_v47 = vld [vmem:[#allocation9 + $0x34] ss:$12 sps:$4 sm:$0xff]   ;;  %v3668_v50 = vld [vmem:[#allocation9 + $0x1c] ss:$12 sps:$4 sm:$0xff]   ;;  %v3670_v51 = vld [vmem:[#allocation9 + $0x18] ss:$12 sps:$4 sm:$0xff]  }
  0xfc   :  { %332 = vperm.xlu0 %3639, %v325_v5   ;;  %3415 = vmatprep.subr.bf16.mxu0 %v4331_v2  ;;  %v3671_v52 = vld [vmem:[#allocation9 + $0x20] ss:$12 sps:$4 sm:$0xff]   ;;  %v3672_v53 = vld [vmem:[#allocation9 + $0x4] ss:$12 sps:$4 sm:$0xff]   ;;  %v3675_v55 = vld [vmem:[#allocation9 + $0x8] ss:$12 sps:$4 sm:$0xff]  }
  0xfd   :  { %v3674_v54 = vld [vmem:[#allocation9] ss:$12 sps:$4 sm:$0xff]   ;;  %v3093_v0 = vld [vmem:[#allocation6] ss:$0 sm:$0xff]  ;;  %v3094_v6 = vld [vmem:[#allocation8] ss:$0 sm:$0xff] }
  0xfe   :  { %646 = vmatpush1.bf16.msra.mxu1 %v3654_v39  ;;  %v4647_v38 = vld [vmem:[%s4989_s6] sm:$0xff]  ;;  %s4992_s14 = sld [smem:[#allocation48_spill]] }
  0xff   :  { %3416 = vmatpush3.bf16.msra.mxu0 %v3643_v8  ;;  %647 = vmatprep.subr.bf16.mxu1 %v3656_v41 }
 0x100   :  { %3421 = vmatprep.subr.bf16.mxu0 %v4331_v2 }
 0x102   :  { %648 = vmatpush1.bf16.msra.mxu1 %v3658_v42  ;;  %v4653_v42 = vld [vmem:[%s4989_s6 + $0x8] sm:$0xff] }
 0x103   :  { %649 = vmatprep.subr.bf16.mxu1 %v3660_v44 }
 0x106   :  { %650 = vmatpush1.bf16.msra.mxu1 %v3662_v45 }
 0x107   :  { %651 = vmatprep.subr.bf16.mxu1 %v3664_v47 }
 0x10a   :  { %652 = vmatpush1.bf16.msra.mxu1 %v3666_v48 }
 0x10b   :  { %653 = vmatprep.subr.bf16.mxu1 %v3668_v50 }
 0x10e   :  { %654 = vmatpush1.bf16.msra.mxu1 %v3670_v51 }
 0x10f   :  { %655 = vmatprep.subr.bf16.mxu1 %v3672_v53 }
 0x112   :  { %656 = vmatpush1.bf16.msra.mxu1 %v3674_v54 }
 0x113   :  { %3441 = vmatprep.subr.bf16.mxu1 %v4331_v2 }
 0x173   :  { %v330_v11 = vpop.permute.xlu0 %329 }
 0x174   :  { %vm334_vm1 = vcmp.eq.s32.totalorder %v4576_v10, %v330_v11 }
 0x175   :  { %v3086_v13 = vsel %vm334_vm1, 1.0, %v4331_v2 }
 0x177   :  { %v333_v12 = vpop.permute.xlu0 %332 }
 0x178   :  { %vm335_vm2 = vcmp.eq.s32.totalorder %v4576_v10, %v333_v12 }
 0x179   :  { %v3087_v14 = vsel %vm335_vm2, 1.0, %v4331_v2 }
 0x17a   :  { %v340_v15 = vpack.c.bf16 %v3087_v14, %v3086_v13  ;;  %v4621_v13 = vshrl.u32 %v326_v9, 7 }
 0x17c   :  { %3418 = vmatmul.mubr.msk.bf16.vlgmr.msra.gmra.mxu0 %vm375_vm3, %v340_v15  ;;  %v4624_v14 = vsub.s32 0, %v4621_v13  ;;  %v496_v15 = vld [vmem:[#allocation11] sm:$0x7] }
 0x17d   :  { %3437 = vmatprep.mubr.msk.bf16.mxu0 %vm4332_vm0, %v4331_v2  ;;  %3422 = vmatpush3.bf16.msra.mxu0 %v3647_v26 }
 0x17e   :  { %3423 = vmatprep.subr.bf16.mxu0 %v4331_v2 }
 0x181   :  { %3424 = vmatpush3.bf16.msra.mxu0 %v3651_v37 }
 0x182   :  { %3425 = vmatprep.subr.bf16.mxu0 %v4331_v2 }
 0x185   :  { %3426 = vmatpush3.bf16.msra.mxu0 %v3655_v40 }
 0x186   :  { %3427 = vmatprep.subr.bf16.mxu0 %v4331_v2 }
 0x189   :  { %3428 = vmatpush3.bf16.msra.mxu0 %v3659_v43 }
 0x18a   :  { %3429 = vmatprep.subr.bf16.mxu0 %v4331_v2 }
 0x18d   :  { %3430 = vmatpush3.bf16.msra.mxu0 %v3663_v46 }
 0x18e   :  { %3431 = vmatprep.subr.bf16.mxu0 %v4331_v2 }
 0x191   :  { %3432 = vmatpush3.bf16.msra.mxu0 %v3667_v49 }
 0x192   :  { %3433 = vmatprep.subr.bf16.mxu0 %v4331_v2 }
 0x195   :  { %3434 = vmatpush3.bf16.msra.mxu0 %v3671_v52 }
 0x196   :  { %3435 = vmatprep.subr.bf16.mxu0 %v4331_v2 }
 0x199   :  { %3436 = vmatpush3.bf16.msra.mxu0 %v3675_v55 }
 0x19a   :  { %3453 = vmatprep.subr.bf16.mxu0 %v4331_v2 }
 0x23c   :  { %v413_v17 = vpop.f32.mrf.mxu0 }
 0x23d   :  { %v414_v18 = vadd.f32 %v413_v17, %v349_v16  ;;  %v4627_v16 = vsub.s32 1, %v4621_v13 }
 0x23e   :  { %v3419_v19 = vpop.f32.mrf.mxu0 }
 0x23f   :  { %422 = vadd.xlane.f32.xlu1 %v414_v18  ;;  %v501_v19 = vrot.slane %v496_v15, %v4624_v14 }
 0x240   :  { %v416_v21 = vpop.f32.mrf.mxu0 }
 0x241   :  { %v417_v22 = vadd.f32 %v416_v21, %v350_v20 }
 0x242   :  { %v3420_v23 = vpop.f32.mrf.mxu0 }
 0x243   :  { %424 = vadd.xlane.f32.xlu1 %v417_v22 }
 0x2c8   :  { %v423_v27 = vpop.xlane.xlu1 %422 }
 0x2c9   :  { %v427_v28 = vmul.f32 0.0078125, %v423_v27 }
 0x2cb   :  { %v4592_v29 = vsub.f32 %v414_v18, %v427_v28 }
 0x2cc   :  { %v425_v30 = vpop.xlane.xlu1 %424 }
 0x2cd   :  { %v428_v31 = vmul.f32 0.0078125, %v425_v30  ;;  %v431_v32 = vmul.f32 %v4592_v29, %v4592_v29 }
 0x2cf   :  { %v4596_v33 = vsub.f32 %v417_v22, %v428_v31  ;;  %433 = vadd.xlane.f32.xlu0 %v431_v32  ;;  %v505_v22 = vrot.slane %v496_v15, %v4627_v16  ;;  %v508_v31 = vsub.s32 2, %v4621_v13 }
 0x2d1   :  { %v432_v34 = vmul.f32 %v4596_v33, %v4596_v33 }
 0x2d3   :  { %435 = vadd.xlane.f32.xlu1 %v432_v34  ;;  %v509_v34 = vrot.slane %v496_v15, %v508_v31  ;;  %v3679_v15 = vld [vmem:[%s4990_s18] sm:$0xff]  }
 0x358   :  { %v434_v56 = vpop.xlane.xlu0 %433 }
 0x359   :  { %v437_v57 = vmul.f32 0.0078125, %v434_v56 }
 0x35b   :  { %v439_v58 = vadd.f32 1e-12, %v437_v57 }
 0x35c   :  { %v436_v59 = vpop.xlane.xlu1 %435 }
 0x35d   :  { %3820 = vrsqrt.f32 %v439_v58  ;;  %v438_v60 = vmul.f32 0.0078125, %v436_v59  ;;  %v3676_v58 = vld [vmem:[%s4990_s18 + $0x18] sm:$0xff]   ;;  %v3677_v59 = vld [vmem:[%s4990_s18 + $0x10] sm:$0xff]  }
 0x35f   :  { %v440_v61 = vadd.f32 1e-12, %v438_v60 }
 0x361   :  { %3822 = vrsqrt.f32 %v440_v61 }
 0x36a   :  { %v3821_v62 = vpop.eup %3820 }
 0x36b   :  { %v443_v63 = vmul.f32 %v3821_v62, %v4592_v29 }
 0x36d   :  { %v451_v5 = vmul.f32 %v3093_v0, %v443_v63 }
 0x36e   :  { %v3823_v3 = vpop.eup %3822 }
 0x36f   :  { %v444_v4 = vmul.f32 %v3823_v3, %v4596_v33  ;;  %v4610_v8 = vadd.f32 %v3094_v6, %v451_v5 }
 0x371   :  { %v452_v7 = vmul.f32 %v3093_v0, %v444_v4 }
 0x373   :  { %v4612_v11 = vadd.f32 %v3094_v6, %v452_v7 }
 0x375   :  { %v463_v12 = vpack.c.bf16 %v4612_v11, %v4610_v8 }
 0x377   :  { %674 = vmatmul.mubr.bf16.vlgmr.msra.gmra.mxu1 %v463_v12  ;;  %3438 = vmatmul.mubr.bf16.vlgmr.msra.gmra.mxu0 %v463_v12  ;;  %v3678_v12 = vld [vmem:[%s4990_s18 + $0x8] sm:$0xff]  }
 0x378   :  { %3443 = vmatprep.mubr.msk.bf16.mxu1 %vm4332_vm0, %v4331_v2  ;;  %3461 = vmatprep.mubr.msk.bf16.mxu0 %vm4332_vm0, %v4331_v2 }
 0x379   :  { %3454 = vmatpush3.bf16.msra.mxu0 %v3676_v58 }
 0x37a   :  { %3455 = vmatprep.subr.bf16.mxu0 %v4331_v2 }
 0x37d   :  { %3456 = vmatpush3.bf16.msra.mxu0 %v3677_v59  ;;  %v3682_v59 = vld [vmem:[%s4990_s18 + $0x28] sm:$0xff]  }
 0x37e   :  { %3457 = vmatprep.subr.bf16.mxu0 %v4331_v2 }
 0x381   :  { %3458 = vmatpush3.bf16.msra.mxu0 %v3678_v12 }
 0x382   :  { %3459 = vmatprep.subr.bf16.mxu0 %v4331_v2 }
 0x385   :  { %3460 = vmatpush3.bf16.msra.mxu0 %v3679_v15 }
 0x386   :  { %3477 = vmatprep.subr.bf16.mxu0 %v4331_v2 }
 0x437   :  { %v675_v17 = vpop.f32.mrf.mxu1  ;;  %v718_v18 = vpop.f32.mrf.mxu0 }
 0x438   :  { %v676_v25 = vadd.f32 %v675_v17, %v501_v19  ;;  %v719_v36 = vadd.f32 %v718_v18, %v509_v34 }
 0x439   :  { %v677_v20 = vpop.f32.mrf.mxu1  ;;  %v3439_v21 = vpop.f32.mrf.mxu0 }
 0x43a   :  { %v678_v28 = vadd.f32 %v677_v20, %v505_v22 }
 0x43b   :  { %v679_v23 = vpop.f32.mrf.mxu1  ;;  %v721_v24 = vpop.f32.mrf.mxu0 }
 0x43c   :  { %v680_v9 = vadd.f32 %v679_v23, %v501_v19  ;;  %v722_v35 = vadd.f32 %v721_v24, %v509_v34 }
 0x43d   :  { %v681_v26 = vpop.f32.mrf.mxu1  ;;  %v3440_v27 = vpop.f32.mrf.mxu0 }
 0x43e   :  { %v682_v29 = vadd.f32 %v681_v26, %v505_v22  ;;  %v750_v30 = vpack.c.bf16 %v680_v9, %v676_v25  ;;  %v4637_v37 = vpack.c.bf16 %v722_v35, %v719_v36 }
 0x440   :  { %v751_v32 = vpack.c.bf16 %v682_v29, %v678_v28  ;;  %940 = vrot.lane.b32.xlu0 %v750_v30, %s4315_s19 }
 0x442   :  { %v756_v33 = vsel %vm375_vm3, %v751_v32, 0 }
 0x443   :  { %3442 = vmatpush3.bf16.xpose.msra.mxu1 %v756_v33 }
 0x444   :  { %3447 = vmatprep.subr.bf16.mxu1 %v4331_v2 }
 0x44a   :  { %3444 = vmatmul.mubr.msk.bf16.vlgmr.msra.gmra.mxu1 %vm375_vm3, %v750_v30 }
 0x44b   :  { %3448 = vmatpush3.bf16.msra.mxu1 %v4637_v37  ;;  %3449 = vmatprep.mubr.msk.bf16.mxu1 %vm4332_vm0, %v4331_v2 }
 0x44c   :  { %3465 = vmatprep.subr.bf16.mxu1 %v4331_v2 }
 0x4b2   :  { %v941_v7 = vpop.permute.xlu0 %940 }
 0x50a   :  { %v792_v39 = vpop.f32.mrf.mxu1 }
 0x50b   :  { %v793_v40 = vadd.f32 %v792_v39, %v4647_v38 }
 0x50c   :  { %v3445_v41 = vpop.f32.mrf.mxu1 }
 0x50d   :  { %v800_v43 = vsel %vm799_vm4, %v793_v40, -inf }
 0x50e   :  { %801 = vmax.xlane.f32.xlu1 %v800_v43  ;;  %v795_v44 = vpop.f32.mrf.mxu1  ;;  %v3119_v43 = vld [vmem:[#allocation12] ss:$0 sm:$0xff] }
 0x50f   :  { %v796_v45 = vadd.f32 %v795_v44, %v4653_v42  ;;  %v748_v44 = vadd.f32 %v3119_v43, %v4610_v8 }
 0x510   :  { %v3446_v46 = vpop.f32.mrf.mxu1 }
 0x511   :  { %v803_v47 = vsel %vm799_vm4, %v796_v45, -inf }
 0x512   :  { %804 = vmax.xlane.f32.xlu1 %v803_v47 }
 0x597   :  { %v802_v48 = vpop.xlane.xlu1 %801 }
 0x598   :  { %v806_v49 = vsub.f32 %v793_v40, %v802_v48  ;;  %v3680_v48 = vld [vmem:[%s4990_s18 + $0x38] sm:$0xff]  }
 0x59a   :  { %v808_v50 = vmul.f32 1.442695, %v806_v49  ;;  %v749_v49 = vadd.f32 %v3119_v43, %v4612_v11  ;;  %v3705_v43 = vld [vmem:[#allocation17] ss:$8 sps:$4 sm:$0xff]  }
 0x59b   :  { %v805_v51 = vpop.xlane.xlu1 %804 }
 0x59c   :  { %3824 = vpow2.f32 %v808_v50  ;;  %v807_v52 = vsub.f32 %v796_v45, %v805_v51  ;;  %v3681_v51 = vld [vmem:[%s4990_s18 + $0x30] sm:$0xff]  }
 0x59e   :  { %v810_v53 = vmul.f32 1.442695, %v807_v52 }
 0x5a0   :  { %3826 = vpow2.f32 %v810_v53 }
 0x5a9   :  { %v3825_v54 = vpop.eup %3824 }
 0x5aa   :  { %v812_v55 = vsel %vm799_vm4, %v3825_v54, 0.0 }
 0x5ab   :  { %813 = vadd.xlane.f32.xlu1 %v812_v55 }
 0x5ad   :  { %v3827_v56 = vpop.eup %3826 }
 0x5ae   :  { %v815_v57 = vsel %vm799_vm4, %v3827_v56, 0.0 }
 0x5af   :  { %816 = vadd.xlane.f32.xlu1 %v815_v57 }
 0x5c0   :  { %943 = vrot.lane.b32.xlu1 %v751_v32, %s4315_s19 }
 0x634   :  { %v814_v60 = vpop.xlane.xlu1 %813 }
 0x635   :  { %3828 = vrcp.f32 %v814_v60  ;;  %v3683_v60 = vld [vmem:[%s4990_s18 + $0x20] sm:$0xff]  }
 0x638   :  { %v817_v61 = vpop.xlane.xlu1 %816 }
 0x639   :  { %3830 = vrcp.f32 %v817_v61 }
 0x63c   :  { %v944_v4 = vpop.permute.xlu1 %943 }
 0x63d   :  { %v949_v6 = vsel %vm375_vm3, %v944_v4, 0 }
 0x642   :  { %v3829_v62 = vpop.eup %3828 }
 0x643   :  { %v820_v0 = vmul.f32 %v3829_v62, %v3825_v54 }
 0x646   :  { %v3831_v63 = vpop.eup %3830 }
 0x647   :  { %v821_v3 = vmul.f32 %v3831_v63, %v3827_v56 }
 0x649   :  { %v822_v5 = vpack.c.bf16 %v821_v3, %v820_v0 }
 0x64b   :  { %3450 = vmatmul.mubr.msk.bf16.vlgmr.msra.gmra.mxu1 %vm799_vm4, %v822_v5 }
 0x64c   :  { %3466 = vmatpush3.bf16.xpose.msra.mxu1 %v949_v6  ;;  %3467 = vmatprep.mubr.msk.bf16.mxu1 %vm4332_vm0, %v4331_v2 }
 0x64d   :  { %3471 = vmatprep.subr.bf16.mxu1 %v4331_v2 }
 0x653   :  { %3468 = vmatmul.mubr.msk.bf16.vlgmr.msra.gmra.mxu1 %vm375_vm3, %v941_v7 }
 0x654   :  { %3473 = vmatprep.mubr.msk.bf16.mxu1 %vm4332_vm0, %v4331_v2 }
 0x70b   :  { %v861_v17 = vpop.f32.mrf.mxu1 }
 0x70d   :  { %v3451_v18 = vpop.f32.mrf.mxu1 }
 0x70e   :  { %v3686_v18 = vld [vmem:[#allocation17 + $0x74] ss:$8 sps:$4 sm:$0xff]  }
 0x70f   :  { %v864_v19 = vpop.f32.mrf.mxu1 }
 0x710   :  { %v868_v20 = vpack.c.bf16 %v864_v19, %v861_v17  ;;  %v3684_v17 = vld [vmem:[#allocation17 + $0x70] ss:$8 sps:$4 sm:$0xff]  }
 0x711   :  { %v3452_v21 = vpop.f32.mrf.mxu1 }
 0x712   :  { %3462 = vmatmul.mubr.msk.bf16.vlgmr.msra.gmra.mxu0 %vm375_vm3, %v868_v20 }
 0x713   :  { %v985_v22 = vpop.f32.mrf.mxu1  ;;  %3485 = vmatprep.mubr.msk.bf16.mxu0 %vm4332_vm0, %v4331_v2  ;;  %3478 = vmatpush3.bf16.msra.mxu0 %v3680_v48 }
 0x714   :  { %v986_v23 = vadd.f32 %v985_v22, %v4647_v38  ;;  %3479 = vmatprep.subr.bf16.mxu0 %v4331_v2 }
 0x715   :  { %v3469_v24 = vpop.f32.mrf.mxu1 }
 0x716   :  { %v992_v25 = vsel %vm799_vm4, %v986_v23, -inf }
 0x717   :  { %993 = vmax.xlane.f32.xlu1 %v992_v25  ;;  %v988_v9 = vpop.f32.mrf.mxu1  ;;  %3480 = vmatpush3.bf16.msra.mxu0 %v3681_v51 }
 0x718   :  { %v989_v26 = vadd.f32 %v988_v9, %v4653_v42  ;;  %3481 = vmatprep.subr.bf16.mxu0 %v4331_v2 }
 0x719   :  { %v3470_v27 = vpop.f32.mrf.mxu1 }
 0x71a   :  { %v995_v28 = vsel %vm799_vm4, %v989_v26, -inf  ;;  %v3687_v27 = vld [vmem:[#allocation17 + $0x60] ss:$8 sps:$4 sm:$0xff]  }
 0x71b   :  { %996 = vmax.xlane.f32.xlu0 %v995_v28  ;;  %3482 = vmatpush3.bf16.msra.mxu0 %v3682_v59  ;;  %v3692_v28 = vld [vmem:[#allocation17 + $0x54] ss:$8 sps:$4 sm:$0xff]  }
 0x71c   :  { %3483 = vmatprep.subr.bf16.mxu0 %v4331_v2  ;;  %v3709_v59 = vld [vmem:[#allocation20 + $0x38] sm:$0xff]  }
 0x71f   :  { %3484 = vmatpush3.bf16.msra.mxu0 %v3683_v60  ;;  %v3710_v60 = vld [vmem:[#allocation20 + $0x70] sm:$0xff]  }
 0x7a0   :  { %v994_v29 = vpop.xlane.xlu1 %993 }
 0x7a1   :  { %v998_v30 = vsub.f32 %v986_v23, %v994_v29  ;;  %v3690_v29 = vld [vmem:[#allocation17 + $0x50] ss:$8 sps:$4 sm:$0xff]  }
 0x7a3   :  { %v1000_v32 = vmul.f32 1.442695, %v998_v30  ;;  %v3693_v30 = vld [vmem:[#allocation17 + $0x40] ss:$8 sps:$4 sm:$0xff]  }
 0x7a4   :  { %v997_v33 = vpop.xlane.xlu0 %996 }
 0x7a5   :  { %3832 = vpow2.f32 %v1000_v32  ;;  %v999_v34 = vsub.f32 %v989_v26, %v997_v33  ;;  %v3689_v26 = vld [vmem:[#allocation17 + $0x64] ss:$8 sps:$4 sm:$0xff]   ;;  %v3698_v33 = vld [vmem:[#allocation17 + $0x34] ss:$8 sps:$4 sm:$0xff]  }
 0x7a6   :  { %v3695_v32 = vld [vmem:[#allocation17 + $0x44] ss:$8 sps:$4 sm:$0xff]  }
 0x7a7   :  { %v1002_v35 = vmul.f32 1.442695, %v999_v34  ;;  %v3696_v34 = vld [vmem:[#allocation17 + $0x30] ss:$8 sps:$4 sm:$0xff]  }
 0x7a9   :  { %3834 = vpow2.f32 %v1002_v35  ;;  %v3701_v35 = vld [vmem:[#allocation17 + $0x24] ss:$8 sps:$4 sm:$0xff]  }
 0x7b2   :  { %v3833_v36 = vpop.eup %3832 }
 0x7b3   :  { %v1004_v39 = vsel %vm799_vm4, %v3833_v36, 0.0 }
 0x7b4   :  { %1005 = vadd.xlane.f32.xlu1 %v1004_v39  ;;  %v3704_v39 = vld [vmem:[#allocation17 + $0x14] ss:$8 sps:$4 sm:$0xff]  }
 0x7b6   :  { %v3835_v40 = vpop.eup %3834 }
 0x7b7   :  { %v1007_v41 = vsel %vm799_vm4, %v3835_v40, 0.0 }
 0x7b8   :  { %1008 = vadd.xlane.f32.xlu1 %v1007_v41  ;;  %v3707_v41 = vld [vmem:[#allocation17 + $0x4] ss:$8 sps:$4 sm:$0xff]  }
 0x7c9   :  { %1016 = vrot.lane.b32.xlu1 %v4637_v37, %s4315_s19 }
 0x7d2   :  { %v930_v45 = vpop.f32.mrf.mxu0 }
 0x7d3   :  { %v937_v46 = vadd.f32 %v930_v45, %v748_v44 }
 0x7d4   :  { %v3463_v47 = vpop.f32.mrf.mxu0 }
 0x7d6   :  { %v933_v50 = vpop.f32.mrf.mxu0 }
 0x7d7   :  { %v938_v52 = vadd.f32 %v933_v50, %v749_v49 }
 0x7d8   :  { %v3464_v37 = vpop.f32.mrf.mxu0 }
 0x83d   :  { %v1006_v8 = vpop.xlane.xlu1 %1005 }
 0x83e   :  { %3836 = vrcp.f32 %v1006_v8 }
 0x841   :  { %v1009_v53 = vpop.xlane.xlu1 %1008 }
 0x842   :  { %3838 = vrcp.f32 %v1009_v53 }
 0x845   :  { %v1017_v54 = vpop.permute.xlu1 %1016 }
 0x846   :  { %3472 = vmatpush3.bf16.msra.mxu1 %v1017_v54  ;;  %v3135_v54 = vld [vmem:[#allocation15] ss:$0 sm:$0xff] }
 0x847   :  { %1283 = vmatprep.subr.bf16.mxu1 %v3686_v18  ;;  %v3723_v18 = vld [vmem:[#allocation20] sm:$0xff]  }
 0x84b   :  { %v3837_v11 = vpop.eup %3836 }
 0x84c   :  { %v1012_v56 = vmul.f32 %v3837_v11, %v3833_v36  ;;  %v3699_v36 = vld [vmem:[#allocation17 + $0x20] ss:$8 sps:$4 sm:$0xff]  }
 0x84f   :  { %v3839_v55 = vpop.eup %3838 }
 0x850   :  { %v1013_v57 = vmul.f32 %v3839_v55, %v3835_v40  ;;  %v3702_v40 = vld [vmem:[#allocation17 + $0x10] ss:$8 sps:$4 sm:$0xff]  }
 0x852   :  { %v1014_v58 = vpack.c.bf16 %v1013_v57, %v1012_v56 }
 0x854   :  { %3474 = vmatmul.mubr.msk.bf16.vlgmr.msra.gmra.mxu1 %vm799_vm4, %v1014_v58  ;;  %v3708_v58 = vld [vmem:[#allocation20 + $0x78] sm:$0xff]  }
 0x855   :  { %1315 = vmatprep.mubr.bf16.mxu1 %v4330_v1  ;;  %1284 = vmatpush1.bf16.msra.mxu1 %v3684_v17  ;;  %v3722_v17 = vld [vmem:[#allocation20 + $0x40] sm:$0xff]  }
 0x856   :  { %1285 = vmatprep.subr.bf16.mxu1 %v3689_v26  ;;  %3318 = vmatprep.subr.bf16.mxu0 %v3708_v58 }
 0x859   :  { %1286 = vmatpush1.bf16.msra.mxu1 %v3687_v27 }
 0x85a   :  { %1287 = vmatprep.subr.bf16.mxu1 %v3692_v28 }
 0x85d   :  { %1288 = vmatpush1.bf16.msra.mxu1 %v3690_v29 }
 0x85e   :  { %1289 = vmatprep.subr.bf16.mxu1 %v3695_v32 }
 0x861   :  { %1290 = vmatpush1.bf16.msra.mxu1 %v3693_v30 }
 0x862   :  { %1291 = vmatprep.subr.bf16.mxu1 %v3698_v33 }
 0x865   :  { %1292 = vmatpush1.bf16.msra.mxu1 %v3696_v34 }
 0x866   :  { %1293 = vmatprep.subr.bf16.mxu1 %v3701_v35 }
 0x869   :  { %1294 = vmatpush1.bf16.msra.mxu1 %v3699_v36 }
 0x86a   :  { %1295 = vmatprep.subr.bf16.mxu1 %v3704_v39 }
 0x86d   :  { %1296 = vmatpush1.bf16.msra.mxu1 %v3702_v40 }
 0x86e   :  { %1297 = vmatprep.subr.bf16.mxu1 %v3707_v41 }
 0x871   :  { %1298 = vmatpush1.bf16.msra.mxu1 %v3705_v43 }
 0x914   :  { %v1056_v61 = vpop.f32.mrf.mxu1 }
 0x916   :  { %v3475_v62 = vpop.f32.mrf.mxu1 }
 0x917   :  { %v3712_v62 = vld [vmem:[#allocation20 + $0x68] sm:$0xff]  }
 0x918   :  { %v1059_v63 = vpop.f32.mrf.mxu1 }
 0x919   :  { %v1063_v0 = vpack.c.bf16 %v1059_v63, %v1056_v61  ;;  %v3711_v61 = vld [vmem:[#allocation20 + $0x30] sm:$0xff]   ;;  %v3713_v63 = vld [vmem:[#allocation20 + $0x28] sm:$0xff]  }
 0x91a   :  { %v3476_v3 = vpop.f32.mrf.mxu1 }
 0x91b   :  { %3486 = vmatmul.mubr.msk.bf16.vlgmr.msra.gmra.mxu0 %vm375_vm3, %v1063_v0  ;;  %v3714_v0 = vld [vmem:[#allocation20 + $0x60] sm:$0xff]  }
 0x91c   :  { %3319 = vmatpush3.bf16.msra.mxu0 %v3709_v59  ;;  %v3715_v3 = vld [vmem:[#allocation20 + $0x20] sm:$0xff]  }
 0x91d   :  { %3320 = vmatprep.subr.bf16.mxu0 %v3710_v60 }
 0x920   :  { %3321 = vmatpush3.bf16.msra.mxu0 %v3711_v61 }
 0x921   :  { %3322 = vmatprep.subr.bf16.mxu0 %v3712_v62 }
 0x924   :  { %3323 = vmatpush3.bf16.msra.mxu0 %v3713_v63 }
 0x925   :  { %3324 = vmatprep.subr.bf16.mxu0 %v3714_v0 }
 0x928   :  { %3325 = vmatpush3.bf16.msra.mxu0 %v3715_v3 }
 0x9db   :  { %v1125_v4 = vpop.f32.mrf.mxu0 }
 0x9dc   :  { %v1132_v5 = vadd.f32 %v1125_v4, %v937_v46  ;;  %v3716_v4 = vld [vmem:[#allocation20 + $0x58] sm:$0xff]  }
 0x9dd   :  { %v3487_v6 = vpop.f32.mrf.mxu0  ;;  %3326 = vmatprep.subr.bf16.mxu0 %v3716_v4 }
 0x9de   :  { %1136 = vadd.xlane.f32.xlu0 %v1132_v5  ;;  %v3718_v6 = vld [vmem:[#allocation20 + $0x50] sm:$0xff]  }
 0x9df   :  { %v1128_v7 = vpop.f32.mrf.mxu0 }
 0x9e0   :  { %v1133_v12 = vadd.f32 %v1128_v7, %v938_v52  ;;  %v3134_v52 = vld [vmem:[#allocation14] ss:$0 sm:$0xff]  ;;  %v3719_v7 = vld [vmem:[#allocation20 + $0x10] sm:$0xff]  }
 0x9e1   :  { %v3488_v15 = vpop.f32.mrf.mxu0 }
 0x9e2   :  { %1138 = vadd.xlane.f32.xlu0 %v1133_v12  ;;  %v3721_v15 = vld [vmem:[#allocation20 + $0x8] sm:$0xff]  }
 0xa67   :  { %v1137_v19 = vpop.xlane.xlu0 %1136 }
 0xa68   :  { %v1140_v20 = vmul.f32 0.0078125, %v1137_v19  ;;  %v1191_v19 = vld [vmem:[#allocation18] sm:$0x3] }
 0xa6a   :  { %v1142_v21 = vsub.f32 %v1132_v5, %v1140_v20  ;;  %v3717_v5 = vld [vmem:[#allocation20 + $0x18] sm:$0xff]   ;;  %v1196_v20 = vrot.slane %v1191_v19, %v4624_v14 }
 0xa6b   :  { %v1139_v22 = vpop.xlane.xlu0 %1138  ;;  %3327 = vmatpush3.bf16.msra.mxu0 %v3717_v5 }
 0xa6c   :  { %v1141_v23 = vmul.f32 0.0078125, %v1139_v22  ;;  %v1144_v24 = vmul.f32 %v1142_v21, %v1142_v21  ;;  %3328 = vmatprep.subr.bf16.mxu0 %v3718_v6 }
 0xa6e   :  { %v1143_v25 = vsub.f32 %v1133_v12, %v1141_v23  ;;  %1146 = vadd.xlane.f32.xlu0 %v1144_v24  ;;  %v3720_v12 = vld [vmem:[#allocation20 + $0x48] sm:$0xff]  }
 0xa6f   :  { %3329 = vmatpush3.bf16.msra.mxu0 %v3719_v7 }
 0xa70   :  { %v1145_v9 = vmul.f32 %v1143_v25, %v1143_v25  ;;  %3330 = vmatprep.subr.bf16.mxu0 %v3720_v12 }
 0xa72   :  { %1148 = vadd.xlane.f32.xlu0 %v1145_v9 }
 0xa73   :  { %3331 = vmatpush3.bf16.msra.mxu0 %v3721_v15  ;;  %v3152_v15 = vld [vmem:[#allocation21] ss:$0 sm:$0xff] }
 0xa74   :  { %3332 = vmatprep.subr.bf16.mxu0 %v3722_v17 }
 0xa77   :  { %3333 = vmatpush3.bf16.msra.mxu0 %v3723_v18 }
 0xa78   :  { %3489 = vmatprep.subr.bf16.mxu0 %v4331_v2 }
 0xaf7   :  { %v1147_v44 = vpop.xlane.xlu0 %1146 }
 0xaf8   :  { %v1150_v45 = vmul.f32 0.0078125, %v1147_v44 }
 0xafa   :  { %v1152_v46 = vadd.f32 1e-12, %v1150_v45 }
 0xafb   :  { %v1149_v47 = vpop.xlane.xlu0 %1148 }
 0xafc   :  { %3840 = vrsqrt.f32 %v1152_v46  ;;  %v1151_v48 = vmul.f32 0.0078125, %v1149_v47 }
 0xafe   :  { %v1153_v49 = vadd.f32 1e-12, %v1151_v48 }
 0xb00   :  { %3842 = vrsqrt.f32 %v1153_v49 }
 0xb09   :  { %v3841_v50 = vpop.eup %3840 }
 0xb0a   :  { %v1156_v51 = vmul.f32 %v3841_v50, %v1142_v21  ;;  %v1200_v21 = vrot.slane %v1191_v19, %v4627_v16 }
 0xb0c   :  { %v1164_v53 = vmul.f32 %v3134_v52, %v1156_v51 }
 0xb0d   :  { %v3843_v37 = vpop.eup %3842 }
 0xb0e   :  { %v1157_v8 = vmul.f32 %v3843_v37, %v1143_v25  ;;  %v4716_v55 = vadd.f32 %v3135_v54, %v1164_v53 }
 0xb10   :  { %v1165_v11 = vmul.f32 %v3134_v52, %v1157_v8 }
 0xb12   :  { %v4718_v56 = vadd.f32 %v3135_v54, %v1165_v11 }
 0xb14   :  { %v1174_v57 = vpack.c.bf16 %v4718_v56, %v4716_v55 }
 0xb16   :  { %1316 = vmatmul.mubr.bf16.vlgmr.msra.gmra.mxu1 %v1174_v57 }
 0xb17   :  { %1794 = vmatprep.mubr.bf16.mxu1 %v4330_v1 }
 0xbd6   :  { %v1317_v22 = vpop.f32.mrf.mxu1 }
 0xbd7   :  { %v1318_v23 = vadd.f32 %v1317_v22, %v1196_v20 }
 0xbd8   :  { %v1319_v24 = vpop.f32.mrf.mxu1 }
 0xbd9   :  { %v1330_v25 = vmul.f32 0.044715, %v1318_v23  ;;  %v1320_v9 = vadd.f32 %v1319_v24, %v1200_v21  ;;  %v1326_v63 = vmul.f32 0.5, %v1318_v23 }
 0xbda   :  { %v1321_v26 = vpop.f32.mrf.mxu1 }
 0xbdb   :  { %v1334_v27 = vmul.f32 %v1330_v25, %v1318_v23  ;;  %v1331_v28 = vmul.f32 0.044715, %v1320_v9  ;;  %v1322_v29 = vadd.f32 %v1321_v26, %v1196_v20  ;;  %v1327_v60 = vmul.f32 0.5, %v1320_v9  ;;  %v3726_v26 = vld [vmem:[#allocation9 + $0x16c] ss:$12 sps:$4 sm:$0xff]  }
 0xbdc   :  { %v1323_v30 = vpop.f32.mrf.mxu1  ;;  %1762 = vmatprep.subr.bf16.mxu1 %v3726_v26 }
 0xbdd   :  { %v1338_v32 = vmul.f32 %v1334_v27, %v1318_v23  ;;  %v1335_v33 = vmul.f32 %v1331_v28, %v1320_v9  ;;  %v1332_v34 = vmul.f32 0.044715, %v1322_v29  ;;  %v1324_v35 = vadd.f32 %v1323_v30, %v1200_v21  ;;  %v3727_v27 = vld [vmem:[#allocation9 + $0x170] ss:$12 sps:$4 sm:$0xff]  }
 0xbde   :  { %v1328_v58 = vmul.f32 0.5, %v1322_v29 }
 0xbdf   :  { %v1342_v36 = vadd.f32 %v1338_v32, %v1318_v23  ;;  %v1339_v39 = vmul.f32 %v1335_v33, %v1320_v9  ;;  %v1336_v40 = vmul.f32 %v1332_v34, %v1322_v29  ;;  %v1333_v41 = vmul.f32 0.044715, %v1324_v35 }
 0xbe0   :  { %v1329_v61 = vmul.f32 0.5, %v1324_v35 }
 0xbe1   :  { %v1340_v43 = vmul.f32 %v1336_v40, %v1322_v29  ;;  %v1337_v44 = vmul.f32 %v1333_v41, %v1324_v35  ;;  %v1343_v45 = vadd.f32 %v1339_v39, %v1320_v9  ;;  %v1346_v46 = vmul.f32 0.7978846, %v1342_v36  ;;  %v3724_v9 = vld [vmem:[#allocation9 + $0x168] ss:$12 sps:$4 sm:$0xff]   ;;  %v3728_v36 = vld [vmem:[#allocation9 + $0x150] ss:$12 sps:$4 sm:$0xff]  }
 0xbe2   :  { %1763 = vmatpush1.bf16.msra.mxu1 %v3724_v9  ;;  %v3731_v39 = vld [vmem:[#allocation9 + $0x158] ss:$12 sps:$4 sm:$0xff]   ;;  %v3734_v40 = vld [vmem:[#allocation9 + $0x13c] ss:$12 sps:$4 sm:$0xff]  }
 0xbe3   :  { %v1344_v47 = vadd.f32 %v1340_v43, %v1322_v29  ;;  %v1341_v48 = vmul.f32 %v1337_v44, %v1324_v35  ;;  %v1347_v49 = vmul.f32 0.7978846, %v1343_v45  ;;  %v3732_v41 = vld [vmem:[#allocation9 + $0x138] ss:$12 sps:$4 sm:$0xff]   ;;  %v3735_v43 = vld [vmem:[#allocation9 + $0x140] ss:$12 sps:$4 sm:$0xff]  }
 0xbe4   :  { %v3736_v44 = vld [vmem:[#allocation9 + $0x120] ss:$12 sps:$4 sm:$0xff]   ;;  %v3738_v45 = vld [vmem:[#allocation9 + $0x124] ss:$12 sps:$4 sm:$0xff]  }
 0xbe5   :  { %v1348_v50 = vmul.f32 0.7978846, %v1344_v47  ;;  %v1345_v51 = vadd.f32 %v1341_v48, %v1324_v35  ;;  %3844 = vtanh.f32 %v1347_v49  ;;  %v3730_v35 = vld [vmem:[#allocation9 + $0x154] ss:$12 sps:$4 sm:$0xff]   ;;  %v3742_v47 = vld [vmem:[#allocation9 + $0x10c] ss:$12 sps:$4 sm:$0xff]  }
 0xbe6   :  { %3846 = vtanh.f32 %v1346_v46  ;;  %1764 = vmatprep.subr.bf16.mxu1 %v3730_v35  ;;  %v3739_v46 = vld [vmem:[#allocation9 + $0x128] ss:$12 sps:$4 sm:$0xff]   ;;  %v3743_v49 = vld [vmem:[#allocation9 + $0x110] ss:$12 sps:$4 sm:$0xff]  }
 0xbe7   :  { %3848 = vtanh.f32 %v1348_v50  ;;  %v1349_v52 = vmul.f32 0.7978846, %v1345_v51  ;;  %1765 = vmatpush1.bf16.msra.mxu1 %v3728_v36  ;;  %v3740_v48 = vld [vmem:[#allocation9 + $0x108] ss:$12 sps:$4 sm:$0xff]   ;;  %v3744_v51 = vld [vmem:[#allocation9 + $0xf0] ss:$12 sps:$4 sm:$0xff]  }
 0xbe8   :  { %1766 = vmatprep.subr.bf16.mxu1 %v3734_v40  ;;  %v3746_v50 = vld [vmem:[#allocation9 + $0xf4] ss:$12 sps:$4 sm:$0xff]  }
 0xbe9   :  { %3850 = vtanh.f32 %v1349_v52  ;;  %v3747_v52 = vld [vmem:[#allocation9 + $0xf8] ss:$12 sps:$4 sm:$0xff]  }
 0xbeb   :  { %1767 = vmatpush1.bf16.msra.mxu1 %v3732_v41 }
 0xbec   :  { %1768 = vmatprep.subr.bf16.mxu1 %v3738_v45 }
 0xbef   :  { %1769 = vmatpush1.bf16.msra.mxu1 %v3736_v44 }
 0xbf0   :  { %1770 = vmatprep.subr.bf16.mxu1 %v3742_v47 }
 0xbf2   :  { %v3845_v37 = vpop.eup %3844 }
 0xbf3   :  { %v3847_v8 = vpop.eup %3846  ;;  %v1355_v54 = vadd.f32 1.0, %v3845_v37  ;;  %1771 = vmatpush1.bf16.msra.mxu1 %v3740_v48  ;;  %v3750_v37 = vld [vmem:[#allocation9 + $0xdc] ss:$12 sps:$4 sm:$0xff]  }
 0xbf4   :  { %v3849_v53 = vpop.eup %3848  ;;  %v1354_v59 = vadd.f32 1.0, %v3847_v8  ;;  %1772 = vmatprep.subr.bf16.mxu1 %v3746_v50  ;;  %v3748_v8 = vld [vmem:[#allocation9 + $0xd8] ss:$12 sps:$4 sm:$0xff]  }
 0xbf5   :  { %v1356_v11 = vadd.f32 1.0, %v3849_v53  ;;  %v1359_v3 = vmul.f32 %v1355_v54, %v1327_v60  ;;  %v3751_v53 = vld [vmem:[#allocation9 + $0xe0] ss:$12 sps:$4 sm:$0xff]   ;;  %v3754_v54 = vld [vmem:[#allocation9 + $0xc4] ss:$12 sps:$4 sm:$0xff]  }
 0xbf6   :  { %v3851_v57 = vpop.eup %3850  ;;  %v1358_v5 = vmul.f32 %v1354_v59, %v1326_v63 }
 0xbf7   :  { %v1357_v62 = vadd.f32 1.0, %v3851_v57  ;;  %v1360_v0 = vmul.f32 %v1356_v11, %v1328_v58  ;;  %1773 = vmatpush1.bf16.msra.mxu1 %v3744_v51  ;;  %v3752_v11 = vld [vmem:[#allocation9 + $0xc0] ss:$12 sps:$4 sm:$0xff]   ;;  %v3755_v57 = vld [vmem:[#allocation9 + $0xc8] ss:$12 sps:$4 sm:$0xff]  }
 0xbf8   :  { %1774 = vmatprep.subr.bf16.mxu1 %v3750_v37 }
 0xbf9   :  { %v1361_v4 = vmul.f32 %v1357_v62, %v1329_v61  ;;  %v1362_v7 = vpack.c.bf16 %v1360_v0, %v1358_v5 }
 0xbfb   :  { %v1363_v6 = vpack.c.bf16 %v1361_v4, %v1359_v3  ;;  %1775 = vmatpush1.bf16.msra.mxu1 %v3748_v8  ;;  %v3169_v4 = vld [vmem:[#allocation23] ss:$0 sm:$0xff] }
 0xbfc   :  { %1776 = vmatprep.subr.bf16.mxu1 %v3754_v54 }
 0xbfd   :  { %1531 = vmatprep.mubr.bf16.mxu0 %v1363_v6 }
 0xbfe   :  { %1532 = vmatmul.mubr.bf16.vlgmr.msra.gmra.mxu0 %v1362_v7 }
 0xbff   :  { %3505 = vmatprep.mubr.msk.bf16.mxu0 %vm4332_vm0, %v4331_v2  ;;  %3490 = vmatpush3.bf16.msra.mxu0 %v3727_v27 }
 0xc00   :  { %3491 = vmatprep.subr.bf16.mxu0 %v4331_v2  ;;  %1777 = vmatpush1.bf16.msra.mxu1 %v3752_v11 }
 0xc01   :  { %3509 = vmatprep.subr.bf16.mxu1 %v4331_v2 }
 0xc03   :  { %3492 = vmatpush3.bf16.msra.mxu0 %v3731_v39 }
 0xc04   :  { %3493 = vmatprep.subr.bf16.mxu0 %v4331_v2 }
 0xc07   :  { %3494 = vmatpush3.bf16.msra.mxu0 %v3735_v43 }
 0xc08   :  { %3495 = vmatprep.subr.bf16.mxu0 %v4331_v2 }
 0xc0b   :  { %3496 = vmatpush3.bf16.msra.mxu0 %v3739_v46 }
 0xc0c   :  { %3497 = vmatprep.subr.bf16.mxu0 %v4331_v2 }
 0xc0f   :  { %3498 = vmatpush3.bf16.msra.mxu0 %v3743_v49 }
 0xc10   :  { %3499 = vmatprep.subr.bf16.mxu0 %v4331_v2 }
 0xc13   :  { %3500 = vmatpush3.bf16.msra.mxu0 %v3747_v52 }
 0xc14   :  { %3501 = vmatprep.subr.bf16.mxu0 %v4331_v2 }
 0xc17   :  { %3502 = vmatpush3.bf16.msra.mxu0 %v3751_v53 }
 0xc18   :  { %3503 = vmatprep.subr.bf16.mxu0 %v4331_v2 }
 0xc1b   :  { %3504 = vmatpush3.bf16.msra.mxu0 %v3755_v57 }
 0xc1c   :  { %3521 = vmatprep.subr.bf16.mxu0 %v4331_v2 }
 0xcbe   :  { %v3334_v12 = vpop.f32.mrf.mxu0 }
 0xcc0   :  { %v3335_v17 = vpop.f32.mrf.mxu0 }
 0xcc1   :  { %v3336_v18 = vadd.f32 %v3335_v17, %v3334_v12  ;;  %v3170_v12 = vld [vmem:[#allocation24] ss:$0 sm:$0xff] }
 0xcc2   :  { %v3337_v19 = vpop.f32.mrf.mxu0 }
 0xcc3   :  { %v1534_v20 = vadd.f32 %v3336_v18, %v3152_v15 }
 0xcc4   :  { %v3338_v21 = vpop.f32.mrf.mxu0 }
 0xcc5   :  { %v3339_v22 = vadd.f32 %v3338_v21, %v3337_v19  ;;  %v1540_v23 = vadd.f32 %v1534_v20, %v4716_v55  ;;  %v1617_v20 = vld [vmem:[#allocation11 + $0x3] sm:$0x7] }
 0xcc6   :  { %v1626_v9 = vrot.slane %v1617_v20, %v4627_v16  ;;  %v1630_v36 = vrot.slane %v1617_v20, %v508_v31 }
 0xcc7   :  { %v1537_v24 = vadd.f32 %v3339_v22, %v3152_v15  ;;  %1544 = vadd.xlane.f32.xlu1 %v1540_v23 }
 0xcc9   :  { %v1541_v25 = vadd.f32 %v1537_v24, %v4718_v56 }
 0xccb   :  { %1546 = vadd.xlane.f32.xlu0 %v1541_v25 }
 0xd50   :  { %v1545_v28 = vpop.xlane.xlu1 %1544 }
 0xd51   :  { %v1548_v29 = vmul.f32 0.0078125, %v1545_v28 }
 0xd53   :  { %v4731_v30 = vsub.f32 %v1540_v23, %v1548_v29  ;;  %v1622_v23 = vrot.slane %v1617_v20, %v4624_v14 }
 0xd54   :  { %v1547_v32 = vpop.xlane.xlu0 %1546 }
 0xd55   :  { %v1549_v33 = vmul.f32 0.0078125, %v1547_v32  ;;  %v1552_v55 = vmul.f32 %v4731_v30, %v4731_v30 }
 0xd57   :  { %v4735_v34 = vsub.f32 %v1541_v25, %v1549_v33  ;;  %1554 = vadd.xlane.f32.xlu0 %v1552_v55 }
 0xd59   :  { %v1553_v56 = vmul.f32 %v4735_v34, %v4735_v34 }
 0xd5b   :  { %1556 = vadd.xlane.f32.xlu0 %v1553_v56 }
 0xde0   :  { %v1555_v58 = vpop.xlane.xlu0 %1554 }
 0xde1   :  { %v1558_v59 = vmul.f32 0.0078125, %v1555_v58 }
 0xde3   :  { %v1560_v60 = vadd.f32 1e-12, %v1558_v59  ;;  %v3756_v59 = vld [vmem:[%s4990_s18 + $0x58] sm:$0xff]  }
 0xde4   :  { %v1557_v61 = vpop.xlane.xlu0 %1556 }
 0xde5   :  { %3852 = vrsqrt.f32 %v1560_v60  ;;  %v1559_v62 = vmul.f32 0.0078125, %v1557_v61  ;;  %v3757_v60 = vld [vmem:[%s4990_s18 + $0x50] sm:$0xff]  }
 0xde7   :  { %v1561_v63 = vadd.f32 1e-12, %v1559_v62 }
 0xde9   :  { %3854 = vrsqrt.f32 %v1561_v63 }
 0xdf2   :  { %v3853_v0 = vpop.eup %3852 }
 0xdf3   :  { %v1564_v3 = vmul.f32 %v3853_v0, %v4731_v30 }
 0xdf5   :  { %v1572_v7 = vmul.f32 %v3169_v4, %v1564_v3 }
 0xdf6   :  { %v3855_v5 = vpop.eup %3854 }
 0xdf7   :  { %v1565_v6 = vmul.f32 %v3855_v5, %v4735_v34  ;;  %v4749_v17 = vadd.f32 %v3170_v12, %v1572_v7 }
 0xdf9   :  { %v1573_v15 = vmul.f32 %v3169_v4, %v1565_v6 }
 0xdfb   :  { %v4751_v18 = vadd.f32 %v3170_v12, %v1573_v15  ;;  %v3758_v15 = vld [vmem:[%s4990_s18 + $0x48] sm:$0xff]  }
 0xdfd   :  { %v1582_v19 = vpack.c.bf16 %v4751_v18, %v4749_v17 }
 0xdff   :  { %1795 = vmatmul.mubr.bf16.vlgmr.msra.gmra.mxu1 %v1582_v19  ;;  %3506 = vmatmul.mubr.bf16.vlgmr.msra.gmra.mxu0 %v1582_v19  ;;  %v3759_v19 = vld [vmem:[%s4990_s18 + $0x40] sm:$0xff]  }
 0xe00   :  { %3511 = vmatprep.mubr.msk.bf16.mxu1 %vm4332_vm0, %v4331_v2  ;;  %3529 = vmatprep.mubr.msk.bf16.mxu0 %vm4332_vm0, %v4331_v2 }
 0xe01   :  { %3522 = vmatpush3.bf16.msra.mxu0 %v3756_v59 }
 0xe02   :  { %3523 = vmatprep.subr.bf16.mxu0 %v4331_v2 }
 0xe05   :  { %3524 = vmatpush3.bf16.msra.mxu0 %v3757_v60 }
 0xe06   :  { %3525 = vmatprep.subr.bf16.mxu0 %v4331_v2 }
 0xe09   :  { %3526 = vmatpush3.bf16.msra.mxu0 %v3758_v15 }
 0xe0a   :  { %3527 = vmatprep.subr.bf16.mxu0 %v4331_v2 }
 0xe0d   :  { %3528 = vmatpush3.bf16.msra.mxu0 %v3759_v19 }
 0xe0e   :  { %3545 = vmatprep.subr.bf16.mxu0 %v4331_v2 }
 0xebf   :  { %v1796_v21 = vpop.f32.mrf.mxu1  ;;  %v1839_v22 = vpop.f32.mrf.mxu0 }
 0xec0   :  { %v1797_v28 = vadd.f32 %v1796_v21, %v1622_v23  ;;  %v1840_v40 = vadd.f32 %v1839_v22, %v1630_v36 }
 0xec1   :  { %v1798_v24 = vpop.f32.mrf.mxu1  ;;  %v3507_v25 = vpop.f32.mrf.mxu0 }
 0xec2   :  { %v1799_v33 = vadd.f32 %v1798_v24, %v1626_v9 }
 0xec3   :  { %v1800_v26 = vpop.f32.mrf.mxu1  ;;  %v1842_v27 = vpop.f32.mrf.mxu0 }
 0xec4   :  { %v1801_v29 = vadd.f32 %v1800_v26, %v1622_v23  ;;  %v1843_v39 = vadd.f32 %v1842_v27, %v1630_v36 }
 0xec5   :  { %v1802_v30 = vpop.f32.mrf.mxu1  ;;  %v3508_v32 = vpop.f32.mrf.mxu0 }
 0xec6   :  { %v1803_v55 = vadd.f32 %v1802_v30, %v1626_v9  ;;  %v1873_v34 = vpack.c.bf16 %v1801_v29, %v1797_v28  ;;  %v4766_v41 = vpack.c.bf16 %v1843_v39, %v1840_v40 }
 0xec8   :  { %v1874_v56 = vpack.c.bf16 %v1803_v55, %v1799_v33  ;;  %2062 = vrot.lane.b32.xlu1 %v1873_v34, %s4315_s19 }
 0xeca   :  { %v1879_v35 = vsel %vm375_vm3, %v1874_v56, 0 }
 0xecb   :  { %3510 = vmatpush3.bf16.xpose.msra.mxu1 %v1879_v35 }
 0xecc   :  { %3515 = vmatprep.subr.bf16.mxu1 %v4331_v2 }
 0xed2   :  { %3512 = vmatmul.mubr.msk.bf16.vlgmr.msra.gmra.mxu1 %vm375_vm3, %v1873_v34 }
 0xed3   :  { %3516 = vmatpush3.bf16.msra.mxu1 %v4766_v41  ;;  %3517 = vmatprep.mubr.msk.bf16.mxu1 %vm4332_vm0, %v4331_v2 }
 0xed4   :  { %3533 = vmatprep.subr.bf16.mxu1 %v4331_v2 }
 0xf3a   :  { %v2063_v12 = vpop.permute.xlu1 %2062 }
 0xf92   :  { %v1915_v43 = vpop.f32.mrf.mxu1 }
 0xf93   :  { %v1916_v44 = vadd.f32 %v1915_v43, %v4647_v38 }
 0xf94   :  { %v3513_v31 = vpop.f32.mrf.mxu1 }
 0xf95   :  { %v1922_v45 = vsel %vm799_vm4, %v1916_v44, -inf }
 0xf96   :  { %1923 = vmax.xlane.f32.xlu0 %v1922_v45  ;;  %v1918_v46 = vpop.f32.mrf.mxu1 }
 0xf97   :  { %v1919_v47 = vadd.f32 %v1918_v46, %v4653_v42 }
 0xf98   :  { %v3514_v48 = vpop.f32.mrf.mxu1 }
 0xf99   :  { %v1925_v49 = vsel %vm799_vm4, %v1919_v47, -inf }
 0xf9a   :  { %1926 = vmax.xlane.f32.xlu0 %v1925_v49 }
0x101f   :  { %v1924_v50 = vpop.xlane.xlu0 %1923 }
0x1020   :  { %v1928_v51 = vsub.f32 %v1916_v44, %v1924_v50  ;;  %v3211_v44 = vld [vmem:[#allocation12 + $0x1] ss:$0 sm:$0xff]  ;;  %v3761_v50 = vld [vmem:[%s4990_s18 + $0x70] sm:$0xff]  }
0x1021   :  { %v1872_v48 = vadd.f32 %v3211_v44, %v4751_v18 }
0x1022   :  { %v1930_v52 = vmul.f32 1.442695, %v1928_v51 }
0x1023   :  { %v1927_v37 = vpop.xlane.xlu0 %1926 }
0x1024   :  { %3856 = vpow2.f32 %v1930_v52  ;;  %v1929_v8 = vsub.f32 %v1919_v47, %v1927_v37  ;;  %v3760_v47 = vld [vmem:[%s4990_s18 + $0x78] sm:$0xff]  }
0x1026   :  { %v1932_v53 = vmul.f32 1.442695, %v1929_v8 }
0x1028   :  { %3858 = vpow2.f32 %v1932_v53 }
0x1031   :  { %v3857_v54 = vpop.eup %3856 }
0x1032   :  { %v1934_v11 = vsel %vm799_vm4, %v3857_v54, 0.0 }
0x1033   :  { %1935 = vadd.xlane.f32.xlu0 %v1934_v11 }
0x1035   :  { %v3859_v57 = vpop.eup %3858 }
0x1036   :  { %v1937_v58 = vsel %vm799_vm4, %v3859_v57, 0.0 }
0x1037   :  { %1938 = vadd.xlane.f32.xlu0 %v1937_v58  ;;  %v3763_v58 = vld [vmem:[%s4990_s18 + $0x60] sm:$0xff]  }
0x104d   :  { %2065 = vrot.lane.b32.xlu0 %v1874_v56, %s4315_s19 }
0x10bc   :  { %v1936_v61 = vpop.xlane.xlu0 %1935 }
0x10bd   :  { %3860 = vrcp.f32 %v1936_v61 }
0x10c0   :  { %v1939_v62 = vpop.xlane.xlu0 %1938 }
0x10c1   :  { %3862 = vrcp.f32 %v1939_v62 }
0x10c4   :  { %v2066_v5 = vpop.permute.xlu0 %2065 }
0x10c5   :  { %v2071_v7 = vsel %vm375_vm3, %v2066_v5, 0 }
0x10ca   :  { %v3861_v63 = vpop.eup %3860 }
0x10cb   :  { %v1942_v3 = vmul.f32 %v3861_v63, %v3857_v54 }
0x10ce   :  { %v3863_v0 = vpop.eup %3862 }
0x10cf   :  { %v1943_v4 = vmul.f32 %v3863_v0, %v3859_v57  ;;  %v3762_v57 = vld [vmem:[%s4990_s18 + $0x68] sm:$0xff]  }
0x10d1   :  { %v1944_v6 = vpack.c.bf16 %v1943_v4, %v1942_v3 }
0x10d3   :  { %3518 = vmatmul.mubr.msk.bf16.vlgmr.msra.gmra.mxu1 %vm799_vm4, %v1944_v6 }
0x10d4   :  { %3534 = vmatpush3.bf16.xpose.msra.mxu1 %v2071_v7  ;;  %3535 = vmatprep.mubr.msk.bf16.mxu1 %vm4332_vm0, %v4331_v2  ;;  %v3764_v7 = vld [vmem:[#allocation17 + $0xf0] ss:$8 sps:$4 sm:$0xff]  }
0x10d5   :  { %3539 = vmatprep.subr.bf16.mxu1 %v4331_v2 }
0x10db   :  { %3536 = vmatmul.mubr.msk.bf16.vlgmr.msra.gmra.mxu1 %vm375_vm3, %v2063_v12  ;;  %v3766_v12 = vld [vmem:[#allocation17 + $0xf4] ss:$8 sps:$4 sm:$0xff]  }
0x10dc   :  { %3541 = vmatprep.mubr.msk.bf16.mxu1 %vm4332_vm0, %v4331_v2 }
0x1193   :  { %v1983_v20 = vpop.f32.mrf.mxu1 }
0x1195   :  { %v3519_v21 = vpop.f32.mrf.mxu1 }
0x1197   :  { %v1986_v22 = vpop.f32.mrf.mxu1 }
0x1198   :  { %v1990_v23 = vpack.c.bf16 %v1986_v22, %v1983_v20 }
0x1199   :  { %v3520_v24 = vpop.f32.mrf.mxu1 }
0x119a   :  { %3530 = vmatmul.mubr.msk.bf16.vlgmr.msra.gmra.mxu0 %vm375_vm3, %v1990_v23 }
0x119b   :  { %v2107_v25 = vpop.f32.mrf.mxu1  ;;  %3553 = vmatprep.mubr.msk.bf16.mxu0 %vm4332_vm0, %v4331_v2  ;;  %3546 = vmatpush3.bf16.msra.mxu0 %v3760_v47 }
0x119c   :  { %v2108_v9 = vadd.f32 %v2107_v25, %v4647_v38  ;;  %3547 = vmatprep.subr.bf16.mxu0 %v4331_v2 }
0x119d   :  { %v3537_v26 = vpop.f32.mrf.mxu1 }
0x119e   :  { %v2114_v27 = vsel %vm799_vm4, %v2108_v9, -inf  ;;  %v3767_v26 = vld [vmem:[#allocation17 + $0xe0] ss:$8 sps:$4 sm:$0xff]  }
0x119f   :  { %2115 = vmax.xlane.f32.xlu0 %v2114_v27  ;;  %v2110_v28 = vpop.f32.mrf.mxu1  ;;  %3548 = vmatpush3.bf16.msra.mxu0 %v3761_v50  ;;  %v3772_v27 = vld [vmem:[#allocation17 + $0xd4] ss:$8 sps:$4 sm:$0xff]  }
0x11a0   :  { %v2111_v29 = vadd.f32 %v2110_v28, %v4653_v42  ;;  %3549 = vmatprep.subr.bf16.mxu0 %v4331_v2  ;;  %v3770_v28 = vld [vmem:[#allocation17 + $0xd0] ss:$8 sps:$4 sm:$0xff]   ;;  %v3227_v50 = vld [vmem:[#allocation15 + $0x1] ss:$0 sm:$0xff] }
0x11a1   :  { %v3538_v30 = vpop.f32.mrf.mxu1 }
0x11a2   :  { %v2117_v32 = vsel %vm799_vm4, %v2111_v29, -inf  ;;  %v3775_v30 = vld [vmem:[#allocation17 + $0xc4] ss:$8 sps:$4 sm:$0xff]  }
0x11a3   :  { %2118 = vmax.xlane.f32.xlu1 %v2117_v32  ;;  %3550 = vmatpush3.bf16.msra.mxu0 %v3762_v57  ;;  %v3778_v32 = vld [vmem:[#allocation17 + $0xb4] ss:$8 sps:$4 sm:$0xff]   ;;  %v3793_v57 = vld [vmem:[#allocation20 + $0xa8] sm:$0xff]  }
0x11a4   :  { %3551 = vmatprep.subr.bf16.mxu0 %v4331_v2 }
0x11a7   :  { %3552 = vmatpush3.bf16.msra.mxu0 %v3763_v58  ;;  %v3794_v58 = vld [vmem:[#allocation20 + $0xe0] sm:$0xff]  }
0x11b4   :  { %2138 = vrot.lane.b32.xlu1 %v4766_v41, %s4315_s19  ;;  %v1871_v41 = vadd.f32 %v3211_v44, %v4749_v17 }
0x1228   :  { %v2116_v33 = vpop.xlane.xlu0 %2115 }
0x1229   :  { %v2120_v55 = vsub.f32 %v2108_v9, %v2116_v33  ;;  %v3769_v9 = vld [vmem:[#allocation17 + $0xe4] ss:$8 sps:$4 sm:$0xff]   ;;  %v3776_v33 = vld [vmem:[#allocation17 + $0xb0] ss:$8 sps:$4 sm:$0xff]  }
0x122b   :  { %v2122_v34 = vmul.f32 1.442695, %v2120_v55  ;;  %v3781_v55 = vld [vmem:[#allocation17 + $0xa4] ss:$8 sps:$4 sm:$0xff]  }
0x122c   :  { %v2119_v56 = vpop.xlane.xlu1 %2118 }
0x122d   :  { %3864 = vpow2.f32 %v2122_v34  ;;  %v2121_v38 = vsub.f32 %v2111_v29, %v2119_v56  ;;  %v3773_v29 = vld [vmem:[#allocation17 + $0xc0] ss:$8 sps:$4 sm:$0xff]   ;;  %v3784_v56 = vld [vmem:[#allocation17 + $0x94] ss:$8 sps:$4 sm:$0xff]  }
0x122e   :  { %v3779_v34 = vld [vmem:[#allocation17 + $0xa0] ss:$8 sps:$4 sm:$0xff]  }
0x122f   :  { %v2124_v35 = vmul.f32 1.442695, %v2121_v38  ;;  %v3782_v38 = vld [vmem:[#allocation17 + $0x90] ss:$8 sps:$4 sm:$0xff]  }
0x1230   :  { %v2139_v36 = vpop.permute.xlu1 %2138 }
0x1231   :  { %3866 = vpow2.f32 %v2124_v35  ;;  %3540 = vmatpush3.bf16.msra.mxu1 %v2139_v36  ;;  %v3787_v35 = vld [vmem:[#allocation17 + $0x84] ss:$8 sps:$4 sm:$0xff]   ;;  %v3785_v36 = vld [vmem:[#allocation17 + $0x80] ss:$8 sps:$4 sm:$0xff]  }
0x1232   :  { %2409 = vmatprep.subr.bf16.mxu1 %v3766_v12 }
0x123a   :  { %v3865_v39 = vpop.eup %3864 }
0x123b   :  { %v2126_v42 = vsel %vm799_vm4, %v3865_v39, 0.0 }
0x123c   :  { %2127 = vadd.xlane.f32.xlu0 %v2126_v42 }
0x123e   :  { %v3867_v40 = vpop.eup %3866 }
0x123f   :  { %v2129_v43 = vsel %vm799_vm4, %v3867_v40, 0.0 }
0x1240   :  { %2130 = vadd.xlane.f32.xlu0 %v2129_v43 }
0x125a   :  { %v2052_v31 = vpop.f32.mrf.mxu0 }
0x125b   :  { %v2059_v45 = vadd.f32 %v2052_v31, %v1871_v41 }
0x125c   :  { %v3531_v46 = vpop.f32.mrf.mxu0 }
0x125d   :  { %v3226_v46 = vld [vmem:[#allocation14 + $0x1] ss:$0 sm:$0xff] }
0x125e   :  { %v2055_v49 = vpop.f32.mrf.mxu0 }
0x125f   :  { %v2060_v51 = vadd.f32 %v2055_v49, %v1872_v48 }
0x1260   :  { %v3532_v52 = vpop.f32.mrf.mxu0 }
0x12c5   :  { %v2128_v17 = vpop.xlane.xlu0 %2127 }
0x12c6   :  { %3868 = vrcp.f32 %v2128_v17 }
0x12c9   :  { %v2131_v37 = vpop.xlane.xlu0 %2130 }
0x12ca   :  { %3870 = vrcp.f32 %v2131_v37 }
0x12d3   :  { %v3869_v8 = vpop.eup %3868 }
0x12d4   :  { %v2134_v18 = vmul.f32 %v3869_v8, %v3865_v39  ;;  %v3788_v8 = vld [vmem:[#allocation20 + $0xf8] sm:$0xff]  }
0x12d5   :  { %3367 = vmatprep.subr.bf16.mxu0 %v3788_v8 }
0x12d7   :  { %v3871_v53 = vpop.eup %3870 }
0x12d8   :  { %v2135_v54 = vmul.f32 %v3871_v53, %v3867_v40  ;;  %v3789_v53 = vld [vmem:[#allocation20 + $0xb8] sm:$0xff]  }
0x12da   :  { %v2136_v11 = vpack.c.bf16 %v2135_v54, %v2134_v18  ;;  %v3790_v18 = vld [vmem:[#allocation20 + $0xf0] sm:$0xff]  }
0x12db   :  { %v3791_v54 = vld [vmem:[#allocation20 + $0xb0] sm:$0xff]  }
0x12dc   :  { %3542 = vmatmul.mubr.msk.bf16.vlgmr.msra.gmra.mxu1 %vm799_vm4, %v2136_v11  ;;  %v3792_v11 = vld [vmem:[#allocation20 + $0xe8] sm:$0xff]  }
0x12dd   :  { %2441 = vmatprep.mubr.bf16.mxu1 %v4330_v1  ;;  %2410 = vmatpush1.bf16.msra.mxu1 %v3764_v7 }
0x12de   :  { %2411 = vmatprep.subr.bf16.mxu1 %v3769_v9 }
0x12e1   :  { %2412 = vmatpush1.bf16.msra.mxu1 %v3767_v26 }
0x12e2   :  { %2413 = vmatprep.subr.bf16.mxu1 %v3772_v27 }
0x12e5   :  { %2414 = vmatpush1.bf16.msra.mxu1 %v3770_v28 }
0x12e6   :  { %2415 = vmatprep.subr.bf16.mxu1 %v3775_v30 }
0x12e9   :  { %2416 = vmatpush1.bf16.msra.mxu1 %v3773_v29 }
0x12ea   :  { %2417 = vmatprep.subr.bf16.mxu1 %v3778_v32 }
0x12ed   :  { %2418 = vmatpush1.bf16.msra.mxu1 %v3776_v33 }
0x12ee   :  { %2419 = vmatprep.subr.bf16.mxu1 %v3781_v55 }
0x12f1   :  { %2420 = vmatpush1.bf16.msra.mxu1 %v3779_v34 }
0x12f2   :  { %2421 = vmatprep.subr.bf16.mxu1 %v3784_v56 }
0x12f5   :  { %2422 = vmatpush1.bf16.msra.mxu1 %v3782_v38 }
0x12f6   :  { %2423 = vmatprep.subr.bf16.mxu1 %v3787_v35 }
0x12f9   :  { %2424 = vmatpush1.bf16.msra.mxu1 %v3785_v36 }
0x12fa   :  { %3557 = vmatprep.subr.bf16.mxu1 %v4331_v2 }
0x139c   :  { %v2178_v59 = vpop.f32.mrf.mxu1 }
0x139e   :  { %v3543_v60 = vpop.f32.mrf.mxu1 }
0x139f   :  { %v3796_v60 = vld [vmem:[#allocation20 + $0xd8] sm:$0xff]  }
0x13a0   :  { %v2181_v61 = vpop.f32.mrf.mxu1 }
0x13a1   :  { %v2185_v62 = vpack.c.bf16 %v2181_v61, %v2178_v59  ;;  %v3795_v59 = vld [vmem:[#allocation20 + $0xa0] sm:$0xff]   ;;  %v3797_v61 = vld [vmem:[#allocation20 + $0x98] sm:$0xff]  }
0x13a2   :  { %v3544_v63 = vpop.f32.mrf.mxu1 }
0x13a3   :  { %3554 = vmatmul.mubr.msk.bf16.vlgmr.msra.gmra.mxu0 %vm375_vm3, %v2185_v62  ;;  %v3798_v62 = vld [vmem:[#allocation20 + $0xd0] sm:$0xff]  }
0x13a4   :  { %3368 = vmatpush3.bf16.msra.mxu0 %v3789_v53  ;;  %v3799_v63 = vld [vmem:[#allocation20 + $0x90] sm:$0xff]  }
0x13a5   :  { %3369 = vmatprep.subr.bf16.mxu0 %v3790_v18 }
0x13a8   :  { %3370 = vmatpush3.bf16.msra.mxu0 %v3791_v54 }
0x13a9   :  { %3371 = vmatprep.subr.bf16.mxu0 %v3792_v11 }
0x13ac   :  { %3372 = vmatpush3.bf16.msra.mxu0 %v3793_v57 }
0x13ad   :  { %3373 = vmatprep.subr.bf16.mxu0 %v3794_v58 }
0x13b0   :  { %3374 = vmatpush3.bf16.msra.mxu0 %v3795_v59  ;;  %v3244_v59 = vld [vmem:[#allocation21 + $0x1] ss:$0 sm:$0xff] }
0x13b1   :  { %3375 = vmatprep.subr.bf16.mxu0 %v3796_v60 }
0x13b4   :  { %3376 = vmatpush3.bf16.msra.mxu0 %v3797_v61 }
0x13b5   :  { %3377 = vmatprep.subr.bf16.mxu0 %v3798_v62 }
0x13b8   :  { %3378 = vmatpush3.bf16.msra.mxu0 %v3799_v63 }
0x1463   :  { %v2247_v1 = vpop.f32.mrf.mxu0 }
0x1464   :  { %v2254_v0 = vadd.f32 %v2247_v1, %v2059_v45  ;;  %v3800_v1 = vld [vmem:[#allocation20 + $0xc8] sm:$0xff]  }
0x1465   :  { %v3555_v3 = vpop.f32.mrf.mxu0  ;;  %3379 = vmatprep.subr.bf16.mxu0 %v3800_v1 }
0x1466   :  { %2260 = vadd.xlane.f32.xlu0 %v2254_v0  ;;  %v3802_v3 = vld [vmem:[#allocation20 + $0xc0] sm:$0xff]  }
0x1467   :  { %v2250_v4 = vpop.f32.mrf.mxu0 }
0x1468   :  { %v2255_v5 = vadd.f32 %v2250_v4, %v2060_v51  ;;  %v3803_v4 = vld [vmem:[#allocation20 + $0x80] sm:$0xff]  }
0x1469   :  { %v3556_v6 = vpop.f32.mrf.mxu0 }
0x146a   :  { %2262 = vadd.xlane.f32.xlu0 %v2255_v5 }
0x14ef   :  { %v2261_v15 = vpop.xlane.xlu0 %2260 }
0x14f0   :  { %v2264_v19 = vmul.f32 0.0078125, %v2261_v15 }
0x14f2   :  { %v2266_v20 = vsub.f32 %v2254_v0, %v2264_v19  ;;  %v3801_v0 = vld [vmem:[#allocation20 + $0x88] sm:$0xff]  }
0x14f3   :  { %v2263_v21 = vpop.xlane.xlu0 %2262  ;;  %3380 = vmatpush3.bf16.msra.mxu0 %v3801_v0 }
0x14f4   :  { %v2265_v22 = vmul.f32 0.0078125, %v2263_v21  ;;  %v2268_v23 = vmul.f32 %v2266_v20, %v2266_v20  ;;  %3381 = vmatprep.subr.bf16.mxu0 %v3802_v3 }
0x14f6   :  { %v2267_v24 = vsub.f32 %v2255_v5, %v2265_v22  ;;  %2270 = vadd.xlane.f32.xlu0 %v2268_v23  ;;  %v2317_v5 = vld [vmem:[#allocation18 + $0x2] sm:$0x3] }
0x14f7   :  { %3382 = vmatpush3.bf16.msra.mxu0 %v3803_v4  ;;  %v2322_v6 = vrot.slane %v2317_v5, %v4624_v14  ;;  %v2326_v7 = vrot.slane %v2317_v5, %v4627_v16 }
0x14f8   :  { %v2269_v25 = vmul.f32 %v2267_v24, %v2267_v24  ;;  %3583 = vmatprep.subr.bf16.mxu0 %v4331_v2 }
0x14fa   :  { %2272 = vadd.xlane.f32.xlu0 %v2269_v25 }
0x157f   :  { %v2271_v39 = vpop.xlane.xlu0 %2270 }
0x1580   :  { %v2274_v42 = vmul.f32 0.0078125, %v2271_v39 }
0x1582   :  { %v2276_v40 = vadd.f32 1e-12, %v2274_v42 }
0x1583   :  { %v2273_v43 = vpop.xlane.xlu0 %2272 }
0x1584   :  { %3872 = vrsqrt.f32 %v2276_v40  ;;  %v2275_v44 = vmul.f32 0.0078125, %v2273_v43 }
0x1586   :  { %v2277_v41 = vadd.f32 1e-12, %v2275_v44 }
0x1588   :  { %3874 = vrsqrt.f32 %v2277_v41 }
0x1591   :  { %v3873_v31 = vpop.eup %3872 }
0x1592   :  { %v2280_v45 = vmul.f32 %v3873_v31, %v2266_v20 }
0x1594   :  { %v2288_v49 = vmul.f32 %v3226_v46, %v2280_v45 }
0x1595   :  { %v3875_v47 = vpop.eup %3874 }
0x1596   :  { %v2281_v48 = vmul.f32 %v3875_v47, %v2267_v24  ;;  %v4836_v52 = vadd.f32 %v3227_v50, %v2288_v49 }
0x1598   :  { %v2289_v51 = vmul.f32 %v3226_v46, %v2281_v48 }
0x159a   :  { %v4838_v17 = vadd.f32 %v3227_v50, %v2289_v51 }
0x159c   :  { %v2298_v37 = vpack.c.bf16 %v4838_v17, %v4836_v52 }
0x159e   :  { %2442 = vmatmul.mubr.bf16.vlgmr.msra.gmra.mxu1 %v2298_v37 }
0x159f   :  { %3559 = vmatprep.mubr.msk.bf16.mxu1 %vm4332_vm0, %v4331_v2 }
0x165e   :  { %v2443_v12 = vpop.f32.mrf.mxu1 }
0x165f   :  { %v2444_v15 = vadd.f32 %v2443_v12, %v2322_v6 }
0x1660   :  { %v2445_v19 = vpop.f32.mrf.mxu1 }
0x1661   :  { %v2456_v20 = vmul.f32 0.044715, %v2444_v15  ;;  %v2446_v21 = vadd.f32 %v2445_v19, %v2326_v7  ;;  %v2452_v37 = vmul.f32 0.5, %v2444_v15 }
0x1662   :  { %v2447_v22 = vpop.f32.mrf.mxu1 }
0x1663   :  { %v2460_v23 = vmul.f32 %v2456_v20, %v2444_v15  ;;  %v2457_v24 = vmul.f32 0.044715, %v2446_v21  ;;  %v2448_v25 = vadd.f32 %v2447_v22, %v2322_v6  ;;  %v2453_v49 = vmul.f32 0.5, %v2446_v21 }
0x1664   :  { %v2449_v9 = vpop.f32.mrf.mxu1 }
0x1665   :  { %v2464_v26 = vmul.f32 %v2460_v23, %v2444_v15  ;;  %v2461_v27 = vmul.f32 %v2457_v24, %v2446_v21  ;;  %v2458_v28 = vmul.f32 0.044715, %v2448_v25  ;;  %v2450_v29 = vadd.f32 %v2449_v9, %v2326_v7 }
0x1666   :  { %v2454_v47 = vmul.f32 0.5, %v2448_v25 }
0x1667   :  { %v2468_v30 = vadd.f32 %v2464_v26, %v2444_v15  ;;  %v2465_v32 = vmul.f32 %v2461_v27, %v2446_v21  ;;  %v2462_v33 = vmul.f32 %v2458_v28, %v2448_v25  ;;  %v2459_v14 = vmul.f32 0.044715, %v2450_v29 }
0x1668   :  { %v2455_v50 = vmul.f32 0.5, %v2450_v29  ;;  %v2714_v28 = vmul.u32 8, %v4621_v13  ;;  %v3806_v13 = vld [vmem:[%s4954_s20 + $0x28] sm:$0xff]  }
0x1669   :  { %v2466_v55 = vmul.f32 %v2462_v33, %v2448_v25  ;;  %v2463_v16 = vmul.f32 %v2459_v14, %v2450_v29  ;;  %v2469_v34 = vadd.f32 %v2465_v32, %v2446_v21  ;;  %v2472_v56 = vmul.f32 0.7978846, %v2468_v30  ;;  %v3262_v14 = vld [vmem:[#allocation24 + $0x1] ss:$0 sm:$0xff] }
0x166a   :  { %vm2715_vm5 = vcmp.eq.s32.totalorder %v4576_v10, %v2714_v28  ;;  %v3805_v10 = vld [vmem:[%s4954_s20 + $0x30] sm:$0xff]  }
0x166b   :  { %v2470_v38 = vadd.f32 %v2466_v55, %v2448_v25  ;;  %v2467_v35 = vmul.f32 %v2463_v16, %v2450_v29  ;;  %v2473_v36 = vmul.f32 0.7978846, %v2469_v34  ;;  %v3263_v16 = vsel %vm2715_vm5, 1.0, %v4331_v2 }
0x166d   :  { %v2474_v39 = vmul.f32 0.7978846, %v2470_v38  ;;  %v2471_v42 = vadd.f32 %v2467_v35, %v2450_v29  ;;  %3876 = vtanh.f32 %v2473_v36  ;;  %v3261_v29 = vld [vmem:[#allocation23 + $0x1] ss:$0 sm:$0xff]  ;;  %v2718_v35 = vpack.c.bf16 %v3263_v16, %v3263_v16 }
0x166e   :  { %3878 = vtanh.f32 %v2472_v56  ;;  %v3804_v36 = vld [vmem:[%s4954_s20 + $0x38] sm:$0xff]  }
0x166f   :  { %3880 = vtanh.f32 %v2474_v39  ;;  %v2475_v40 = vmul.f32 0.7978846, %v2471_v42  ;;  %v3807_v39 = vld [vmem:[%s4954_s20 + $0x20] sm:$0xff]   ;;  %v3808_v42 = vld [vmem:[%s4954_s20 + $0x18] sm:$0xff]  }
0x1671   :  { %3882 = vtanh.f32 %v2475_v40  ;;  %v3809_v40 = vld [vmem:[%s4954_s20 + $0x10] sm:$0xff]  }
0x167a   :  { %v3877_v43 = vpop.eup %3876 }
0x167b   :  { %v3879_v44 = vpop.eup %3878  ;;  %v2481_v31 = vadd.f32 1.0, %v3877_v43  ;;  %v3810_v43 = vld [vmem:[%s4954_s20 + $0x8] sm:$0xff]  }
0x167c   :  { %v3881_v41 = vpop.eup %3880  ;;  %v2480_v48 = vadd.f32 1.0, %v3879_v44  ;;  %v3811_v44 = vld [vmem:[%s4954_s20] sm:$0xff]  }
0x167d   :  { %v2482_v45 = vadd.f32 1.0, %v3881_v41  ;;  %v2485_v53 = vmul.f32 %v2481_v31, %v2453_v49  ;;  %v3812_v41 = vld [vmem:[%s4956_s22 + $0x38] sm:$0xff]   ;;  %v3813_v31 = vld [vmem:[%s4956_s22 + $0x30] sm:$0xff]  }
0x167e   :  { %v3883_v46 = vpop.eup %3882  ;;  %v2484_v54 = vmul.f32 %v2480_v48, %v2452_v37  ;;  %v3816_v37 = vld [vmem:[%s4956_s22 + $0x18] sm:$0xff]  }
0x167f   :  { %v2483_v51 = vadd.f32 1.0, %v3883_v46  ;;  %v2486_v8 = vmul.f32 %v2482_v45, %v2454_v47  ;;  %v3814_v45 = vld [vmem:[%s4956_s22 + $0x28] sm:$0xff]  }
0x1681   :  { %v2487_v18 = vmul.f32 %v2483_v51, %v2455_v50  ;;  %v2488_v57 = vpack.c.bf16 %v2486_v8, %v2484_v54  ;;  %v3815_v51 = vld [vmem:[%s4956_s22 + $0x20] sm:$0xff]   ;;  %v3817_v8 = vld [vmem:[%s4956_s22 + $0x10] sm:$0xff]   ;;  %v3265_v54 = vld [vmem:[#allocation26] ss:$0 sm:$0xff] }
0x1683   :  { %v2489_v11 = vpack.c.bf16 %v2487_v18, %v2485_v53  ;;  %v3818_v53 = vld [vmem:[%s4956_s22 + $0x8] sm:$0xff]   ;;  %v3819_v18 = vld [vmem:[%s4956_s22] sm:$0xff]  }
0x1685   :  { %2659 = vmatprep.mubr.bf16.mxu0 %v2489_v11 }
0x1686   :  { %2660 = vmatmul.mubr.bf16.vlgmr.msra.gmra.mxu0 %v2488_v57 }
0x1687   :  { %3599 = vmatprep.mubr.msk.bf16.mxu0 %vm4332_vm0, %v4331_v2  ;;  %3584 = vmatpush3.bf16.msra.mxu0 %v3812_v41 }
0x1688   :  { %3585 = vmatprep.subr.bf16.mxu0 %v4331_v2 }
0x168b   :  { %3586 = vmatpush3.bf16.msra.mxu0 %v3813_v31 }
0x168c   :  { %3587 = vmatprep.subr.bf16.mxu0 %v4331_v2 }
0x168f   :  { %3588 = vmatpush3.bf16.msra.mxu0 %v3814_v45 }
0x1690   :  { %3589 = vmatprep.subr.bf16.mxu0 %v4331_v2 }
0x1693   :  { %3590 = vmatpush3.bf16.msra.mxu0 %v3815_v51 }
0x1694   :  { %3591 = vmatprep.subr.bf16.mxu0 %v4331_v2 }
0x1697   :  { %3592 = vmatpush3.bf16.msra.mxu0 %v3816_v37 }
0x1698   :  { %3593 = vmatprep.subr.bf16.mxu0 %v4331_v2 }
0x169b   :  { %3594 = vmatpush3.bf16.msra.mxu0 %v3817_v8 }
0x169c   :  { %3595 = vmatprep.subr.bf16.mxu0 %v4331_v2 }
0x169f   :  { %3596 = vmatpush3.bf16.msra.mxu0 %v3818_v53 }
0x16a0   :  { %3597 = vmatprep.subr.bf16.mxu0 %v4331_v2 }
0x16a3   :  { %3598 = vmatpush3.bf16.msra.mxu0 %v3819_v18 }
0x1746   :  { %v3383_v58 = vpop.f32.mrf.mxu0 }
0x1748   :  { %v3384_v60 = vpop.f32.mrf.mxu0 }
0x1749   :  { %v3385_v61 = vadd.f32 %v3384_v60, %v3383_v58 }
0x174a   :  { %v3386_v62 = vpop.f32.mrf.mxu0 }
0x174b   :  { %v2662_v63 = vadd.f32 %v3385_v61, %v3244_v59 }
0x174c   :  { %v3387_v1 = vpop.f32.mrf.mxu0 }
0x174d   :  { %v3388_v0 = vadd.f32 %v3387_v1, %v3386_v62  ;;  %v2668_v3 = vadd.f32 %v2662_v63, %v4836_v52  ;;  %v3274_v63 = vld [vmem:[#allocation27] ss:$0 sm:$0xff] }
0x174f   :  { %v2665_v4 = vadd.f32 %v3388_v0, %v3244_v59  ;;  %2674 = vadd.xlane.f32.xlu1 %v2668_v3  ;;  %v3283_v0 = vld [vmem:[#allocation29] ss:$0 sm:$0xff] }
0x1751   :  { %v2669_v5 = vadd.f32 %v2665_v4, %v4838_v17 }
0x1753   :  { %2676 = vadd.xlane.f32.xlu0 %v2669_v5 }
0x17d8   :  { %v2675_v6 = vpop.xlane.xlu1 %2674 }
0x17d9   :  { %v2678_v7 = vmul.f32 0.0078125, %v2675_v6 }
0x17db   :  { %v2680_v12 = vsub.f32 %v2668_v3, %v2678_v7  ;;  %v3284_v3 = vld [vmem:[#allocation30] ss:$0 sm:$0xff] }
0x17dc   :  { %v2677_v15 = vpop.xlane.xlu0 %2676 }
0x17dd   :  { %v2679_v19 = vmul.f32 0.0078125, %v2677_v15  ;;  %v2682_v20 = vmul.f32 %v2680_v12, %v2680_v12 }
0x17df   :  { %v2681_v21 = vsub.f32 %v2669_v5, %v2679_v19  ;;  %2684 = vadd.xlane.f32.xlu0 %v2682_v20 }
0x17e1   :  { %v2683_v22 = vmul.f32 %v2681_v21, %v2681_v21 }
0x17e3   :  { %2686 = vadd.xlane.f32.xlu0 %v2683_v22  ;;  %v3285_v22 = vld [vmem:[#allocation2] ss:$0 sm:$0xff] }
0x1868   :  { %v2685_v23 = vpop.xlane.xlu0 %2684 }
0x1869   :  { %v2688_v24 = vmul.f32 0.0078125, %v2685_v23 }
0x186b   :  { %v2690_v25 = vadd.f32 1e-12, %v2688_v24 }
0x186c   :  { %v2687_v9 = vpop.xlane.xlu0 %2686 }
0x186d   :  { %3884 = vrsqrt.f32 %v2690_v25  ;;  %v2689_v52 = vmul.f32 0.0078125, %v2687_v9 }
0x186f   :  { %v2691_v26 = vadd.f32 1e-12, %v2689_v52 }
0x1871   :  { %3886 = vrsqrt.f32 %v2691_v26 }
0x187a   :  { %v3885_v17 = vpop.eup %3884 }
0x187b   :  { %v2694_v27 = vmul.f32 %v3885_v17, %v2680_v12 }
0x187d   :  { %v2702_v33 = vmul.f32 %v3261_v29, %v2694_v27 }
0x187e   :  { %v3887_v30 = vpop.eup %3886 }
0x187f   :  { %v2695_v32 = vmul.f32 %v3887_v30, %v2681_v21  ;;  %v2710_v34 = vadd.f32 %v3262_v14, %v2702_v33  ;;  %v3030_v30 = vld [vmem:[%s4992_s14] sm:$0x3] }
0x1880   :  { %v3039_v16 = vsub.f32 1.0, %v3030_v30 }
0x1881   :  { %v2703_v55 = vmul.f32 %v3261_v29, %v2695_v32 }
0x1883   :  { %v2711_v56 = vadd.f32 %v3262_v14, %v2703_v55 }
0x1885   :  { %v2719_v38 = vpack.c.bf16 %v2711_v56, %v2710_v34 }
0x1887   :  { %3558 = vmatpush3.bf16.msra.mxu1 %v2719_v38 }
0x1888   :  { %3563 = vmatprep.subr.bf16.mxu1 %v4331_v2 }
0x188a   :  { %3560 = vmatmul.mubr.msk.bf16.vlgmr.msra.gmra.mxu1 %vm799_vm4, %v2718_v35 }
0x188b   :  { %3564 = vmatpush3.bf16.msra.mxu1 %v3804_v36  ;;  %3579 = vmatprep.mubr.msk.bf16.mxu1 %vm4332_vm0, %v4331_v2 }
0x188c   :  { %3565 = vmatprep.subr.bf16.mxu1 %v4331_v2 }
0x188f   :  { %3566 = vmatpush3.bf16.msra.mxu1 %v3805_v10 }
0x1890   :  { %3567 = vmatprep.subr.bf16.mxu1 %v4331_v2 }
0x1893   :  { %3568 = vmatpush3.bf16.msra.mxu1 %v3806_v13 }
0x1894   :  { %3569 = vmatprep.subr.bf16.mxu1 %v4331_v2 }
0x1897   :  { %3570 = vmatpush3.bf16.msra.mxu1 %v3807_v39 }
0x1898   :  { %3571 = vmatprep.subr.bf16.mxu1 %v4331_v2 }
0x189b   :  { %3572 = vmatpush3.bf16.msra.mxu1 %v3808_v42 }
0x189c   :  { %3573 = vmatprep.subr.bf16.mxu1 %v4331_v2 }
0x189f   :  { %3574 = vmatpush3.bf16.msra.mxu1 %v3809_v40 }
0x18a0   :  { %3575 = vmatprep.subr.bf16.mxu1 %v4331_v2 }
0x18a3   :  { %3576 = vmatpush3.bf16.msra.mxu1 %v3810_v43 }
0x18a4   :  { %3577 = vmatprep.subr.bf16.mxu1 %v4331_v2  ;;  %v3000_v2 = vld [vmem:[%s4991_s25] sm:$0x3] }
0x18a5   :  { %v3008_v7 = vmul.f32 %v3284_v3, %v3000_v2 }
0x18a7   :  { %3578 = vmatpush3.bf16.msra.mxu1 %v3811_v44  ;;  %v3010_v20 = vsel %vm3009_vm7, %v3008_v7, 0.0 }
0x194a   :  { %v2757_v46 = vpop.f32.mrf.mxu1 }
0x194b   :  { %v2763_v47 = vpack.c.bf16 %v2757_v46, %v2757_v46 }
0x194c   :  { %v3561_v48 = vpop.f32.mrf.mxu1 }
0x194d   :  { %3580 = vmatmul.mubr.bf16.vlgmr.msra.gmra.mxu1 %v2763_v47 }
0x194e   :  { %v2760_v49 = vpop.f32.mrf.mxu1 }
0x1950   :  { %v3562_v50 = vpop.f32.mrf.mxu1 }
0x1a0d   :  { %v2869_v11 = vpop.f32.mrf.mxu1 }
0x1a0e   :  { %v2870_v57 = vadd.f32 %v3265_v54, %v2869_v11 }
0x1a0f   :  { %v3581_v58 = vpop.f32.mrf.mxu1 }
0x1a10   :  { %3888 = vtanh.f32 %v2870_v57 }
0x1a11   :  { %v2872_v59 = vpop.f32.mrf.mxu1 }
0x1a13   :  { %v3582_v60 = vpop.f32.mrf.mxu1 }
0x1a1d   :  { %v3889_v61 = vpop.eup %3888 }
0x1a1e   :  { %v2876_v62 = vpack.c.bf16 %v3889_v61, %v3889_v61 }
0x1a20   :  { %3600 = vmatmul.mubr.bf16.vlgmr.msra.gmra.mxu0 %v2876_v62 }
0x1ae0   :  { %v2982_v1 = vpop.f32.mrf.mxu0 }
0x1ae1   :  { %v2983_v4 = vadd.f32 %v3274_v63, %v2982_v1 }
0x1ae2   :  { %v3601_v5 = vpop.f32.mrf.mxu0 }
0x1ae3   :  { %v2995_v6 = vmul.f32 %v3283_v0, %v2983_v4 }
0x1ae4   :  { %v2985_v12 = vpop.f32.mrf.mxu0 }
0x1ae5   :  { %v2997_v15 = vsel %vm2996_vm6, %v2995_v6, 0.0 }
0x1ae6   :  { %2998 = vadd.xlane.f32.xlu0 %v2997_v15  ;;  %v3602_v19 = vpop.f32.mrf.mxu0 }
0x1aea   :  { %3011 = vadd.xlane.f32.xlu0 %v3010_v20 }
0x1b6f   :  { %v2999_v21 = vpop.xlane.xlu0 %2998 }
0x1b73   :  { %v3012_v23 = vpop.xlane.xlu0 %3011 }
0x1b74   :  { %v3013_v24 = vadd.f32 %v3012_v23, %v2999_v21 }
0x1b76   :  { %v3021_v25 = vadd.f32 %v3285_v22, %v3013_v24 }
0x1b78   :  { %v3022_v9 = vsub.f32 0.0, %v3021_v25 }
0x1b7a   :  { %v3023_v52 = vmul.f32 1.442695, %v3022_v9 }
0x1b7c   :  { %3890 = vpow2.f32 %v3023_v52 }
0x1b89   :  { %v3891_v26 = vpop.eup %3890 }
0x1b8a   :  { %v3025_v17 = vadd.f32 1.0, %v3891_v26 }
0x1b8c   :  { %3892 = vrcp.f32 %v3025_v17 }
0x1b99   :  { %v3893_v27 = vpop.eup %3892 }
0x1b9a   :  { %3894 = vlog2.f32 %v3893_v27  ;;  %v3034_v28 = vsub.f32 1.0, %v3893_v27  ;;  %3029 = vst.msk [vmem:[%s4961_s27] sm:$0x3] %vm3028_vm8, %v3893_v27  ;;  %s4333_s27 = smov [#allocation32]  }
0x1b9b   :  { %s3066_s23 = sshll.u32 %s4333_s27, 4  ;;  %s3067_s23 = int_to_ptr.vmem [resolvable:$true] %s3066_s23 }
0x1b9c   :  { %3896 = vlog2.f32 %v3034_v28  ;;  %s4258_s1 = scalar_lea.vmem %s3067_s23, 16  ;;  %s4262_s4 = scalar_lea.vmem %s3067_s23, 32 }
0x1b9d   :  { %p4259_p6 = scmp.ne.s32.totalorder %s3067_s23, %s4258_s1  ;;  %p4263_p7 = scmp.lt.s32.totalorder %s3067_s23, %s3067_s23 }
0x1b9e   :  { %p4264_p8 = scmp.lt.s32.totalorder %s4262_s4, %s4258_s1 }
0x1ba0   :  { %p4265_p9 = por %p4264_p8, %p4263_p7 }
0x1ba2   :  { %p4266_p10 = pnand %p4265_p9, %p4259_p6 }
0x1ba7   :  { %v3895_v29 = vpop.eup %3894 }
0x1ba8   :  { %v3032_v32 = vmul.f32 0.6931472, %v3895_v29 }
0x1ba9   :  { %v3897_v33 = vpop.eup %3896 }
0x1baa   :  { %v3033_v14 = vmax.f32 %v3032_v32, -100.0  ;;  %v3036_v55 = vmul.f32 0.6931472, %v3897_v33 }
0x1bac   :  { %v3037_v34 = vmax.f32 %v3036_v55, -100.0  ;;  %v3038_v56 = vmul.f32 %v3033_v14, %v3030_v30 }
0x1bae   :  { %v3040_v38 = vmul.f32 %v3039_v16, %v3037_v34 }
0x1bb0   :  { %v3041_v35 = vadd.f32 %v3040_v38, %v3038_v56 }
0x1bb2   :  { %v3042_v36 = vsub.f32 0.0, %v3041_v35 }
0x1bb4   :  { %v3043_v10 = vsel %vm3028_vm8, %v3042_v36, 0.0 }
0x1bb5   :  { %3044 = vadd.xlane.f32.xlu0 %v3043_v10 }
0x1c3e   :  { %v3045_v13 = vpop.xlane.xlu0 %3044 }
0x1c3f   :  { %v3046_v39 = vrot.slane %v3045_v13, 4 }
0x1c41   :  { %v3047_v42 = vadd.f32 %v3046_v39, %v3045_v13 }
0x1c43   :  { %v3048_v40 = vrot.slane %v3047_v42, 2 }
0x1c45   :  { %v3049_v43 = vadd.f32 %v3048_v40, %v3047_v42 }
0x1c47   :  { %v3050_v44 = vrot.slane %v3049_v43, 1 }
0x1c49   :  { %v3051_v41 = vadd.f32 %v3050_v44, %v3049_v43 }
0x1c4b   :  { %3603 = vpush %v3051_v41 }
0x1c7c   :  { %s3604_s15 = spop %3603 }
0x1c7d   :  { %v3053_v31 = vstv %s3604_s15 }
0x1c7e   :  { %v3055_v45 = vmul.f32 0.5, %v3053_v31 }
0x1c80   :  { %3057 = vst.msk [vmem:[#allocation32] sm:$0x1] %vm3056_vm9, %v3055_v45 }
0x1c81   :  { %4269 = shalt.err (!%p4266_p10)
}
0x1c82   :  { %3069 = dma.vmem_to_hbm [thread:$0]  %s3067_s23, 16, %s4962_s28, [#allocation5]  }
0x1c83   :  { %4298 = dma.done.wait [#allocation5], 16  }
0x1c84   :  { %4299 = vsyncadd [#allocation5], 4294967280 }
0x1c85   :  { %3075 = vsyncpa [#allocation4], 1 }
0x1c86   :  { %3076 = vsyncpa [#allocation7], 1 }
0x1c87   :  { %3077 = vsyncpa [#allocation10], 1 }
0x1c88   :  { %3078 = vsyncpa [#allocation13], 1 }
0x1c89   :  { %3079 = vsyncpa [#allocation16], 1 }
0x1c8a   :  { %3080 = vsyncpa [#allocation19], 1 }
0x1c8b   :  { %3081 = vsyncpa [#allocation22], 1 }
0x1c8c   :  { %3082 = vsyncpa [#allocation25], 1 }
0x1c8d   :  { %3083 = vsyncpa [#allocation28], 1 }
0x1c8e   :  { %3084 = vsyncpa [#allocation31], 1 }
0x1c8f   :  { %3085 = vsyncpa [#allocation5], 1 }

</bundles_post_ra>
